<compile_context>
chip_gen: v7x
topology: tpu7x:2x2x1
jax: 0.10.0
libtpu: 0.0.40
codegen_flags: <defaults>
</compile_context>

<pallas_src>
import functools

import jax
import jax.numpy as jnp
from jax.experimental import pallas as pl
from jax.experimental.pallas import tpu as pltpu

_LANE = 128


def _round_up(v, m):
    return (v + m - 1) // m * m


def _physical_vmem_bytes():
    try:
        info = pltpu.get_tpu_info()
        return int(getattr(info, "vmem_capacity_bytes", 64 << 20))
    except Exception:
        return 64 << 20   # conservative: v7x per-TensorCore VMEM


def _vmem_limit(bytes_needed):
    # actual need + headroom, never above the physical per-core VMEM.
    phys = _physical_vmem_bytes()
    return int(min(max(bytes_needed + (4 << 20), 16 << 20), phys))


def _pick_hw_tile(hw, c, itemsize=4, budget=24 << 20, max_tile=4096):
    """Lane tile for the streaming pass: a multiple of 128, capped so the
    double-buffered x-in + out blocks (4 * C * tile * itemsize) stay within
    `budget`, and never larger than needed to cover hw."""
    hw_ceil = _round_up(hw, _LANE)
    cap = budget // max(1, 4 * c * itemsize)
    cap = max(_LANE, (cap // _LANE) * _LANE)
    cap = min(cap, max_tile)
    return min(hw_ceil, cap)


# -----------------------------------------------------------------------------
# K1: channel gate + channel-pooled stats (one read of x per batch element).
# -----------------------------------------------------------------------------
def _channel_stats_kernel(x_ref, w1_ref, b1_ref, w2_ref, b2_ref,
                          cgate_ref, stats_ref, *, inv_hw):
    x = x_ref[0].astype(jnp.float32)                        # (C, HW)
    c_dim, hw = x.shape

    # Global spatial average pool (exact f32 sum).  If HW is not a multiple of
    # the 128-lane width, zero the physical lane tail first so the lane-axis
    # reduction cannot pick up unspecified padding values.  (C is assumed to
    # behave under the sublane-axis reductions below, which respect the
    # logical shape; typical CBAM channel counts are multiples of 8.)
    if hw % _LANE != 0:
        lane = jax.lax.broadcasted_iota(jnp.int32, (c_dim, hw), 1)
        x_pool = jnp.where(lane < hw, x, 0.0)
    else:
        x_pool = x
    pooled = jnp.sum(x_pool, axis=1, keepdims=True) * inv_hw   # (C, 1)

    # 1x1-conv MLP on the MXU.  w2/b2 already carry the 2x from the reference
    # avg-pooling both the "avg" and "max" branches.
    hidden = jnp.dot(w1_ref[...], pooled,
                     preferred_element_type=jnp.float32) + b1_ref[...]
    hidden = jnp.maximum(hidden, 0.0)                          # (Bn, 1)
    att = jnp.dot(w2_ref[...], hidden,
                  preferred_element_type=jnp.float32) + b2_ref[...]
    cgate = jax.nn.sigmoid(att)                                # (C, 1)
    cgate_ref[0] = cgate.astype(cgate_ref.dtype)

    # Channel-attention output stays in VMEM; only the per-position channel
    # mean / max stats needed by the spatial attention go back to HBM
    # (single (2, HW) store).
    y = cgate * x                                              # (C, HW)
    mean_c = jnp.mean(y, axis=0, keepdims=True)                # (1, HW)
    max_c = jnp.max(y, axis=0, keepdims=True)                  # (1, HW)
    stats_ref[0] = jnp.concatenate([mean_c, max_c], axis=0).astype(stats_ref.dtype)


# -----------------------------------------------------------------------------
# K2: 7x7 spatial conv on the (2, H, W) stats -> sigmoid spatial gate,
#     emitted directly in the flattened lane-dense (1, HW) layout.
# -----------------------------------------------------------------------------
def _spatial_gate_kernel(cw_ref, cb_ref, sp_ref, gate_ref, *, ksize, height, width):
    att = jnp.zeros((height, width), jnp.float32)
    for c in range(2):
        for dh in range(ksize):
            for dw in range(ksize):
                w = cw_ref[(c * ksize + dh) * ksize + dw]            # SMEM scalar
                win = sp_ref[0, c, dh:dh + height, dw:dw + width]    # (H, W)
                att = att + w * win.astype(jnp.float32)
    sig = jax.nn.sigmoid(att + cb_ref[0])                            # (H, W)
    # Row-store into the flattened VMEM block; the HBM writeback is a single
    # dense (1, HW) DMA per batch element (lane-dense output).
    for h in range(height):
        gate_ref[0, :, pl.ds(h * width, width)] = sig[h:h + 1, :].astype(gate_ref.dtype)


# -----------------------------------------------------------------------------
# K3: out = (cgate * x) * sgate -- lane-dense, HW-tiled streaming pass.
# -----------------------------------------------------------------------------
def _apply_gates_kernel(x_ref, cgate_ref, sgate_ref, o_ref):
    x = x_ref[0].astype(jnp.float32)        # (C, hw_tile)
    cg = cgate_ref[0].astype(jnp.float32)   # (C, 1)
    sg = sgate_ref[0].astype(jnp.float32)   # (1, hw_tile)
    o_ref[0] = ((cg * x) * sg).astype(o_ref.dtype)


def cbam_forward(x, w1, b1, w2, b2, conv_w, conv_b):
    """CBAM forward.

    x: (N, C, H, W) f32
    w1: (Bn, C), b1: (Bn,)      -- 1x1 conv C -> Bn
    w2: (C, Bn), b2: (C,)       -- 1x1 conv Bn -> C
    conv_w: (1, 2, K, K), conv_b: (1,)  -- spatial-attention conv (OIHW)
    """
    N, C, H, W = x.shape
    Bn = w1.shape[0]
    K = conv_w.shape[-1]
    P = K // 2
    HW = H * W
    f32b = 4

    # Flattened spatial dim, no lane padding: kernels operate on the exact HW
    # extent (ragged tails are handled inside the kernels / by masked stores).
    x_flat = x.reshape(N, C, HW)

    # Fold the avg+max double count into the second 1x1 conv:
    # sigmoid(2*(W2 h + b2)) == sigmoid((2*W2) h + 2*b2)  (exact in f32).
    w1f = w1.astype(jnp.float32)
    b1c = b1.reshape(Bn, 1).astype(jnp.float32)
    w2s = (2.0 * w2).astype(jnp.float32)
    b2s = (2.0 * b2).reshape(C, 1).astype(jnp.float32)

    # ---------------- K1: channel gate + channel-pooled stats ----------------
    k1_bytes = (2 * C * HW                          # x block, double-buffered
                + 2 * (C + 2 * HW)                  # cgate + stats out blocks
                + 2 * (Bn * C + Bn + C * Bn + C)    # weight blocks
                + 3 * C * HW                        # y = cgate*x + temporaries
                ) * f32b
    cgate, stats = pl.pallas_call(
        functools.partial(_channel_stats_kernel, inv_hw=1.0 / HW),
        out_shape=(
            jax.ShapeDtypeStruct((N, C, 1), jnp.float32),
            jax.ShapeDtypeStruct((N, 2, HW), jnp.float32),
        ),
        grid_spec=pltpu.PrefetchScalarGridSpec(
            num_scalar_prefetch=0,
            grid=(N,),
            in_specs=[
                pl.BlockSpec((1, C, HW), lambda n: (n, 0, 0)),   # x
                pl.BlockSpec((Bn, C), lambda n: (0, 0)),         # W1
                pl.BlockSpec((Bn, 1), lambda n: (0, 0)),         # b1
                pl.BlockSpec((C, Bn), lambda n: (0, 0)),         # 2*W2
                pl.BlockSpec((C, 1), lambda n: (0, 0)),          # 2*b2
            ],
            out_specs=[
                pl.BlockSpec((1, C, 1), lambda n: (n, 0, 0)),    # channel gate
                pl.BlockSpec((1, 2, HW), lambda n: (n, 0, 0)),   # [mean_c, max_c]
            ],
        ),
        compiler_params=pltpu.CompilerParams(
            dimension_semantics=("parallel",),
            vmem_limit_bytes=_vmem_limit(k1_bytes)),
    )(x_flat, w1f, b1c, w2s, b2s)

    # ---------------- K2: spatial gate (7x7 conv + sigmoid) ----------------
    # Zero-pad the tiny (N, 2, H, W) stats for the "same" conv (2/C of x traffic).
    stats_hw = stats.reshape(N, 2, H, W)
    stats_pad = jnp.pad(stats_hw, ((0, 0), (0, 0), (P, P), (P, P)))
    Hp, Wp = H + 2 * P, W + 2 * P
    cw_flat = conv_w.reshape(-1).astype(jnp.float32)     # (2*K*K,)
    cb_flat = conv_b.reshape(-1).astype(jnp.float32)     # (1,)

    k2_bytes = (2 * 2 * Hp * Wp + 2 * HW + 4 * HW) * f32b
    sgate = pl.pallas_call(
        functools.partial(_spatial_gate_kernel, ksize=K, height=H, width=W),
        out_shape=jax.ShapeDtypeStruct((N, 1, HW), jnp.float32),
        grid_spec=pltpu.PrefetchScalarGridSpec(
            num_scalar_prefetch=0,
            grid=(N,),
            in_specs=[
                pl.BlockSpec(memory_space=pltpu.MemorySpace.SMEM),  # conv weights
                pl.BlockSpec(memory_space=pltpu.MemorySpace.SMEM),  # conv bias
                pl.BlockSpec((1, 2, Hp, Wp), lambda n: (n, 0, 0, 0)),
            ],
            out_specs=pl.BlockSpec((1, 1, HW), lambda n: (n, 0, 0)),
        ),
        compiler_params=pltpu.CompilerParams(
            dimension_semantics=("parallel",),
            vmem_limit_bytes=_vmem_limit(k2_bytes)),
    )(cw_flat, cb_flat, stats_pad)

    # ---------------- K3: out = (cgate * x) * sgate ----------------
    hw_tile = _pick_hw_tile(HW, C)
    n_hw_tiles = pl.cdiv(HW, hw_tile)
    k3_bytes = (4 * C * hw_tile + 2 * (C + hw_tile)) * f32b
    out_flat = pl.pallas_call(
        _apply_gates_kernel,
        out_shape=jax.ShapeDtypeStruct((N, C, HW), x.dtype),
        grid_spec=pltpu.PrefetchScalarGridSpec(
            num_scalar_prefetch=0,
            grid=(N, n_hw_tiles),
            in_specs=[
                pl.BlockSpec((1, C, hw_tile), lambda n, t: (n, 0, t)),  # x
                pl.BlockSpec((1, C, 1), lambda n, t: (n, 0, 0)),        # channel gate
                pl.BlockSpec((1, 1, hw_tile), lambda n, t: (n, 0, t)),  # spatial gate
            ],
            out_specs=pl.BlockSpec((1, C, hw_tile), lambda n, t: (n, 0, t)),
        ),
        compiler_params=pltpu.CompilerParams(
            dimension_semantics=("parallel", "parallel"),
            vmem_limit_bytes=_vmem_limit(k3_bytes)),
    )(x_flat, cgate, sgate)

    return out_flat.reshape(N, C, H, W)


def cbam_reference(x, w1, b1, w2, b2, conv_w, conv_b):
    """Pure-JAX reference matching the PyTorch CBAM forward
    (including the avg-pool-twice quirk in CBAMChannelAttention)."""
    K = conv_w.shape[-1]
    P = K // 2
    pooled = jnp.mean(x, axis=(2, 3))                 # both branches are avg-pool
    hidden = jnp.maximum(pooled @ w1.T + b1, 0.0)
    att = hidden @ w2.T + b2
    cgate = jax.nn.sigmoid(att + att)
    y = cgate[:, :, None, None] * x
    sp = jnp.concatenate([jnp.mean(y, axis=1, keepdims=True),
                          jnp.max(y, axis=1, keepdims=True)], axis=1)
    att_sp = jax.lax.conv_general_dilated(
        sp, conv_w, window_strides=(1, 1), padding=((P, P), (P, P)),
        dimension_numbers=("NCHW", "OIHW", "NCHW"),
        precision=jax.lax.Precision.HIGHEST)
    sgate = jax.nn.sigmoid(att_sp + conv_b.reshape(1, -1, 1, 1))
    return sgate * y


if __name__ == "__main__":
    N, C, H, W = 2, 64, 16, 16
    reduction_factor = 16
    Bn = C // reduction_factor
    K = 7

    key = jax.random.PRNGKey(0)
    kx, k1, k2, k3, k4, k5, k6 = jax.random.split(key, 7)

    x = jax.random.normal(kx, (N, C, H, W), dtype=jnp.float32)
    # 1x1-conv weights (kernel dims squeezed): Conv2d(C->Bn) and Conv2d(Bn->C).
    w1 = jax.random.normal(k1, (Bn, C), dtype=jnp.float32) * 0.1
    b1 = jax.random.normal(k2, (Bn,), dtype=jnp.float32) * 0.1
    w2 = jax.random.normal(k3, (C, Bn), dtype=jnp.float32) * 0.1
    b2 = jax.random.normal(k4, (C,), dtype=jnp.float32) * 0.1
    # spatial-attention conv: Conv2d(2 -> 1, kernel_size=7, padding=3) + bias.
    conv_w = jax.random.normal(k5, (1, 2, K, K), dtype=jnp.float32) * 0.1
    conv_b = jax.random.normal(k6, (1,), dtype=jnp.float32) * 0.1

    out = jax.jit(cbam_forward)(x, w1, b1, w2, b2, conv_w, conv_b)
    out = jax.block_until_ready(out)

    ref = cbam_reference(x, w1, b1, w2, b2, conv_w, conv_b)
    assert jnp.allclose(out, ref, atol=2e-5, rtol=2e-5), "mismatch vs reference"

    print("KERNEL_OK")
</pallas_src>

<mosaic_0001>
module attributes {stable_mosaic.version = 11 : i64} {
  func.func @_channel_stats_kernel(%arg0: i32, %arg1: memref<1x64x256xf32, #tpu.memory_space<vmem>>, %arg2: memref<4x64xf32, #tpu.memory_space<vmem>>, %arg3: memref<4x1xf32, #tpu.memory_space<vmem>>, %arg4: memref<64x4xf32, #tpu.memory_space<vmem>>, %arg5: memref<64x1xf32, #tpu.memory_space<vmem>>, %arg6: memref<1x64x1xf32, #tpu.memory_space<vmem>>, %arg7: memref<1x2x256xf32, #tpu.memory_space<vmem>>) attributes {dimension_semantics = [#tpu.dimension_semantics<parallel>], iteration_bounds = array<i64: 2>, scalar_prefetch = 0 : i64, scratch_operands = 0 : i64, tpu.core_type = #tpu.core_type<tc>, window_params = [{transform_indices = @transform_0, window_bounds = array<i64: 1, 64, 256>}, {pipeline_mode = #tpu.pipeline_mode<synchronous>, transform_indices = @transform_1, window_bounds = array<i64: 4, 64>}, {pipeline_mode = #tpu.pipeline_mode<synchronous>, transform_indices = @transform_2, window_bounds = array<i64: 4, 1>}, {pipeline_mode = #tpu.pipeline_mode<synchronous>, transform_indices = @transform_3, window_bounds = array<i64: 64, 4>}, {pipeline_mode = #tpu.pipeline_mode<synchronous>, transform_indices = @transform_4, window_bounds = array<i64: 64, 1>}, {transform_indices = @transform_5, window_bounds = array<i64: 1, 64, 1>}, {transform_indices = @transform_6, window_bounds = array<i64: 1, 2, 256>}]} {
    %c0 = arith.constant 0 : index
    %c0_0 = arith.constant 0 : index
    %c0_1 = arith.constant 0 : index
    %0 = vector.load %arg1[%c0, %c0_0, %c0_1] : memref<1x64x256xf32, #tpu.memory_space<vmem>>, vector<1x64x256xf32>
    %1 = vector.shape_cast %0 : vector<1x64x256xf32> to vector<64x256xf32>
    %cst = arith.constant dense<0.000000e+00> : vector<64xf32>
    %2 = vector.multi_reduction <add>, %1, %cst [1] : vector<64x256xf32> to vector<64xf32>
    %3 = vector.shape_cast %2 : vector<64xf32> to vector<64x1xf32>
    %cst_2 = arith.constant 3.906250e-03 : f32
    %4 = vector.broadcast %cst_2 : f32 to vector<64x1xf32>
    %5 = arith.mulf %3, %4 : vector<64x1xf32>
    %c0_3 = arith.constant 0 : index
    %c0_4 = arith.constant 0 : index
    %6 = vector.load %arg2[%c0_3, %c0_4] : memref<4x64xf32, #tpu.memory_space<vmem>>, vector<4x64xf32>
    %cst_5 = arith.constant dense<0.000000e+00> : vector<4x1xf32>
    %7 = tpu.matmul %6, %5, %cst_5 {dimension_numbers = #tpu.dot_dimension_numbers<[1], [0], [0], [1], [0, 0, 1, 1], [], []>} : vector<4x64xf32>, vector<64x1xf32>, vector<4x1xf32> -> vector<4x1xf32>
    %c0_6 = arith.constant 0 : index
    %c0_7 = arith.constant 0 : index
    %8 = vector.load %arg3[%c0_6, %c0_7] : memref<4x1xf32, #tpu.memory_space<vmem>>, vector<4x1xf32>
    %9 = arith.addf %7, %8 : vector<4x1xf32>
    %cst_8 = arith.constant 0.000000e+00 : f32
    %10 = vector.broadcast %cst_8 : f32 to vector<4x1xf32>
    %11 = arith.maximumf %9, %10 : vector<4x1xf32>
    %c0_9 = arith.constant 0 : index
    %c0_10 = arith.constant 0 : index
    %12 = vector.load %arg4[%c0_9, %c0_10] : memref<64x4xf32, #tpu.memory_space<vmem>>, vector<64x4xf32>
    %cst_11 = arith.constant dense<0.000000e+00> : vector<64x1xf32>
    %13 = tpu.matmul %12, %11, %cst_11 {dimension_numbers = #tpu.dot_dimension_numbers<[1], [0], [0], [1], [0, 0, 1, 1], [], []>} : vector<64x4xf32>, vector<4x1xf32>, vector<64x1xf32> -> vector<64x1xf32>
    %c0_12 = arith.constant 0 : index
    %c0_13 = arith.constant 0 : index
    %14 = vector.load %arg5[%c0_12, %c0_13] : memref<64x1xf32, #tpu.memory_space<vmem>>, vector<64x1xf32>
    %15 = arith.addf %13, %14 : vector<64x1xf32>
    %16 = arith.negf %15 : vector<64x1xf32>
    %17 = math.exp %16 : vector<64x1xf32>
    %cst_14 = arith.constant 1.000000e+00 : f32
    %18 = vector.broadcast %cst_14 : f32 to vector<64x1xf32>
    %19 = arith.addf %18, %17 : vector<64x1xf32>
    %20 = arith.divf %18, %19 : vector<64x1xf32>
    %c0_15 = arith.constant 0 : index
    %c0_16 = arith.constant 0 : index
    %c0_17 = arith.constant 0 : index
    %21 = vector.load %arg6[%c0_15, %c0_16, %c0_17] : memref<1x64x1xf32, #tpu.memory_space<vmem>>, vector<1x64x1xf32>
    %22 = vector.shape_cast %21 : vector<1x64x1xf32> to vector<64x1xf32>
    %23 = vector.shape_cast %20 : vector<64x1xf32> to vector<1x64x1xf32>
    tpu.vector_store %arg6[%c0_15, %c0_16, %c0_17], %23 {strides = array<i32>} : memref<1x64x1xf32, #tpu.memory_space<vmem>>, vector<1x64x1xf32>,
    %24 = vector.broadcast %20 : vector<64x1xf32> to vector<64x256xf32>
    %25 = arith.mulf %24, %1 : vector<64x256xf32>
    %cst_18 = arith.constant dense<0.000000e+00> : vector<256xf32>
    %26 = vector.multi_reduction <add>, %25, %cst_18 [0] : vector<64x256xf32> to vector<256xf32>
    %27 = vector.shape_cast %26 : vector<256xf32> to vector<1x256xf32>
    %cst_19 = arith.constant 6.400000e+01 : f32
    %28 = vector.broadcast %cst_19 : f32 to vector<1x256xf32>
    %29 = arith.divf %27, %28 : vector<1x256xf32>
    %cst_20 = arith.constant dense<0xFF800000> : vector<256xf32>
    %30 = vector.multi_reduction <maximumf>, %25, %cst_20 [0] : vector<64x256xf32> to vector<256xf32>
    %31 = vector.shape_cast %30 : vector<256xf32> to vector<1x256xf32>
    %32 = tpu.concatenate %29, %31 in 0 : vector<1x256xf32>, vector<1x256xf32> -> vector<2x256xf32>
    %c0_21 = arith.constant 0 : index
    %c0_22 = arith.constant 0 : index
    %c0_23 = arith.constant 0 : index
    %33 = vector.load %arg7[%c0_21, %c0_22, %c0_23] : memref<1x2x256xf32, #tpu.memory_space<vmem>>, vector<1x2x256xf32>
    %34 = vector.shape_cast %33 : vector<1x2x256xf32> to vector<2x256xf32>
    %35 = vector.shape_cast %32 : vector<2x256xf32> to vector<1x2x256xf32>
    tpu.vector_store %arg7[%c0_21, %c0_22, %c0_23], %35 {strides = array<i32>} : memref<1x2x256xf32, #tpu.memory_space<vmem>>, vector<1x2x256xf32>,
    return
  }
  func.func @transform_0(%arg0: i32) -> (i32, i32, i32) {
    %c0_i32 = arith.constant 0 : i32
    %c0_i32_0 = arith.constant 0 : i32
    %c0_i32_1 = arith.constant 0 : i32
    return %arg0, %c0_i32, %c0_i32_0 : i32, i32, i32
  }
  func.func @transform_1(%arg0: i32) -> (i32, i32) {
    %c0_i32 = arith.constant 0 : i32
    %c0_i32_0 = arith.constant 0 : i32
    %c0_i32_1 = arith.constant 0 : i32
    return %c0_i32, %c0_i32_0 : i32, i32
  }
  func.func @transform_2(%arg0: i32) -> (i32, i32) {
    %c0_i32 = arith.constant 0 : i32
    %c0_i32_0 = arith.constant 0 : i32
    %c0_i32_1 = arith.constant 0 : i32
    return %c0_i32, %c0_i32_0 : i32, i32
  }
  func.func @transform_3(%arg0: i32) -> (i32, i32) {
    %c0_i32 = arith.constant 0 : i32
    %c0_i32_0 = arith.constant 0 : i32
    %c0_i32_1 = arith.constant 0 : i32
    return %c0_i32, %c0_i32_0 : i32, i32
  }
  func.func @transform_4(%arg0: i32) -> (i32, i32) {
    %c0_i32 = arith.constant 0 : i32
    %c0_i32_0 = arith.constant 0 : i32
    %c0_i32_1 = arith.constant 0 : i32
    return %c0_i32, %c0_i32_0 : i32, i32
  }
  func.func @transform_5(%arg0: i32) -> (i32, i32, i32) {
    %c0_i32 = arith.constant 0 : i32
    %c0_i32_0 = arith.constant 0 : i32
    %c0_i32_1 = arith.constant 0 : i32
    return %arg0, %c0_i32, %c0_i32_0 : i32, i32, i32
  }
  func.func @transform_6(%arg0: i32) -> (i32, i32, i32) {
    %c0_i32 = arith.constant 0 : i32
    %c0_i32_0 = arith.constant 0 : i32
    %c0_i32_1 = arith.constant 0 : i32
    return %arg0, %c0_i32, %c0_i32_0 : i32, i32, i32
  }
}

module attributes {stable_mosaic.version = 11 : i64} {
  func.func @_apply_gates_kernel(%arg0: i32, %arg1: i32, %arg2: memref<1x64x256xf32, #tpu.memory_space<vmem>>, %arg3: memref<1x64x1xf32, #tpu.memory_space<vmem>>, %arg4: memref<1x1x256xf32, #tpu.memory_space<vmem>>, %arg5: memref<1x64x256xf32, #tpu.memory_space<vmem>>) attributes {dimension_semantics = [#tpu.dimension_semantics<parallel>, #tpu.dimension_semantics<parallel>], iteration_bounds = array<i64: 2, 1>, scalar_prefetch = 0 : i64, scratch_operands = 0 : i64, tpu.core_type = #tpu.core_type<tc>, window_params = [{transform_indices = @transform_0, window_bounds = array<i64: 1, 64, 256>}, {transform_indices = @transform_1, window_bounds = array<i64: 1, 64, 1>}, {transform_indices = @transform_2, window_bounds = array<i64: 1, 1, 256>}, {transform_indices = @transform_3, window_bounds = array<i64: 1, 64, 256>}]} {
    %c0 = arith.constant 0 : index
    %c0_0 = arith.constant 0 : index
    %c0_1 = arith.constant 0 : index
    %0 = vector.load %arg2[%c0, %c0_0, %c0_1] : memref<1x64x256xf32, #tpu.memory_space<vmem>>, vector<1x64x256xf32>
    %1 = vector.shape_cast %0 : vector<1x64x256xf32> to vector<64x256xf32>
    %c0_2 = arith.constant 0 : index
    %c0_3 = arith.constant 0 : index
    %c0_4 = arith.constant 0 : index
    %2 = vector.load %arg3[%c0_2, %c0_3, %c0_4] : memref<1x64x1xf32, #tpu.memory_space<vmem>>, vector<1x64x1xf32>
    %3 = vector.shape_cast %2 : vector<1x64x1xf32> to vector<64x1xf32>
    %c0_5 = arith.constant 0 : index
    %c0_6 = arith.constant 0 : index
    %c0_7 = arith.constant 0 : index
    %4 = vector.load %arg4[%c0_5, %c0_6, %c0_7] : memref<1x1x256xf32, #tpu.memory_space<vmem>>, vector<1x1x256xf32>
    %5 = vector.shape_cast %4 : vector<1x1x256xf32> to vector<1x256xf32>
    %6 = vector.broadcast %3 : vector<64x1xf32> to vector<64x256xf32>
    %7 = arith.mulf %6, %1 : vector<64x256xf32>
    %8 = vector.broadcast %5 : vector<1x256xf32> to vector<64x256xf32>
    %9 = arith.mulf %7, %8 : vector<64x256xf32>
    %c0_8 = arith.constant 0 : index
    %c0_9 = arith.constant 0 : index
    %c0_10 = arith.constant 0 : index
    %10 = vector.load %arg5[%c0_8, %c0_9, %c0_10] : memref<1x64x256xf32, #tpu.memory_space<vmem>>, vector<1x64x256xf32>
    %11 = vector.shape_cast %10 : vector<1x64x256xf32> to vector<64x256xf32>
    %12 = vector.shape_cast %9 : vector<64x256xf32> to vector<1x64x256xf32>
    tpu.vector_store %arg5[%c0_8, %c0_9, %c0_10], %12 {strides = array<i32>} : memref<1x64x256xf32, #tpu.memory_space<vmem>>, vector<1x64x256xf32>,
    return
  }
  func.func @transform_0(%arg0: i32, %arg1: i32) -> (i32, i32, i32) {
    %c0_i32 = arith.constant 0 : i32
    %c0_i32_0 = arith.constant 0 : i32
    return %arg0, %c0_i32, %arg1 : i32, i32, i32
  }
  func.func @transform_1(%arg0: i32, %arg1: i32) -> (i32, i32, i32) {
    %c0_i32 = arith.constant 0 : i32
    %c0_i32_0 = arith.constant 0 : i32
    %c0_i32_1 = arith.constant 0 : i32
    return %arg0, %c0_i32, %c0_i32_0 : i32, i32, i32
  }
  func.func @transform_2(%arg0: i32, %arg1: i32) -> (i32, i32, i32) {
    %c0_i32 = arith.constant 0 : i32
    %c0_i32_0 = arith.constant 0 : i32
    return %arg0, %c0_i32, %arg1 : i32, i32, i32
  }
  func.func @transform_3(%arg0: i32, %arg1: i32) -> (i32, i32, i32) {
    %c0_i32 = arith.constant 0 : i32
    %c0_i32_0 = arith.constant 0 : i32
    return %arg0, %c0_i32, %arg1 : i32, i32, i32
  }
}

module attributes {stable_mosaic.version = 11 : i64} {
  func.func @_spatial_gate_kernel(%arg0: i32, %arg1: memref<98xf32, #tpu.memory_space<smem>>, %arg2: memref<1xf32, #tpu.memory_space<smem>>, %arg3: memref<1x2x22x22xf32, #tpu.memory_space<vmem>>, %arg4: memref<1x1x256xf32, #tpu.memory_space<vmem>>) attributes {dimension_semantics = [#tpu.dimension_semantics<parallel>], iteration_bounds = array<i64: 2>, scalar_prefetch = 0 : i64, scratch_operands = 0 : i64, tpu.core_type = #tpu.core_type<tc>, window_params = [{transform_indices = @transform_0, window_bounds = array<i64: 98>}, {transform_indices = @transform_1, window_bounds = array<i64: 1>}, {transform_indices = @transform_2, window_bounds = array<i64: 1, 2, 22, 22>}, {transform_indices = @transform_3, window_bounds = array<i64: 1, 1, 256>}]} {
    %cst = arith.constant 0.000000e+00 : f32
    %0 = vector.broadcast %cst : f32 to vector<16x16xf32>
    %c0 = arith.constant 0 : index
    %1 = memref.load %arg1[%c0] : memref<98xf32, #tpu.memory_space<smem>>
    %c0_0 = arith.constant 0 : index
    %c0_1 = arith.constant 0 : index
    %c0_2 = arith.constant 0 : index
    %c0_3 = arith.constant 0 : index
    %2 = vector.load %arg3[%c0_0, %c0_1, %c0_2, %c0_3] : memref<1x2x22x22xf32, #tpu.memory_space<vmem>>, vector<1x1x16x16xf32>
    %3 = vector.shape_cast %2 : vector<1x1x16x16xf32> to vector<16x16xf32>
    %4 = vector.broadcast %1 : f32 to vector<16x16xf32>
    %5 = arith.mulf %4, %3 : vector<16x16xf32>
    %6 = arith.addf %0, %5 : vector<16x16xf32>
    %c1 = arith.constant 1 : index
    %7 = memref.load %arg1[%c1] : memref<98xf32, #tpu.memory_space<smem>>
    %c0_4 = arith.constant 0 : index
    %c0_5 = arith.constant 0 : index
    %c0_6 = arith.constant 0 : index
    %c1_7 = arith.constant 1 : index
    %8 = vector.load %arg3[%c0_4, %c0_5, %c0_6, %c1_7] : memref<1x2x22x22xf32, #tpu.memory_space<vmem>>, vector<1x1x16x16xf32>
    %9 = vector.shape_cast %8 : vector<1x1x16x16xf32> to vector<16x16xf32>
    %10 = vector.broadcast %7 : f32 to vector<16x16xf32>
    %11 = arith.mulf %10, %9 : vector<16x16xf32>
    %12 = arith.addf %6, %11 : vector<16x16xf32>
    %c2 = arith.constant 2 : index
    %13 = memref.load %arg1[%c2] : memref<98xf32, #tpu.memory_space<smem>>
    %c0_8 = arith.constant 0 : index
    %c0_9 = arith.constant 0 : index
    %c0_10 = arith.constant 0 : index
    %c2_11 = arith.constant 2 : index
    %14 = vector.load %arg3[%c0_8, %c0_9, %c0_10, %c2_11] : memref<1x2x22x22xf32, #tpu.memory_space<vmem>>, vector<1x1x16x16xf32>
    %15 = vector.shape_cast %14 : vector<1x1x16x16xf32> to vector<16x16xf32>
    %16 = vector.broadcast %13 : f32 to vector<16x16xf32>
    %17 = arith.mulf %16, %15 : vector<16x16xf32>
    %18 = arith.addf %12, %17 : vector<16x16xf32>
    %c3 = arith.constant 3 : index
    %19 = memref.load %arg1[%c3] : memref<98xf32, #tpu.memory_space<smem>>
    %c0_12 = arith.constant 0 : index
    %c0_13 = arith.constant 0 : index
    %c0_14 = arith.constant 0 : index
    %c3_15 = arith.constant 3 : index
    %20 = vector.load %arg3[%c0_12, %c0_13, %c0_14, %c3_15] : memref<1x2x22x22xf32, #tpu.memory_space<vmem>>, vector<1x1x16x16xf32>
    %21 = vector.shape_cast %20 : vector<1x1x16x16xf32> to vector<16x16xf32>
    %22 = vector.broadcast %19 : f32 to vector<16x16xf32>
    %23 = arith.mulf %22, %21 : vector<16x16xf32>
    %24 = arith.addf %18, %23 : vector<16x16xf32>
    %c4 = arith.constant 4 : index
    %25 = memref.load %arg1[%c4] : memref<98xf32, #tpu.memory_space<smem>>
    %c0_16 = arith.constant 0 : index
    %c0_17 = arith.constant 0 : index
    %c0_18 = arith.constant 0 : index
    %c4_19 = arith.constant 4 : index
    %26 = vector.load %arg3[%c0_16, %c0_17, %c0_18, %c4_19] : memref<1x2x22x22xf32, #tpu.memory_space<vmem>>, vector<1x1x16x16xf32>
    %27 = vector.shape_cast %26 : vector<1x1x16x16xf32> to vector<16x16xf32>
    %28 = vector.broadcast %25 : f32 to vector<16x16xf32>
    %29 = arith.mulf %28, %27 : vector<16x16xf32>
    %30 = arith.addf %24, %29 : vector<16x16xf32>
    %c5 = arith.constant 5 : index
    %31 = memref.load %arg1[%c5] : memref<98xf32, #tpu.memory_space<smem>>
    %c0_20 = arith.constant 0 : index
    %c0_21 = arith.constant 0 : index
    %c0_22 = arith.constant 0 : index
    %c5_23 = arith.constant 5 : index
    %32 = vector.load %arg3[%c0_20, %c0_21, %c0_22, %c5_23] : memref<1x2x22x22xf32, #tpu.memory_space<vmem>>, vector<1x1x16x16xf32>
    %33 = vector.shape_cast %32 : vector<1x1x16x16xf32> to vector<16x16xf32>
    %34 = vector.broadcast %31 : f32 to vector<16x16xf32>
    %35 = arith.mulf %34, %33 : vector<16x16xf32>
    %36 = arith.addf %30, %35 : vector<16x16xf32>
    %c6 = arith.constant 6 : index
    %37 = memref.load %arg1[%c6] : memref<98xf32, #tpu.memory_space<smem>>
    %c0_24 = arith.constant 0 : index
    %c0_25 = arith.constant 0 : index
    %c0_26 = arith.constant 0 : index
    %c6_27 = arith.constant 6 : index
    %38 = vector.load %arg3[%c0_24, %c0_25, %c0_26, %c6_27] : memref<1x2x22x22xf32, #tpu.memory_space<vmem>>, vector<1x1x16x16xf32>
    %39 = vector.shape_cast %38 : vector<1x1x16x16xf32> to vector<16x16xf32>
    %40 = vector.broadcast %37 : f32 to vector<16x16xf32>
    %41 = arith.mulf %40, %39 : vector<16x16xf32>
    %42 = arith.addf %36, %41 : vector<16x16xf32>
    %c7 = arith.constant 7 : index
    %43 = memref.load %arg1[%c7] : memref<98xf32, #tpu.memory_space<smem>>
    %c0_28 = arith.constant 0 : index
    %c0_29 = arith.constant 0 : index
    %c1_30 = arith.constant 1 : index
    %c0_31 = arith.constant 0 : index
    %44 = vector.load %arg3[%c0_28, %c0_29, %c1_30, %c0_31] : memref<1x2x22x22xf32, #tpu.memory_space<vmem>>, vector<1x1x16x16xf32>
    %45 = vector.shape_cast %44 : vector<1x1x16x16xf32> to vector<16x16xf32>
    %46 = vector.broadcast %43 : f32 to vector<16x16xf32>
    %47 = arith.mulf %46, %45 : vector<16x16xf32>
    %48 = arith.addf %42, %47 : vector<16x16xf32>
    %c8 = arith.constant 8 : index
    %49 = memref.load %arg1[%c8] : memref<98xf32, #tpu.memory_space<smem>>
    %c0_32 = arith.constant 0 : index
    %c0_33 = arith.constant 0 : index
    %c1_34 = arith.constant 1 : index
    %c1_35 = arith.constant 1 : index
    %50 = vector.load %arg3[%c0_32, %c0_33, %c1_34, %c1_35] : memref<1x2x22x22xf32, #tpu.memory_space<vmem>>, vector<1x1x16x16xf32>
    %51 = vector.shape_cast %50 : vector<1x1x16x16xf32> to vector<16x16xf32>
    %52 = vector.broadcast %49 : f32 to vector<16x16xf32>
    %53 = arith.mulf %52, %51 : vector<16x16xf32>
    %54 = arith.addf %48, %53 : vector<16x16xf32>
    %c9 = arith.constant 9 : index
    %55 = memref.load %arg1[%c9] : memref<98xf32, #tpu.memory_space<smem>>
    %c0_36 = arith.constant 0 : index
    %c0_37 = arith.constant 0 : index
    %c1_38 = arith.constant 1 : index
    %c2_39 = arith.constant 2 : index
    %56 = vector.load %arg3[%c0_36, %c0_37, %c1_38, %c2_39] : memref<1x2x22x22xf32, #tpu.memory_space<vmem>>, vector<1x1x16x16xf32>
    %57 = vector.shape_cast %56 : vector<1x1x16x16xf32> to vector<16x16xf32>
    %58 = vector.broadcast %55 : f32 to vector<16x16xf32>
    %59 = arith.mulf %58, %57 : vector<16x16xf32>
    %60 = arith.addf %54, %59 : vector<16x16xf32>
    %c10 = arith.constant 10 : index
    %61 = memref.load %arg1[%c10] : memref<98xf32, #tpu.memory_space<smem>>
    %c0_40 = arith.constant 0 : index
    %c0_41 = arith.constant 0 : index
    %c1_42 = arith.constant 1 : index
    %c3_43 = arith.constant 3 : index
    %62 = vector.load %arg3[%c0_40, %c0_41, %c1_42, %c3_43] : memref<1x2x22x22xf32, #tpu.memory_space<vmem>>, vector<1x1x16x16xf32>
    %63 = vector.shape_cast %62 : vector<1x1x16x16xf32> to vector<16x16xf32>
    %64 = vector.broadcast %61 : f32 to vector<16x16xf32>
    %65 = arith.mulf %64, %63 : vector<16x16xf32>
    %66 = arith.addf %60, %65 : vector<16x16xf32>
    %c11 = arith.constant 11 : index
    %67 = memref.load %arg1[%c11] : memref<98xf32, #tpu.memory_space<smem>>
    %c0_44 = arith.constant 0 : index
    %c0_45 = arith.constant 0 : index
    %c1_46 = arith.constant 1 : index
    %c4_47 = arith.constant 4 : index
    %68 = vector.load %arg3[%c0_44, %c0_45, %c1_46, %c4_47] : memref<1x2x22x22xf32, #tpu.memory_space<vmem>>, vector<1x1x16x16xf32>
    %69 = vector.shape_cast %68 : vector<1x1x16x16xf32> to vector<16x16xf32>
    %70 = vector.broadcast %67 : f32 to vector<16x16xf32>
    %71 = arith.mulf %70, %69 : vector<16x16xf32>
    %72 = arith.addf %66, %71 : vector<16x16xf32>
    %c12 = arith.constant 12 : index
    %73 = memref.load %arg1[%c12] : memref<98xf32, #tpu.memory_space<smem>>
    %c0_48 = arith.constant 0 : index
    %c0_49 = arith.constant 0 : index
    %c1_50 = arith.constant 1 : index
    %c5_51 = arith.constant 5 : index
    %74 = vector.load %arg3[%c0_48, %c0_49, %c1_50, %c5_51] : memref<1x2x22x22xf32, #tpu.memory_space<vmem>>, vector<1x1x16x16xf32>
    %75 = vector.shape_cast %74 : vector<1x1x16x16xf32> to vector<16x16xf32>
    %76 = vector.broadcast %73 : f32 to vector<16x16xf32>
    %77 = arith.mulf %76, %75 : vector<16x16xf32>
    %78 = arith.addf %72, %77 : vector<16x16xf32>
    %c13 = arith.constant 13 : index
    %79 = memref.load %arg1[%c13] : memref<98xf32, #tpu.memory_space<smem>>
    %c0_52 = arith.constant 0 : index
    %c0_53 = arith.constant 0 : index
    %c1_54 = arith.constant 1 : index
    %c6_55 = arith.constant 6 : index
    %80 = vector.load %arg3[%c0_52, %c0_53, %c1_54, %c6_55] : memref<1x2x22x22xf32, #tpu.memory_space<vmem>>, vector<1x1x16x16xf32>
    %81 = vector.shape_cast %80 : vector<1x1x16x16xf32> to vector<16x16xf32>
    %82 = vector.broadcast %79 : f32 to vector<16x16xf32>
    %83 = arith.mulf %82, %81 : vector<16x16xf32>
    %84 = arith.addf %78, %83 : vector<16x16xf32>
    %c14 = arith.constant 14 : index
    %85 = memref.load %arg1[%c14] : memref<98xf32, #tpu.memory_space<smem>>
    %c0_56 = arith.constant 0 : index
    %c0_57 = arith.constant 0 : index
    %c2_58 = arith.constant 2 : index
    %c0_59 = arith.constant 0 : index
    %86 = vector.load %arg3[%c0_56, %c0_57, %c2_58, %c0_59] : memref<1x2x22x22xf32, #tpu.memory_space<vmem>>, vector<1x1x16x16xf32>
    %87 = vector.shape_cast %86 : vector<1x1x16x16xf32> to vector<16x16xf32>
    %88 = vector.broadcast %85 : f32 to vector<16x16xf32>
    %89 = arith.mulf %88, %87 : vector<16x16xf32>
    %90 = arith.addf %84, %89 : vector<16x16xf32>
    %c15 = arith.constant 15 : index
    %91 = memref.load %arg1[%c15] : memref<98xf32, #tpu.memory_space<smem>>
    %c0_60 = arith.constant 0 : index
    %c0_61 = arith.constant 0 : index
    %c2_62 = arith.constant 2 : index
    %c1_63 = arith.constant 1 : index
    %92 = vector.load %arg3[%c0_60, %c0_61, %c2_62, %c1_63] : memref<1x2x22x22xf32, #tpu.memory_space<vmem>>, vector<1x1x16x16xf32>
    %93 = vector.shape_cast %92 : vector<1x1x16x16xf32> to vector<16x16xf32>
    %94 = vector.broadcast %91 : f32 to vector<16x16xf32>
    %95 = arith.mulf %94, %93 : vector<16x16xf32>
    %96 = arith.addf %90, %95 : vector<16x16xf32>
    %c16 = arith.constant 16 : index
    %97 = memref.load %arg1[%c16] : memref<98xf32, #tpu.memory_space<smem>>
    %c0_64 = arith.constant 0 : index
    %c0_65 = arith.constant 0 : index
    %c2_66 = arith.constant 2 : index
    %c2_67 = arith.constant 2 : index
    %98 = vector.load %arg3[%c0_64, %c0_65, %c2_66, %c2_67] : memref<1x2x22x22xf32, #tpu.memory_space<vmem>>, vector<1x1x16x16xf32>
    %99 = vector.shape_cast %98 : vector<1x1x16x16xf32> to vector<16x16xf32>
    %100 = vector.broadcast %97 : f32 to vector<16x16xf32>
    %101 = arith.mulf %100, %99 : vector<16x16xf32>
    %102 = arith.addf %96, %101 : vector<16x16xf32>
    %c17 = arith.constant 17 : index
    %103 = memref.load %arg1[%c17] : memref<98xf32, #tpu.memory_space<smem>>
    %c0_68 = arith.constant 0 : index
    %c0_69 = arith.constant 0 : index
    %c2_70 = arith.constant 2 : index
    %c3_71 = arith.constant 3 : index
    %104 = vector.load %arg3[%c0_68, %c0_69, %c2_70, %c3_71] : memref<1x2x22x22xf32, #tpu.memory_space<vmem>>, vector<1x1x16x16xf32>
    %105 = vector.shape_cast %104 : vector<1x1x16x16xf32> to vector<16x16xf32>
    %106 = vector.broadcast %103 : f32 to vector<16x16xf32>
    %107 = arith.mulf %106, %105 : vector<16x16xf32>
    %108 = arith.addf %102, %107 : vector<16x16xf32>
    %c18 = arith.constant 18 : index
    %109 = memref.load %arg1[%c18] : memref<98xf32, #tpu.memory_space<smem>>
    %c0_72 = arith.constant 0 : index
    %c0_73 = arith.constant 0 : index
    %c2_74 = arith.constant 2 : index
    %c4_75 = arith.constant 4 : index
    %110 = vector.load %arg3[%c0_72, %c0_73, %c2_74, %c4_75] : memref<1x2x22x22xf32, #tpu.memory_space<vmem>>, vector<1x1x16x16xf32>
    %111 = vector.shape_cast %110 : vector<1x1x16x16xf32> to vector<16x16xf32>
    %112 = vector.broadcast %109 : f32 to vector<16x16xf32>
    %113 = arith.mulf %112, %111 : vector<16x16xf32>
    %114 = arith.addf %108, %113 : vector<16x16xf32>
    %c19 = arith.constant 19 : index
    %115 = memref.load %arg1[%c19] : memref<98xf32, #tpu.memory_space<smem>>
    %c0_76 = arith.constant 0 : index
    %c0_77 = arith.constant 0 : index
    %c2_78 = arith.constant 2 : index
    %c5_79 = arith.constant 5 : index
    %116 = vector.load %arg3[%c0_76, %c0_77, %c2_78, %c5_79] : memref<1x2x22x22xf32, #tpu.memory_space<vmem>>, vector<1x1x16x16xf32>
    %117 = vector.shape_cast %116 : vector<1x1x16x16xf32> to vector<16x16xf32>
    %118 = vector.broadcast %115 : f32 to vector<16x16xf32>
    %119 = arith.mulf %118, %117 : vector<16x16xf32>
    %120 = arith.addf %114, %119 : vector<16x16xf32>
    %c20 = arith.constant 20 : index
    %121 = memref.load %arg1[%c20] : memref<98xf32, #tpu.memory_space<smem>>
    %c0_80 = arith.constant 0 : index
    %c0_81 = arith.constant 0 : index
    %c2_82 = arith.constant 2 : index
    %c6_83 = arith.constant 6 : index
    %122 = vector.load %arg3[%c0_80, %c0_81, %c2_82, %c6_83] : memref<1x2x22x22xf32, #tpu.memory_space<vmem>>, vector<1x1x16x16xf32>
    %123 = vector.shape_cast %122 : vector<1x1x16x16xf32> to vector<16x16xf32>
    %124 = vector.broadcast %121 : f32 to vector<16x16xf32>
    %125 = arith.mulf %124, %123 : vector<16x16xf32>
    %126 = arith.addf %120, %125 : vector<16x16xf32>
    %c21 = arith.constant 21 : index
    %127 = memref.load %arg1[%c21] : memref<98xf32, #tpu.memory_space<smem>>
    %c0_84 = arith.constant 0 : index
    %c0_85 = arith.constant 0 : index
    %c3_86 = arith.constant 3 : index
    %c0_87 = arith.constant 0 : index
    %128 = vector.load %arg3[%c0_84, %c0_85, %c3_86, %c0_87] : memref<1x2x22x22xf32, #tpu.memory_space<vmem>>, vector<1x1x16x16xf32>
    %129 = vector.shape_cast %128 : vector<1x1x16x16xf32> to vector<16x16xf32>
    %130 = vector.broadcast %127 : f32 to vector<16x16xf32>
    %131 = arith.mulf %130, %129 : vector<16x16xf32>
    %132 = arith.addf %126, %131 : vector<16x16xf32>
    %c22 = arith.constant 22 : index
    %133 = memref.load %arg1[%c22] : memref<98xf32, #tpu.memory_space<smem>>
    %c0_88 = arith.constant 0 : index
    %c0_89 = arith.constant 0 : index
    %c3_90 = arith.constant 3 : index
    %c1_91 = arith.constant 1 : index
    %134 = vector.load %arg3[%c0_88, %c0_89, %c3_90, %c1_91] : memref<1x2x22x22xf32, #tpu.memory_space<vmem>>, vector<1x1x16x16xf32>
    %135 = vector.shape_cast %134 : vector<1x1x16x16xf32> to vector<16x16xf32>
    %136 = vector.broadcast %133 : f32 to vector<16x16xf32>
    %137 = arith.mulf %136, %135 : vector<16x16xf32>
    %138 = arith.addf %132, %137 : vector<16x16xf32>
    %c23 = arith.constant 23 : index
    %139 = memref.load %arg1[%c23] : memref<98xf32, #tpu.memory_space<smem>>
    %c0_92 = arith.constant 0 : index
    %c0_93 = arith.constant 0 : index
    %c3_94 = arith.constant 3 : index
    %c2_95 = arith.constant 2 : index
    %140 = vector.load %arg3[%c0_92, %c0_93, %c3_94, %c2_95] : memref<1x2x22x22xf32, #tpu.memory_space<vmem>>, vector<1x1x16x16xf32>
    %141 = vector.shape_cast %140 : vector<1x1x16x16xf32> to vector<16x16xf32>
    %142 = vector.broadcast %139 : f32 to vector<16x16xf32>
    %143 = arith.mulf %142, %141 : vector<16x16xf32>
    %144 = arith.addf %138, %143 : vector<16x16xf32>
    %c24 = arith.constant 24 : index
    %145 = memref.load %arg1[%c24] : memref<98xf32, #tpu.memory_space<smem>>
    %c0_96 = arith.constant 0 : index
    %c0_97 = arith.constant 0 : index
    %c3_98 = arith.constant 3 : index
    %c3_99 = arith.constant 3 : index
    %146 = vector.load %arg3[%c0_96, %c0_97, %c3_98, %c3_99] : memref<1x2x22x22xf32, #tpu.memory_space<vmem>>, vector<1x1x16x16xf32>
    %147 = vector.shape_cast %146 : vector<1x1x16x16xf32> to vector<16x16xf32>
    %148 = vector.broadcast %145 : f32 to vector<16x16xf32>
    %149 = arith.mulf %148, %147 : vector<16x16xf32>
    %150 = arith.addf %144, %149 : vector<16x16xf32>
    %c25 = arith.constant 25 : index
    %151 = memref.load %arg1[%c25] : memref<98xf32, #tpu.memory_space<smem>>
    %c0_100 = arith.constant 0 : index
    %c0_101 = arith.constant 0 : index
    %c3_102 = arith.constant 3 : index
    %c4_103 = arith.constant 4 : index
    %152 = vector.load %arg3[%c0_100, %c0_101, %c3_102, %c4_103] : memref<1x2x22x22xf32, #tpu.memory_space<vmem>>, vector<1x1x16x16xf32>
    %153 = vector.shape_cast %152 : vector<1x1x16x16xf32> to vector<16x16xf32>
    %154 = vector.broadcast %151 : f32 to vector<16x16xf32>
    %155 = arith.mulf %154, %153 : vector<16x16xf32>
    %156 = arith.addf %150, %155 : vector<16x16xf32>
    %c26 = arith.constant 26 : index
    %157 = memref.load %arg1[%c26] : memref<98xf32, #tpu.memory_space<smem>>
    %c0_104 = arith.constant 0 : index
    %c0_105 = arith.constant 0 : index
    %c3_106 = arith.constant 3 : index
    %c5_107 = arith.constant 5 : index
    %158 = vector.load %arg3[%c0_104, %c0_105, %c3_106, %c5_107] : memref<1x2x22x22xf32, #tpu.memory_space<vmem>>, vector<1x1x16x16xf32>
    %159 = vector.shape_cast %158 : vector<1x1x16x16xf32> to vector<16x16xf32>
    %160 = vector.broadcast %157 : f32 to vector<16x16xf32>
    %161 = arith.mulf %160, %159 : vector<16x16xf32>
    %162 = arith.addf %156, %161 : vector<16x16xf32>
    %c27 = arith.constant 27 : index
    %163 = memref.load %arg1[%c27] : memref<98xf32, #tpu.memory_space<smem>>
    %c0_108 = arith.constant 0 : index
    %c0_109 = arith.constant 0 : index
    %c3_110 = arith.constant 3 : index
    %c6_111 = arith.constant 6 : index
    %164 = vector.load %arg3[%c0_108, %c0_109, %c3_110, %c6_111] : memref<1x2x22x22xf32, #tpu.memory_space<vmem>>, vector<1x1x16x16xf32>
    %165 = vector.shape_cast %164 : vector<1x1x16x16xf32> to vector<16x16xf32>
    %166 = vector.broadcast %163 : f32 to vector<16x16xf32>
    %167 = arith.mulf %166, %165 : vector<16x16xf32>
    %168 = arith.addf %162, %167 : vector<16x16xf32>
    %c28 = arith.constant 28 : index
    %169 = memref.load %arg1[%c28] : memref<98xf32, #tpu.memory_space<smem>>
    %c0_112 = arith.constant 0 : index
    %c0_113 = arith.constant 0 : index
    %c4_114 = arith.constant 4 : index
    %c0_115 = arith.constant 0 : index
    %170 = vector.load %arg3[%c0_112, %c0_113, %c4_114, %c0_115] : memref<1x2x22x22xf32, #tpu.memory_space<vmem>>, vector<1x1x16x16xf32>
    %171 = vector.shape_cast %170 : vector<1x1x16x16xf32> to vector<16x16xf32>
    %172 = vector.broadcast %169 : f32 to vector<16x16xf32>
    %173 = arith.mulf %172, %171 : vector<16x16xf32>
    %174 = arith.addf %168, %173 : vector<16x16xf32>
    %c29 = arith.constant 29 : index
    %175 = memref.load %arg1[%c29] : memref<98xf32, #tpu.memory_space<smem>>
    %c0_116 = arith.constant 0 : index
    %c0_117 = arith.constant 0 : index
    %c4_118 = arith.constant 4 : index
    %c1_119 = arith.constant 1 : index
    %176 = vector.load %arg3[%c0_116, %c0_117, %c4_118, %c1_119] : memref<1x2x22x22xf32, #tpu.memory_space<vmem>>, vector<1x1x16x16xf32>
    %177 = vector.shape_cast %176 : vector<1x1x16x16xf32> to vector<16x16xf32>
    %178 = vector.broadcast %175 : f32 to vector<16x16xf32>
    %179 = arith.mulf %178, %177 : vector<16x16xf32>
    %180 = arith.addf %174, %179 : vector<16x16xf32>
    %c30 = arith.constant 30 : index
    %181 = memref.load %arg1[%c30] : memref<98xf32, #tpu.memory_space<smem>>
    %c0_120 = arith.constant 0 : index
    %c0_121 = arith.constant 0 : index
    %c4_122 = arith.constant 4 : index
    %c2_123 = arith.constant 2 : index
    %182 = vector.load %arg3[%c0_120, %c0_121, %c4_122, %c2_123] : memref<1x2x22x22xf32, #tpu.memory_space<vmem>>, vector<1x1x16x16xf32>
    %183 = vector.shape_cast %182 : vector<1x1x16x16xf32> to vector<16x16xf32>
    %184 = vector.broadcast %181 : f32 to vector<16x16xf32>
    %185 = arith.mulf %184, %183 : vector<16x16xf32>
    %186 = arith.addf %180, %185 : vector<16x16xf32>
    %c31 = arith.constant 31 : index
    %187 = memref.load %arg1[%c31] : memref<98xf32, #tpu.memory_space<smem>>
    %c0_124 = arith.constant 0 : index
    %c0_125 = arith.constant 0 : index
    %c4_126 = arith.constant 4 : index
    %c3_127 = arith.constant 3 : index
    %188 = vector.load %arg3[%c0_124, %c0_125, %c4_126, %c3_127] : memref<1x2x22x22xf32, #tpu.memory_space<vmem>>, vector<1x1x16x16xf32>
    %189 = vector.shape_cast %188 : vector<1x1x16x16xf32> to vector<16x16xf32>
    %190 = vector.broadcast %187 : f32 to vector<16x16xf32>
    %191 = arith.mulf %190, %189 : vector<16x16xf32>
    %192 = arith.addf %186, %191 : vector<16x16xf32>
    %c32 = arith.constant 32 : index
    %193 = memref.load %arg1[%c32] : memref<98xf32, #tpu.memory_space<smem>>
    %c0_128 = arith.constant 0 : index
    %c0_129 = arith.constant 0 : index
    %c4_130 = arith.constant 4 : index
    %c4_131 = arith.constant 4 : index
    %194 = vector.load %arg3[%c0_128, %c0_129, %c4_130, %c4_131] : memref<1x2x22x22xf32, #tpu.memory_space<vmem>>, vector<1x1x16x16xf32>
    %195 = vector.shape_cast %194 : vector<1x1x16x16xf32> to vector<16x16xf32>
    %196 = vector.broadcast %193 : f32 to vector<16x16xf32>
    %197 = arith.mulf %196, %195 : vector<16x16xf32>
    %198 = arith.addf %192, %197 : vector<16x16xf32>
    %c33 = arith.constant 33 : index
    %199 = memref.load %arg1[%c33] : memref<98xf32, #tpu.memory_space<smem>>
    %c0_132 = arith.constant 0 : index
    %c0_133 = arith.constant 0 : index
    %c4_134 = arith.constant 4 : index
    %c5_135 = arith.constant 5 : index
    %200 = vector.load %arg3[%c0_132, %c0_133, %c4_134, %c5_135] : memref<1x2x22x22xf32, #tpu.memory_space<vmem>>, vector<1x1x16x16xf32>
    %201 = vector.shape_cast %200 : vector<1x1x16x16xf32> to vector<16x16xf32>
    %202 = vector.broadcast %199 : f32 to vector<16x16xf32>
    %203 = arith.mulf %202, %201 : vector<16x16xf32>
    %204 = arith.addf %198, %203 : vector<16x16xf32>
    %c34 = arith.constant 34 : index
    %205 = memref.load %arg1[%c34] : memref<98xf32, #tpu.memory_space<smem>>
    %c0_136 = arith.constant 0 : index
    %c0_137 = arith.constant 0 : index
    %c4_138 = arith.constant 4 : index
    %c6_139 = arith.constant 6 : index
    %206 = vector.load %arg3[%c0_136, %c0_137, %c4_138, %c6_139] : memref<1x2x22x22xf32, #tpu.memory_space<vmem>>, vector<1x1x16x16xf32>
    %207 = vector.shape_cast %206 : vector<1x1x16x16xf32> to vector<16x16xf32>
    %208 = vector.broadcast %205 : f32 to vector<16x16xf32>
    %209 = arith.mulf %208, %207 : vector<16x16xf32>
    %210 = arith.addf %204, %209 : vector<16x16xf32>
    %c35 = arith.constant 35 : index
    %211 = memref.load %arg1[%c35] : memref<98xf32, #tpu.memory_space<smem>>
    %c0_140 = arith.constant 0 : index
    %c0_141 = arith.constant 0 : index
    %c5_142 = arith.constant 5 : index
    %c0_143 = arith.constant 0 : index
    %212 = vector.load %arg3[%c0_140, %c0_141, %c5_142, %c0_143] : memref<1x2x22x22xf32, #tpu.memory_space<vmem>>, vector<1x1x16x16xf32>
    %213 = vector.shape_cast %212 : vector<1x1x16x16xf32> to vector<16x16xf32>
    %214 = vector.broadcast %211 : f32 to vector<16x16xf32>
    %215 = arith.mulf %214, %213 : vector<16x16xf32>
    %216 = arith.addf %210, %215 : vector<16x16xf32>
    %c36 = arith.constant 36 : index
    %217 = memref.load %arg1[%c36] : memref<98xf32, #tpu.memory_space<smem>>
    %c0_144 = arith.constant 0 : index
    %c0_145 = arith.constant 0 : index
    %c5_146 = arith.constant 5 : index
    %c1_147 = arith.constant 1 : index
    %218 = vector.load %arg3[%c0_144, %c0_145, %c5_146, %c1_147] : memref<1x2x22x22xf32, #tpu.memory_space<vmem>>, vector<1x1x16x16xf32>
    %219 = vector.shape_cast %218 : vector<1x1x16x16xf32> to vector<16x16xf32>
    %220 = vector.broadcast %217 : f32 to vector<16x16xf32>
    %221 = arith.mulf %220, %219 : vector<16x16xf32>
    %222 = arith.addf %216, %221 : vector<16x16xf32>
    %c37 = arith.constant 37 : index
    %223 = memref.load %arg1[%c37] : memref<98xf32, #tpu.memory_space<smem>>
    %c0_148 = arith.constant 0 : index
    %c0_149 = arith.constant 0 : index
    %c5_150 = arith.constant 5 : index
    %c2_151 = arith.constant 2 : index
    %224 = vector.load %arg3[%c0_148, %c0_149, %c5_150, %c2_151] : memref<1x2x22x22xf32, #tpu.memory_space<vmem>>, vector<1x1x16x16xf32>
    %225 = vector.shape_cast %224 : vector<1x1x16x16xf32> to vector<16x16xf32>
    %226 = vector.broadcast %223 : f32 to vector<16x16xf32>
    %227 = arith.mulf %226, %225 : vector<16x16xf32>
    %228 = arith.addf %222, %227 : vector<16x16xf32>
    %c38 = arith.constant 38 : index
    %229 = memref.load %arg1[%c38] : memref<98xf32, #tpu.memory_space<smem>>
    %c0_152 = arith.constant 0 : index
    %c0_153 = arith.constant 0 : index
    %c5_154 = arith.constant 5 : index
    %c3_155 = arith.constant 3 : index
    %230 = vector.load %arg3[%c0_152, %c0_153, %c5_154, %c3_155] : memref<1x2x22x22xf32, #tpu.memory_space<vmem>>, vector<1x1x16x16xf32>
    %231 = vector.shape_cast %230 : vector<1x1x16x16xf32> to vector<16x16xf32>
    %232 = vector.broadcast %229 : f32 to vector<16x16xf32>
    %233 = arith.mulf %232, %231 : vector<16x16xf32>
    %234 = arith.addf %228, %233 : vector<16x16xf32>
    %c39 = arith.constant 39 : index
    %235 = memref.load %arg1[%c39] : memref<98xf32, #tpu.memory_space<smem>>
    %c0_156 = arith.constant 0 : index
    %c0_157 = arith.constant 0 : index
    %c5_158 = arith.constant 5 : index
    %c4_159 = arith.constant 4 : index
    %236 = vector.load %arg3[%c0_156, %c0_157, %c5_158, %c4_159] : memref<1x2x22x22xf32, #tpu.memory_space<vmem>>, vector<1x1x16x16xf32>
    %237 = vector.shape_cast %236 : vector<1x1x16x16xf32> to vector<16x16xf32>
    %238 = vector.broadcast %235 : f32 to vector<16x16xf32>
    %239 = arith.mulf %238, %237 : vector<16x16xf32>
    %240 = arith.addf %234, %239 : vector<16x16xf32>
    %c40 = arith.constant 40 : index
    %241 = memref.load %arg1[%c40] : memref<98xf32, #tpu.memory_space<smem>>
    %c0_160 = arith.constant 0 : index
    %c0_161 = arith.constant 0 : index
    %c5_162 = arith.constant 5 : index
    %c5_163 = arith.constant 5 : index
    %242 = vector.load %arg3[%c0_160, %c0_161, %c5_162, %c5_163] : memref<1x2x22x22xf32, #tpu.memory_space<vmem>>, vector<1x1x16x16xf32>
    %243 = vector.shape_cast %242 : vector<1x1x16x16xf32> to vector<16x16xf32>
    %244 = vector.broadcast %241 : f32 to vector<16x16xf32>
    %245 = arith.mulf %244, %243 : vector<16x16xf32>
    %246 = arith.addf %240, %245 : vector<16x16xf32>
    %c41 = arith.constant 41 : index
    %247 = memref.load %arg1[%c41] : memref<98xf32, #tpu.memory_space<smem>>
    %c0_164 = arith.constant 0 : index
    %c0_165 = arith.constant 0 : index
    %c5_166 = arith.constant 5 : index
    %c6_167 = arith.constant 6 : index
    %248 = vector.load %arg3[%c0_164, %c0_165, %c5_166, %c6_167] : memref<1x2x22x22xf32, #tpu.memory_space<vmem>>, vector<1x1x16x16xf32>
    %249 = vector.shape_cast %248 : vector<1x1x16x16xf32> to vector<16x16xf32>
    %250 = vector.broadcast %247 : f32 to vector<16x16xf32>
    %251 = arith.mulf %250, %249 : vector<16x16xf32>
    %252 = arith.addf %246, %251 : vector<16x16xf32>
    %c42 = arith.constant 42 : index
    %253 = memref.load %arg1[%c42] : memref<98xf32, #tpu.memory_space<smem>>
    %c0_168 = arith.constant 0 : index
    %c0_169 = arith.constant 0 : index
    %c6_170 = arith.constant 6 : index
    %c0_171 = arith.constant 0 : index
    %254 = vector.load %arg3[%c0_168, %c0_169, %c6_170, %c0_171] : memref<1x2x22x22xf32, #tpu.memory_space<vmem>>, vector<1x1x16x16xf32>
    %255 = vector.shape_cast %254 : vector<1x1x16x16xf32> to vector<16x16xf32>
    %256 = vector.broadcast %253 : f32 to vector<16x16xf32>
    %257 = arith.mulf %256, %255 : vector<16x16xf32>
    %258 = arith.addf %252, %257 : vector<16x16xf32>
    %c43 = arith.constant 43 : index
    %259 = memref.load %arg1[%c43] : memref<98xf32, #tpu.memory_space<smem>>
    %c0_172 = arith.constant 0 : index
    %c0_173 = arith.constant 0 : index
    %c6_174 = arith.constant 6 : index
    %c1_175 = arith.constant 1 : index
    %260 = vector.load %arg3[%c0_172, %c0_173, %c6_174, %c1_175] : memref<1x2x22x22xf32, #tpu.memory_space<vmem>>, vector<1x1x16x16xf32>
    %261 = vector.shape_cast %260 : vector<1x1x16x16xf32> to vector<16x16xf32>
    %262 = vector.broadcast %259 : f32 to vector<16x16xf32>
    %263 = arith.mulf %262, %261 : vector<16x16xf32>
    %264 = arith.addf %258, %263 : vector<16x16xf32>
    %c44 = arith.constant 44 : index
    %265 = memref.load %arg1[%c44] : memref<98xf32, #tpu.memory_space<smem>>
    %c0_176 = arith.constant 0 : index
    %c0_177 = arith.constant 0 : index
    %c6_178 = arith.constant 6 : index
    %c2_179 = arith.constant 2 : index
    %266 = vector.load %arg3[%c0_176, %c0_177, %c6_178, %c2_179] : memref<1x2x22x22xf32, #tpu.memory_space<vmem>>, vector<1x1x16x16xf32>
    %267 = vector.shape_cast %266 : vector<1x1x16x16xf32> to vector<16x16xf32>
    %268 = vector.broadcast %265 : f32 to vector<16x16xf32>
    %269 = arith.mulf %268, %267 : vector<16x16xf32>
    %270 = arith.addf %264, %269 : vector<16x16xf32>
    %c45 = arith.constant 45 : index
    %271 = memref.load %arg1[%c45] : memref<98xf32, #tpu.memory_space<smem>>
    %c0_180 = arith.constant 0 : index
    %c0_181 = arith.constant 0 : index
    %c6_182 = arith.constant 6 : index
    %c3_183 = arith.constant 3 : index
    %272 = vector.load %arg3[%c0_180, %c0_181, %c6_182, %c3_183] : memref<1x2x22x22xf32, #tpu.memory_space<vmem>>, vector<1x1x16x16xf32>
    %273 = vector.shape_cast %272 : vector<1x1x16x16xf32> to vector<16x16xf32>
    %274 = vector.broadcast %271 : f32 to vector<16x16xf32>
    %275 = arith.mulf %274, %273 : vector<16x16xf32>
    %276 = arith.addf %270, %275 : vector<16x16xf32>
    %c46 = arith.constant 46 : index
    %277 = memref.load %arg1[%c46] : memref<98xf32, #tpu.memory_space<smem>>
    %c0_184 = arith.constant 0 : index
    %c0_185 = arith.constant 0 : index
    %c6_186 = arith.constant 6 : index
    %c4_187 = arith.constant 4 : index
    %278 = vector.load %arg3[%c0_184, %c0_185, %c6_186, %c4_187] : memref<1x2x22x22xf32, #tpu.memory_space<vmem>>, vector<1x1x16x16xf32>
    %279 = vector.shape_cast %278 : vector<1x1x16x16xf32> to vector<16x16xf32>
    %280 = vector.broadcast %277 : f32 to vector<16x16xf32>
    %281 = arith.mulf %280, %279 : vector<16x16xf32>
    %282 = arith.addf %276, %281 : vector<16x16xf32>
    %c47 = arith.constant 47 : index
    %283 = memref.load %arg1[%c47] : memref<98xf32, #tpu.memory_space<smem>>
    %c0_188 = arith.constant 0 : index
    %c0_189 = arith.constant 0 : index
    %c6_190 = arith.constant 6 : index
    %c5_191 = arith.constant 5 : index
    %284 = vector.load %arg3[%c0_188, %c0_189, %c6_190, %c5_191] : memref<1x2x22x22xf32, #tpu.memory_space<vmem>>, vector<1x1x16x16xf32>
    %285 = vector.shape_cast %284 : vector<1x1x16x16xf32> to vector<16x16xf32>
    %286 = vector.broadcast %283 : f32 to vector<16x16xf32>
    %287 = arith.mulf %286, %285 : vector<16x16xf32>
    %288 = arith.addf %282, %287 : vector<16x16xf32>
    %c48 = arith.constant 48 : index
    %289 = memref.load %arg1[%c48] : memref<98xf32, #tpu.memory_space<smem>>
    %c0_192 = arith.constant 0 : index
    %c0_193 = arith.constant 0 : index
    %c6_194 = arith.constant 6 : index
    %c6_195 = arith.constant 6 : index
    %290 = vector.load %arg3[%c0_192, %c0_193, %c6_194, %c6_195] : memref<1x2x22x22xf32, #tpu.memory_space<vmem>>, vector<1x1x16x16xf32>
    %291 = vector.shape_cast %290 : vector<1x1x16x16xf32> to vector<16x16xf32>
    %292 = vector.broadcast %289 : f32 to vector<16x16xf32>
    %293 = arith.mulf %292, %291 : vector<16x16xf32>
    %294 = arith.addf %288, %293 : vector<16x16xf32>
    %c49 = arith.constant 49 : index
    %295 = memref.load %arg1[%c49] : memref<98xf32, #tpu.memory_space<smem>>
    %c0_196 = arith.constant 0 : index
    %c1_197 = arith.constant 1 : index
    %c0_198 = arith.constant 0 : index
    %c0_199 = arith.constant 0 : index
    %296 = vector.load %arg3[%c0_196, %c1_197, %c0_198, %c0_199] : memref<1x2x22x22xf32, #tpu.memory_space<vmem>>, vector<1x1x16x16xf32>
    %297 = vector.shape_cast %296 : vector<1x1x16x16xf32> to vector<16x16xf32>
    %298 = vector.broadcast %295 : f32 to vector<16x16xf32>
    %299 = arith.mulf %298, %297 : vector<16x16xf32>
    %300 = arith.addf %294, %299 : vector<16x16xf32>
    %c50 = arith.constant 50 : index
    %301 = memref.load %arg1[%c50] : memref<98xf32, #tpu.memory_space<smem>>
    %c0_200 = arith.constant 0 : index
    %c1_201 = arith.constant 1 : index
    %c0_202 = arith.constant 0 : index
    %c1_203 = arith.constant 1 : index
    %302 = vector.load %arg3[%c0_200, %c1_201, %c0_202, %c1_203] : memref<1x2x22x22xf32, #tpu.memory_space<vmem>>, vector<1x1x16x16xf32>
    %303 = vector.shape_cast %302 : vector<1x1x16x16xf32> to vector<16x16xf32>
    %304 = vector.broadcast %301 : f32 to vector<16x16xf32>
    %305 = arith.mulf %304, %303 : vector<16x16xf32>
    %306 = arith.addf %300, %305 : vector<16x16xf32>
    %c51 = arith.constant 51 : index
    %307 = memref.load %arg1[%c51] : memref<98xf32, #tpu.memory_space<smem>>
    %c0_204 = arith.constant 0 : index
    %c1_205 = arith.constant 1 : index
    %c0_206 = arith.constant 0 : index
    %c2_207 = arith.constant 2 : index
    %308 = vector.load %arg3[%c0_204, %c1_205, %c0_206, %c2_207] : memref<1x2x22x22xf32, #tpu.memory_space<vmem>>, vector<1x1x16x16xf32>
    %309 = vector.shape_cast %308 : vector<1x1x16x16xf32> to vector<16x16xf32>
    %310 = vector.broadcast %307 : f32 to vector<16x16xf32>
    %311 = arith.mulf %310, %309 : vector<16x16xf32>
    %312 = arith.addf %306, %311 : vector<16x16xf32>
    %c52 = arith.constant 52 : index
    %313 = memref.load %arg1[%c52] : memref<98xf32, #tpu.memory_space<smem>>
    %c0_208 = arith.constant 0 : index
    %c1_209 = arith.constant 1 : index
    %c0_210 = arith.constant 0 : index
    %c3_211 = arith.constant 3 : index
    %314 = vector.load %arg3[%c0_208, %c1_209, %c0_210, %c3_211] : memref<1x2x22x22xf32, #tpu.memory_space<vmem>>, vector<1x1x16x16xf32>
    %315 = vector.shape_cast %314 : vector<1x1x16x16xf32> to vector<16x16xf32>
    %316 = vector.broadcast %313 : f32 to vector<16x16xf32>
    %317 = arith.mulf %316, %315 : vector<16x16xf32>
    %318 = arith.addf %312, %317 : vector<16x16xf32>
    %c53 = arith.constant 53 : index
    %319 = memref.load %arg1[%c53] : memref<98xf32, #tpu.memory_space<smem>>
    %c0_212 = arith.constant 0 : index
    %c1_213 = arith.constant 1 : index
    %c0_214 = arith.constant 0 : index
    %c4_215 = arith.constant 4 : index
    %320 = vector.load %arg3[%c0_212, %c1_213, %c0_214, %c4_215] : memref<1x2x22x22xf32, #tpu.memory_space<vmem>>, vector<1x1x16x16xf32>
    %321 = vector.shape_cast %320 : vector<1x1x16x16xf32> to vector<16x16xf32>
    %322 = vector.broadcast %319 : f32 to vector<16x16xf32>
    %323 = arith.mulf %322, %321 : vector<16x16xf32>
    %324 = arith.addf %318, %323 : vector<16x16xf32>
    %c54 = arith.constant 54 : index
    %325 = memref.load %arg1[%c54] : memref<98xf32, #tpu.memory_space<smem>>
    %c0_216 = arith.constant 0 : index
    %c1_217 = arith.constant 1 : index
    %c0_218 = arith.constant 0 : index
    %c5_219 = arith.constant 5 : index
    %326 = vector.load %arg3[%c0_216, %c1_217, %c0_218, %c5_219] : memref<1x2x22x22xf32, #tpu.memory_space<vmem>>, vector<1x1x16x16xf32>
    %327 = vector.shape_cast %326 : vector<1x1x16x16xf32> to vector<16x16xf32>
    %328 = vector.broadcast %325 : f32 to vector<16x16xf32>
    %329 = arith.mulf %328, %327 : vector<16x16xf32>
    %330 = arith.addf %324, %329 : vector<16x16xf32>
    %c55 = arith.constant 55 : index
    %331 = memref.load %arg1[%c55] : memref<98xf32, #tpu.memory_space<smem>>
    %c0_220 = arith.constant 0 : index
    %c1_221 = arith.constant 1 : index
    %c0_222 = arith.constant 0 : index
    %c6_223 = arith.constant 6 : index
    %332 = vector.load %arg3[%c0_220, %c1_221, %c0_222, %c6_223] : memref<1x2x22x22xf32, #tpu.memory_space<vmem>>, vector<1x1x16x16xf32>
    %333 = vector.shape_cast %332 : vector<1x1x16x16xf32> to vector<16x16xf32>
    %334 = vector.broadcast %331 : f32 to vector<16x16xf32>
    %335 = arith.mulf %334, %333 : vector<16x16xf32>
    %336 = arith.addf %330, %335 : vector<16x16xf32>
    %c56 = arith.constant 56 : index
    %337 = memref.load %arg1[%c56] : memref<98xf32, #tpu.memory_space<smem>>
    %c0_224 = arith.constant 0 : index
    %c1_225 = arith.constant 1 : index
    %c1_226 = arith.constant 1 : index
    %c0_227 = arith.constant 0 : index
    %338 = vector.load %arg3[%c0_224, %c1_225, %c1_226, %c0_227] : memref<1x2x22x22xf32, #tpu.memory_space<vmem>>, vector<1x1x16x16xf32>
    %339 = vector.shape_cast %338 : vector<1x1x16x16xf32> to vector<16x16xf32>
    %340 = vector.broadcast %337 : f32 to vector<16x16xf32>
    %341 = arith.mulf %340, %339 : vector<16x16xf32>
    %342 = arith.addf %336, %341 : vector<16x16xf32>
    %c57 = arith.constant 57 : index
    %343 = memref.load %arg1[%c57] : memref<98xf32, #tpu.memory_space<smem>>
    %c0_228 = arith.constant 0 : index
    %c1_229 = arith.constant 1 : index
    %c1_230 = arith.constant 1 : index
    %c1_231 = arith.constant 1 : index
    %344 = vector.load %arg3[%c0_228, %c1_229, %c1_230, %c1_231] : memref<1x2x22x22xf32, #tpu.memory_space<vmem>>, vector<1x1x16x16xf32>
    %345 = vector.shape_cast %344 : vector<1x1x16x16xf32> to vector<16x16xf32>
    %346 = vector.broadcast %343 : f32 to vector<16x16xf32>
    %347 = arith.mulf %346, %345 : vector<16x16xf32>
    %348 = arith.addf %342, %347 : vector<16x16xf32>
    %c58 = arith.constant 58 : index
    %349 = memref.load %arg1[%c58] : memref<98xf32, #tpu.memory_space<smem>>
    %c0_232 = arith.constant 0 : index
    %c1_233 = arith.constant 1 : index
    %c1_234 = arith.constant 1 : index
    %c2_235 = arith.constant 2 : index
    %350 = vector.load %arg3[%c0_232, %c1_233, %c1_234, %c2_235] : memref<1x2x22x22xf32, #tpu.memory_space<vmem>>, vector<1x1x16x16xf32>
    %351 = vector.shape_cast %350 : vector<1x1x16x16xf32> to vector<16x16xf32>
    %352 = vector.broadcast %349 : f32 to vector<16x16xf32>
    %353 = arith.mulf %352, %351 : vector<16x16xf32>
    %354 = arith.addf %348, %353 : vector<16x16xf32>
    %c59 = arith.constant 59 : index
    %355 = memref.load %arg1[%c59] : memref<98xf32, #tpu.memory_space<smem>>
    %c0_236 = arith.constant 0 : index
    %c1_237 = arith.constant 1 : index
    %c1_238 = arith.constant 1 : index
    %c3_239 = arith.constant 3 : index
    %356 = vector.load %arg3[%c0_236, %c1_237, %c1_238, %c3_239] : memref<1x2x22x22xf32, #tpu.memory_space<vmem>>, vector<1x1x16x16xf32>
    %357 = vector.shape_cast %356 : vector<1x1x16x16xf32> to vector<16x16xf32>
    %358 = vector.broadcast %355 : f32 to vector<16x16xf32>
    %359 = arith.mulf %358, %357 : vector<16x16xf32>
    %360 = arith.addf %354, %359 : vector<16x16xf32>
    %c60 = arith.constant 60 : index
    %361 = memref.load %arg1[%c60] : memref<98xf32, #tpu.memory_space<smem>>
    %c0_240 = arith.constant 0 : index
    %c1_241 = arith.constant 1 : index
    %c1_242 = arith.constant 1 : index
    %c4_243 = arith.constant 4 : index
    %362 = vector.load %arg3[%c0_240, %c1_241, %c1_242, %c4_243] : memref<1x2x22x22xf32, #tpu.memory_space<vmem>>, vector<1x1x16x16xf32>
    %363 = vector.shape_cast %362 : vector<1x1x16x16xf32> to vector<16x16xf32>
    %364 = vector.broadcast %361 : f32 to vector<16x16xf32>
    %365 = arith.mulf %364, %363 : vector<16x16xf32>
    %366 = arith.addf %360, %365 : vector<16x16xf32>
    %c61 = arith.constant 61 : index
    %367 = memref.load %arg1[%c61] : memref<98xf32, #tpu.memory_space<smem>>
    %c0_244 = arith.constant 0 : index
    %c1_245 = arith.constant 1 : index
    %c1_246 = arith.constant 1 : index
    %c5_247 = arith.constant 5 : index
    %368 = vector.load %arg3[%c0_244, %c1_245, %c1_246, %c5_247] : memref<1x2x22x22xf32, #tpu.memory_space<vmem>>, vector<1x1x16x16xf32>
    %369 = vector.shape_cast %368 : vector<1x1x16x16xf32> to vector<16x16xf32>
    %370 = vector.broadcast %367 : f32 to vector<16x16xf32>
    %371 = arith.mulf %370, %369 : vector<16x16xf32>
    %372 = arith.addf %366, %371 : vector<16x16xf32>
    %c62 = arith.constant 62 : index
    %373 = memref.load %arg1[%c62] : memref<98xf32, #tpu.memory_space<smem>>
    %c0_248 = arith.constant 0 : index
    %c1_249 = arith.constant 1 : index
    %c1_250 = arith.constant 1 : index
    %c6_251 = arith.constant 6 : index
    %374 = vector.load %arg3[%c0_248, %c1_249, %c1_250, %c6_251] : memref<1x2x22x22xf32, #tpu.memory_space<vmem>>, vector<1x1x16x16xf32>
    %375 = vector.shape_cast %374 : vector<1x1x16x16xf32> to vector<16x16xf32>
    %376 = vector.broadcast %373 : f32 to vector<16x16xf32>
    %377 = arith.mulf %376, %375 : vector<16x16xf32>
    %378 = arith.addf %372, %377 : vector<16x16xf32>
    %c63 = arith.constant 63 : index
    %379 = memref.load %arg1[%c63] : memref<98xf32, #tpu.memory_space<smem>>
    %c0_252 = arith.constant 0 : index
    %c1_253 = arith.constant 1 : index
    %c2_254 = arith.constant 2 : index
    %c0_255 = arith.constant 0 : index
    %380 = vector.load %arg3[%c0_252, %c1_253, %c2_254, %c0_255] : memref<1x2x22x22xf32, #tpu.memory_space<vmem>>, vector<1x1x16x16xf32>
    %381 = vector.shape_cast %380 : vector<1x1x16x16xf32> to vector<16x16xf32>
    %382 = vector.broadcast %379 : f32 to vector<16x16xf32>
    %383 = arith.mulf %382, %381 : vector<16x16xf32>
    %384 = arith.addf %378, %383 : vector<16x16xf32>
    %c64 = arith.constant 64 : index
    %385 = memref.load %arg1[%c64] : memref<98xf32, #tpu.memory_space<smem>>
    %c0_256 = arith.constant 0 : index
    %c1_257 = arith.constant 1 : index
    %c2_258 = arith.constant 2 : index
    %c1_259 = arith.constant 1 : index
    %386 = vector.load %arg3[%c0_256, %c1_257, %c2_258, %c1_259] : memref<1x2x22x22xf32, #tpu.memory_space<vmem>>, vector<1x1x16x16xf32>
    %387 = vector.shape_cast %386 : vector<1x1x16x16xf32> to vector<16x16xf32>
    %388 = vector.broadcast %385 : f32 to vector<16x16xf32>
    %389 = arith.mulf %388, %387 : vector<16x16xf32>
    %390 = arith.addf %384, %389 : vector<16x16xf32>
    %c65 = arith.constant 65 : index
    %391 = memref.load %arg1[%c65] : memref<98xf32, #tpu.memory_space<smem>>
    %c0_260 = arith.constant 0 : index
    %c1_261 = arith.constant 1 : index
    %c2_262 = arith.constant 2 : index
    %c2_263 = arith.constant 2 : index
    %392 = vector.load %arg3[%c0_260, %c1_261, %c2_262, %c2_263] : memref<1x2x22x22xf32, #tpu.memory_space<vmem>>, vector<1x1x16x16xf32>
    %393 = vector.shape_cast %392 : vector<1x1x16x16xf32> to vector<16x16xf32>
    %394 = vector.broadcast %391 : f32 to vector<16x16xf32>
    %395 = arith.mulf %394, %393 : vector<16x16xf32>
    %396 = arith.addf %390, %395 : vector<16x16xf32>
    %c66 = arith.constant 66 : index
    %397 = memref.load %arg1[%c66] : memref<98xf32, #tpu.memory_space<smem>>
    %c0_264 = arith.constant 0 : index
    %c1_265 = arith.constant 1 : index
    %c2_266 = arith.constant 2 : index
    %c3_267 = arith.constant 3 : index
    %398 = vector.load %arg3[%c0_264, %c1_265, %c2_266, %c3_267] : memref<1x2x22x22xf32, #tpu.memory_space<vmem>>, vector<1x1x16x16xf32>
    %399 = vector.shape_cast %398 : vector<1x1x16x16xf32> to vector<16x16xf32>
    %400 = vector.broadcast %397 : f32 to vector<16x16xf32>
    %401 = arith.mulf %400, %399 : vector<16x16xf32>
    %402 = arith.addf %396, %401 : vector<16x16xf32>
    %c67 = arith.constant 67 : index
    %403 = memref.load %arg1[%c67] : memref<98xf32, #tpu.memory_space<smem>>
    %c0_268 = arith.constant 0 : index
    %c1_269 = arith.constant 1 : index
    %c2_270 = arith.constant 2 : index
    %c4_271 = arith.constant 4 : index
    %404 = vector.load %arg3[%c0_268, %c1_269, %c2_270, %c4_271] : memref<1x2x22x22xf32, #tpu.memory_space<vmem>>, vector<1x1x16x16xf32>
    %405 = vector.shape_cast %404 : vector<1x1x16x16xf32> to vector<16x16xf32>
    %406 = vector.broadcast %403 : f32 to vector<16x16xf32>
    %407 = arith.mulf %406, %405 : vector<16x16xf32>
    %408 = arith.addf %402, %407 : vector<16x16xf32>
    %c68 = arith.constant 68 : index
    %409 = memref.load %arg1[%c68] : memref<98xf32, #tpu.memory_space<smem>>
    %c0_272 = arith.constant 0 : index
    %c1_273 = arith.constant 1 : index
    %c2_274 = arith.constant 2 : index
    %c5_275 = arith.constant 5 : index
    %410 = vector.load %arg3[%c0_272, %c1_273, %c2_274, %c5_275] : memref<1x2x22x22xf32, #tpu.memory_space<vmem>>, vector<1x1x16x16xf32>
    %411 = vector.shape_cast %410 : vector<1x1x16x16xf32> to vector<16x16xf32>
    %412 = vector.broadcast %409 : f32 to vector<16x16xf32>
    %413 = arith.mulf %412, %411 : vector<16x16xf32>
    %414 = arith.addf %408, %413 : vector<16x16xf32>
    %c69 = arith.constant 69 : index
    %415 = memref.load %arg1[%c69] : memref<98xf32, #tpu.memory_space<smem>>
    %c0_276 = arith.constant 0 : index
    %c1_277 = arith.constant 1 : index
    %c2_278 = arith.constant 2 : index
    %c6_279 = arith.constant 6 : index
    %416 = vector.load %arg3[%c0_276, %c1_277, %c2_278, %c6_279] : memref<1x2x22x22xf32, #tpu.memory_space<vmem>>, vector<1x1x16x16xf32>
    %417 = vector.shape_cast %416 : vector<1x1x16x16xf32> to vector<16x16xf32>
    %418 = vector.broadcast %415 : f32 to vector<16x16xf32>
    %419 = arith.mulf %418, %417 : vector<16x16xf32>
    %420 = arith.addf %414, %419 : vector<16x16xf32>
    %c70 = arith.constant 70 : index
    %421 = memref.load %arg1[%c70] : memref<98xf32, #tpu.memory_space<smem>>
    %c0_280 = arith.constant 0 : index
    %c1_281 = arith.constant 1 : index
    %c3_282 = arith.constant 3 : index
    %c0_283 = arith.constant 0 : index
    %422 = vector.load %arg3[%c0_280, %c1_281, %c3_282, %c0_283] : memref<1x2x22x22xf32, #tpu.memory_space<vmem>>, vector<1x1x16x16xf32>
    %423 = vector.shape_cast %422 : vector<1x1x16x16xf32> to vector<16x16xf32>
    %424 = vector.broadcast %421 : f32 to vector<16x16xf32>
    %425 = arith.mulf %424, %423 : vector<16x16xf32>
    %426 = arith.addf %420, %425 : vector<16x16xf32>
    %c71 = arith.constant 71 : index
    %427 = memref.load %arg1[%c71] : memref<98xf32, #tpu.memory_space<smem>>
    %c0_284 = arith.constant 0 : index
    %c1_285 = arith.constant 1 : index
    %c3_286 = arith.constant 3 : index
    %c1_287 = arith.constant 1 : index
    %428 = vector.load %arg3[%c0_284, %c1_285, %c3_286, %c1_287] : memref<1x2x22x22xf32, #tpu.memory_space<vmem>>, vector<1x1x16x16xf32>
    %429 = vector.shape_cast %428 : vector<1x1x16x16xf32> to vector<16x16xf32>
    %430 = vector.broadcast %427 : f32 to vector<16x16xf32>
    %431 = arith.mulf %430, %429 : vector<16x16xf32>
    %432 = arith.addf %426, %431 : vector<16x16xf32>
    %c72 = arith.constant 72 : index
    %433 = memref.load %arg1[%c72] : memref<98xf32, #tpu.memory_space<smem>>
    %c0_288 = arith.constant 0 : index
    %c1_289 = arith.constant 1 : index
    %c3_290 = arith.constant 3 : index
    %c2_291 = arith.constant 2 : index
    %434 = vector.load %arg3[%c0_288, %c1_289, %c3_290, %c2_291] : memref<1x2x22x22xf32, #tpu.memory_space<vmem>>, vector<1x1x16x16xf32>
    %435 = vector.shape_cast %434 : vector<1x1x16x16xf32> to vector<16x16xf32>
    %436 = vector.broadcast %433 : f32 to vector<16x16xf32>
    %437 = arith.mulf %436, %435 : vector<16x16xf32>
    %438 = arith.addf %432, %437 : vector<16x16xf32>
    %c73 = arith.constant 73 : index
    %439 = memref.load %arg1[%c73] : memref<98xf32, #tpu.memory_space<smem>>
    %c0_292 = arith.constant 0 : index
    %c1_293 = arith.constant 1 : index
    %c3_294 = arith.constant 3 : index
    %c3_295 = arith.constant 3 : index
    %440 = vector.load %arg3[%c0_292, %c1_293, %c3_294, %c3_295] : memref<1x2x22x22xf32, #tpu.memory_space<vmem>>, vector<1x1x16x16xf32>
    %441 = vector.shape_cast %440 : vector<1x1x16x16xf32> to vector<16x16xf32>
    %442 = vector.broadcast %439 : f32 to vector<16x16xf32>
    %443 = arith.mulf %442, %441 : vector<16x16xf32>
    %444 = arith.addf %438, %443 : vector<16x16xf32>
    %c74 = arith.constant 74 : index
    %445 = memref.load %arg1[%c74] : memref<98xf32, #tpu.memory_space<smem>>
    %c0_296 = arith.constant 0 : index
    %c1_297 = arith.constant 1 : index
    %c3_298 = arith.constant 3 : index
    %c4_299 = arith.constant 4 : index
    %446 = vector.load %arg3[%c0_296, %c1_297, %c3_298, %c4_299] : memref<1x2x22x22xf32, #tpu.memory_space<vmem>>, vector<1x1x16x16xf32>
    %447 = vector.shape_cast %446 : vector<1x1x16x16xf32> to vector<16x16xf32>
    %448 = vector.broadcast %445 : f32 to vector<16x16xf32>
    %449 = arith.mulf %448, %447 : vector<16x16xf32>
    %450 = arith.addf %444, %449 : vector<16x16xf32>
    %c75 = arith.constant 75 : index
    %451 = memref.load %arg1[%c75] : memref<98xf32, #tpu.memory_space<smem>>
    %c0_300 = arith.constant 0 : index
    %c1_301 = arith.constant 1 : index
    %c3_302 = arith.constant 3 : index
    %c5_303 = arith.constant 5 : index
    %452 = vector.load %arg3[%c0_300, %c1_301, %c3_302, %c5_303] : memref<1x2x22x22xf32, #tpu.memory_space<vmem>>, vector<1x1x16x16xf32>
    %453 = vector.shape_cast %452 : vector<1x1x16x16xf32> to vector<16x16xf32>
    %454 = vector.broadcast %451 : f32 to vector<16x16xf32>
    %455 = arith.mulf %454, %453 : vector<16x16xf32>
    %456 = arith.addf %450, %455 : vector<16x16xf32>
    %c76 = arith.constant 76 : index
    %457 = memref.load %arg1[%c76] : memref<98xf32, #tpu.memory_space<smem>>
    %c0_304 = arith.constant 0 : index
    %c1_305 = arith.constant 1 : index
    %c3_306 = arith.constant 3 : index
    %c6_307 = arith.constant 6 : index
    %458 = vector.load %arg3[%c0_304, %c1_305, %c3_306, %c6_307] : memref<1x2x22x22xf32, #tpu.memory_space<vmem>>, vector<1x1x16x16xf32>
    %459 = vector.shape_cast %458 : vector<1x1x16x16xf32> to vector<16x16xf32>
    %460 = vector.broadcast %457 : f32 to vector<16x16xf32>
    %461 = arith.mulf %460, %459 : vector<16x16xf32>
    %462 = arith.addf %456, %461 : vector<16x16xf32>
    %c77 = arith.constant 77 : index
    %463 = memref.load %arg1[%c77] : memref<98xf32, #tpu.memory_space<smem>>
    %c0_308 = arith.constant 0 : index
    %c1_309 = arith.constant 1 : index
    %c4_310 = arith.constant 4 : index
    %c0_311 = arith.constant 0 : index
    %464 = vector.load %arg3[%c0_308, %c1_309, %c4_310, %c0_311] : memref<1x2x22x22xf32, #tpu.memory_space<vmem>>, vector<1x1x16x16xf32>
    %465 = vector.shape_cast %464 : vector<1x1x16x16xf32> to vector<16x16xf32>
    %466 = vector.broadcast %463 : f32 to vector<16x16xf32>
    %467 = arith.mulf %466, %465 : vector<16x16xf32>
    %468 = arith.addf %462, %467 : vector<16x16xf32>
    %c78 = arith.constant 78 : index
    %469 = memref.load %arg1[%c78] : memref<98xf32, #tpu.memory_space<smem>>
    %c0_312 = arith.constant 0 : index
    %c1_313 = arith.constant 1 : index
    %c4_314 = arith.constant 4 : index
    %c1_315 = arith.constant 1 : index
    %470 = vector.load %arg3[%c0_312, %c1_313, %c4_314, %c1_315] : memref<1x2x22x22xf32, #tpu.memory_space<vmem>>, vector<1x1x16x16xf32>
    %471 = vector.shape_cast %470 : vector<1x1x16x16xf32> to vector<16x16xf32>
    %472 = vector.broadcast %469 : f32 to vector<16x16xf32>
    %473 = arith.mulf %472, %471 : vector<16x16xf32>
    %474 = arith.addf %468, %473 : vector<16x16xf32>
    %c79 = arith.constant 79 : index
    %475 = memref.load %arg1[%c79] : memref<98xf32, #tpu.memory_space<smem>>
    %c0_316 = arith.constant 0 : index
    %c1_317 = arith.constant 1 : index
    %c4_318 = arith.constant 4 : index
    %c2_319 = arith.constant 2 : index
    %476 = vector.load %arg3[%c0_316, %c1_317, %c4_318, %c2_319] : memref<1x2x22x22xf32, #tpu.memory_space<vmem>>, vector<1x1x16x16xf32>
    %477 = vector.shape_cast %476 : vector<1x1x16x16xf32> to vector<16x16xf32>
    %478 = vector.broadcast %475 : f32 to vector<16x16xf32>
    %479 = arith.mulf %478, %477 : vector<16x16xf32>
    %480 = arith.addf %474, %479 : vector<16x16xf32>
    %c80 = arith.constant 80 : index
    %481 = memref.load %arg1[%c80] : memref<98xf32, #tpu.memory_space<smem>>
    %c0_320 = arith.constant 0 : index
    %c1_321 = arith.constant 1 : index
    %c4_322 = arith.constant 4 : index
    %c3_323 = arith.constant 3 : index
    %482 = vector.load %arg3[%c0_320, %c1_321, %c4_322, %c3_323] : memref<1x2x22x22xf32, #tpu.memory_space<vmem>>, vector<1x1x16x16xf32>
    %483 = vector.shape_cast %482 : vector<1x1x16x16xf32> to vector<16x16xf32>
    %484 = vector.broadcast %481 : f32 to vector<16x16xf32>
    %485 = arith.mulf %484, %483 : vector<16x16xf32>
    %486 = arith.addf %480, %485 : vector<16x16xf32>
    %c81 = arith.constant 81 : index
    %487 = memref.load %arg1[%c81] : memref<98xf32, #tpu.memory_space<smem>>
    %c0_324 = arith.constant 0 : index
    %c1_325 = arith.constant 1 : index
    %c4_326 = arith.constant 4 : index
    %c4_327 = arith.constant 4 : index
    %488 = vector.load %arg3[%c0_324, %c1_325, %c4_326, %c4_327] : memref<1x2x22x22xf32, #tpu.memory_space<vmem>>, vector<1x1x16x16xf32>
    %489 = vector.shape_cast %488 : vector<1x1x16x16xf32> to vector<16x16xf32>
    %490 = vector.broadcast %487 : f32 to vector<16x16xf32>
    %491 = arith.mulf %490, %489 : vector<16x16xf32>
    %492 = arith.addf %486, %491 : vector<16x16xf32>
    %c82 = arith.constant 82 : index
    %493 = memref.load %arg1[%c82] : memref<98xf32, #tpu.memory_space<smem>>
    %c0_328 = arith.constant 0 : index
    %c1_329 = arith.constant 1 : index
    %c4_330 = arith.constant 4 : index
    %c5_331 = arith.constant 5 : index
    %494 = vector.load %arg3[%c0_328, %c1_329, %c4_330, %c5_331] : memref<1x2x22x22xf32, #tpu.memory_space<vmem>>, vector<1x1x16x16xf32>
    %495 = vector.shape_cast %494 : vector<1x1x16x16xf32> to vector<16x16xf32>
    %496 = vector.broadcast %493 : f32 to vector<16x16xf32>
    %497 = arith.mulf %496, %495 : vector<16x16xf32>
    %498 = arith.addf %492, %497 : vector<16x16xf32>
    %c83 = arith.constant 83 : index
    %499 = memref.load %arg1[%c83] : memref<98xf32, #tpu.memory_space<smem>>
    %c0_332 = arith.constant 0 : index
    %c1_333 = arith.constant 1 : index
    %c4_334 = arith.constant 4 : index
    %c6_335 = arith.constant 6 : index
    %500 = vector.load %arg3[%c0_332, %c1_333, %c4_334, %c6_335] : memref<1x2x22x22xf32, #tpu.memory_space<vmem>>, vector<1x1x16x16xf32>
    %501 = vector.shape_cast %500 : vector<1x1x16x16xf32> to vector<16x16xf32>
    %502 = vector.broadcast %499 : f32 to vector<16x16xf32>
    %503 = arith.mulf %502, %501 : vector<16x16xf32>
    %504 = arith.addf %498, %503 : vector<16x16xf32>
    %c84 = arith.constant 84 : index
    %505 = memref.load %arg1[%c84] : memref<98xf32, #tpu.memory_space<smem>>
    %c0_336 = arith.constant 0 : index
    %c1_337 = arith.constant 1 : index
    %c5_338 = arith.constant 5 : index
    %c0_339 = arith.constant 0 : index
    %506 = vector.load %arg3[%c0_336, %c1_337, %c5_338, %c0_339] : memref<1x2x22x22xf32, #tpu.memory_space<vmem>>, vector<1x1x16x16xf32>
    %507 = vector.shape_cast %506 : vector<1x1x16x16xf32> to vector<16x16xf32>
    %508 = vector.broadcast %505 : f32 to vector<16x16xf32>
    %509 = arith.mulf %508, %507 : vector<16x16xf32>
    %510 = arith.addf %504, %509 : vector<16x16xf32>
    %c85 = arith.constant 85 : index
    %511 = memref.load %arg1[%c85] : memref<98xf32, #tpu.memory_space<smem>>
    %c0_340 = arith.constant 0 : index
    %c1_341 = arith.constant 1 : index
    %c5_342 = arith.constant 5 : index
    %c1_343 = arith.constant 1 : index
    %512 = vector.load %arg3[%c0_340, %c1_341, %c5_342, %c1_343] : memref<1x2x22x22xf32, #tpu.memory_space<vmem>>, vector<1x1x16x16xf32>
    %513 = vector.shape_cast %512 : vector<1x1x16x16xf32> to vector<16x16xf32>
    %514 = vector.broadcast %511 : f32 to vector<16x16xf32>
    %515 = arith.mulf %514, %513 : vector<16x16xf32>
    %516 = arith.addf %510, %515 : vector<16x16xf32>
    %c86 = arith.constant 86 : index
    %517 = memref.load %arg1[%c86] : memref<98xf32, #tpu.memory_space<smem>>
    %c0_344 = arith.constant 0 : index
    %c1_345 = arith.constant 1 : index
    %c5_346 = arith.constant 5 : index
    %c2_347 = arith.constant 2 : index
    %518 = vector.load %arg3[%c0_344, %c1_345, %c5_346, %c2_347] : memref<1x2x22x22xf32, #tpu.memory_space<vmem>>, vector<1x1x16x16xf32>
    %519 = vector.shape_cast %518 : vector<1x1x16x16xf32> to vector<16x16xf32>
    %520 = vector.broadcast %517 : f32 to vector<16x16xf32>
    %521 = arith.mulf %520, %519 : vector<16x16xf32>
    %522 = arith.addf %516, %521 : vector<16x16xf32>
    %c87 = arith.constant 87 : index
    %523 = memref.load %arg1[%c87] : memref<98xf32, #tpu.memory_space<smem>>
    %c0_348 = arith.constant 0 : index
    %c1_349 = arith.constant 1 : index
    %c5_350 = arith.constant 5 : index
    %c3_351 = arith.constant 3 : index
    %524 = vector.load %arg3[%c0_348, %c1_349, %c5_350, %c3_351] : memref<1x2x22x22xf32, #tpu.memory_space<vmem>>, vector<1x1x16x16xf32>
    %525 = vector.shape_cast %524 : vector<1x1x16x16xf32> to vector<16x16xf32>
    %526 = vector.broadcast %523 : f32 to vector<16x16xf32>
    %527 = arith.mulf %526, %525 : vector<16x16xf32>
    %528 = arith.addf %522, %527 : vector<16x16xf32>
    %c88 = arith.constant 88 : index
    %529 = memref.load %arg1[%c88] : memref<98xf32, #tpu.memory_space<smem>>
    %c0_352 = arith.constant 0 : index
    %c1_353 = arith.constant 1 : index
    %c5_354 = arith.constant 5 : index
    %c4_355 = arith.constant 4 : index
    %530 = vector.load %arg3[%c0_352, %c1_353, %c5_354, %c4_355] : memref<1x2x22x22xf32, #tpu.memory_space<vmem>>, vector<1x1x16x16xf32>
    %531 = vector.shape_cast %530 : vector<1x1x16x16xf32> to vector<16x16xf32>
    %532 = vector.broadcast %529 : f32 to vector<16x16xf32>
    %533 = arith.mulf %532, %531 : vector<16x16xf32>
    %534 = arith.addf %528, %533 : vector<16x16xf32>
    %c89 = arith.constant 89 : index
    %535 = memref.load %arg1[%c89] : memref<98xf32, #tpu.memory_space<smem>>
    %c0_356 = arith.constant 0 : index
    %c1_357 = arith.constant 1 : index
    %c5_358 = arith.constant 5 : index
    %c5_359 = arith.constant 5 : index
    %536 = vector.load %arg3[%c0_356, %c1_357, %c5_358, %c5_359] : memref<1x2x22x22xf32, #tpu.memory_space<vmem>>, vector<1x1x16x16xf32>
    %537 = vector.shape_cast %536 : vector<1x1x16x16xf32> to vector<16x16xf32>
    %538 = vector.broadcast %535 : f32 to vector<16x16xf32>
    %539 = arith.mulf %538, %537 : vector<16x16xf32>
    %540 = arith.addf %534, %539 : vector<16x16xf32>
    %c90 = arith.constant 90 : index
    %541 = memref.load %arg1[%c90] : memref<98xf32, #tpu.memory_space<smem>>
    %c0_360 = arith.constant 0 : index
    %c1_361 = arith.constant 1 : index
    %c5_362 = arith.constant 5 : index
    %c6_363 = arith.constant 6 : index
    %542 = vector.load %arg3[%c0_360, %c1_361, %c5_362, %c6_363] : memref<1x2x22x22xf32, #tpu.memory_space<vmem>>, vector<1x1x16x16xf32>
    %543 = vector.shape_cast %542 : vector<1x1x16x16xf32> to vector<16x16xf32>
    %544 = vector.broadcast %541 : f32 to vector<16x16xf32>
    %545 = arith.mulf %544, %543 : vector<16x16xf32>
    %546 = arith.addf %540, %545 : vector<16x16xf32>
    %c91 = arith.constant 91 : index
    %547 = memref.load %arg1[%c91] : memref<98xf32, #tpu.memory_space<smem>>
    %c0_364 = arith.constant 0 : index
    %c1_365 = arith.constant 1 : index
    %c6_366 = arith.constant 6 : index
    %c0_367 = arith.constant 0 : index
    %548 = vector.load %arg3[%c0_364, %c1_365, %c6_366, %c0_367] : memref<1x2x22x22xf32, #tpu.memory_space<vmem>>, vector<1x1x16x16xf32>
    %549 = vector.shape_cast %548 : vector<1x1x16x16xf32> to vector<16x16xf32>
    %550 = vector.broadcast %547 : f32 to vector<16x16xf32>
    %551 = arith.mulf %550, %549 : vector<16x16xf32>
    %552 = arith.addf %546, %551 : vector<16x16xf32>
    %c92 = arith.constant 92 : index
    %553 = memref.load %arg1[%c92] : memref<98xf32, #tpu.memory_space<smem>>
    %c0_368 = arith.constant 0 : index
    %c1_369 = arith.constant 1 : index
    %c6_370 = arith.constant 6 : index
    %c1_371 = arith.constant 1 : index
    %554 = vector.load %arg3[%c0_368, %c1_369, %c6_370, %c1_371] : memref<1x2x22x22xf32, #tpu.memory_space<vmem>>, vector<1x1x16x16xf32>
    %555 = vector.shape_cast %554 : vector<1x1x16x16xf32> to vector<16x16xf32>
    %556 = vector.broadcast %553 : f32 to vector<16x16xf32>
    %557 = arith.mulf %556, %555 : vector<16x16xf32>
    %558 = arith.addf %552, %557 : vector<16x16xf32>
    %c93 = arith.constant 93 : index
    %559 = memref.load %arg1[%c93] : memref<98xf32, #tpu.memory_space<smem>>
    %c0_372 = arith.constant 0 : index
    %c1_373 = arith.constant 1 : index
    %c6_374 = arith.constant 6 : index
    %c2_375 = arith.constant 2 : index
    %560 = vector.load %arg3[%c0_372, %c1_373, %c6_374, %c2_375] : memref<1x2x22x22xf32, #tpu.memory_space<vmem>>, vector<1x1x16x16xf32>
    %561 = vector.shape_cast %560 : vector<1x1x16x16xf32> to vector<16x16xf32>
    %562 = vector.broadcast %559 : f32 to vector<16x16xf32>
    %563 = arith.mulf %562, %561 : vector<16x16xf32>
    %564 = arith.addf %558, %563 : vector<16x16xf32>
    %c94 = arith.constant 94 : index
    %565 = memref.load %arg1[%c94] : memref<98xf32, #tpu.memory_space<smem>>
    %c0_376 = arith.constant 0 : index
    %c1_377 = arith.constant 1 : index
    %c6_378 = arith.constant 6 : index
    %c3_379 = arith.constant 3 : index
    %566 = vector.load %arg3[%c0_376, %c1_377, %c6_378, %c3_379] : memref<1x2x22x22xf32, #tpu.memory_space<vmem>>, vector<1x1x16x16xf32>
    %567 = vector.shape_cast %566 : vector<1x1x16x16xf32> to vector<16x16xf32>
    %568 = vector.broadcast %565 : f32 to vector<16x16xf32>
    %569 = arith.mulf %568, %567 : vector<16x16xf32>
    %570 = arith.addf %564, %569 : vector<16x16xf32>
    %c95 = arith.constant 95 : index
    %571 = memref.load %arg1[%c95] : memref<98xf32, #tpu.memory_space<smem>>
    %c0_380 = arith.constant 0 : index
    %c1_381 = arith.constant 1 : index
    %c6_382 = arith.constant 6 : index
    %c4_383 = arith.constant 4 : index
    %572 = vector.load %arg3[%c0_380, %c1_381, %c6_382, %c4_383] : memref<1x2x22x22xf32, #tpu.memory_space<vmem>>, vector<1x1x16x16xf32>
    %573 = vector.shape_cast %572 : vector<1x1x16x16xf32> to vector<16x16xf32>
    %574 = vector.broadcast %571 : f32 to vector<16x16xf32>
    %575 = arith.mulf %574, %573 : vector<16x16xf32>
    %576 = arith.addf %570, %575 : vector<16x16xf32>
    %c96 = arith.constant 96 : index
    %577 = memref.load %arg1[%c96] : memref<98xf32, #tpu.memory_space<smem>>
    %c0_384 = arith.constant 0 : index
    %c1_385 = arith.constant 1 : index
    %c6_386 = arith.constant 6 : index
    %c5_387 = arith.constant 5 : index
    %578 = vector.load %arg3[%c0_384, %c1_385, %c6_386, %c5_387] : memref<1x2x22x22xf32, #tpu.memory_space<vmem>>, vector<1x1x16x16xf32>
    %579 = vector.shape_cast %578 : vector<1x1x16x16xf32> to vector<16x16xf32>
    %580 = vector.broadcast %577 : f32 to vector<16x16xf32>
    %581 = arith.mulf %580, %579 : vector<16x16xf32>
    %582 = arith.addf %576, %581 : vector<16x16xf32>
    %c97 = arith.constant 97 : index
    %583 = memref.load %arg1[%c97] : memref<98xf32, #tpu.memory_space<smem>>
    %c0_388 = arith.constant 0 : index
    %c1_389 = arith.constant 1 : index
    %c6_390 = arith.constant 6 : index
    %c6_391 = arith.constant 6 : index
    %584 = vector.load %arg3[%c0_388, %c1_389, %c6_390, %c6_391] : memref<1x2x22x22xf32, #tpu.memory_space<vmem>>, vector<1x1x16x16xf32>
    %585 = vector.shape_cast %584 : vector<1x1x16x16xf32> to vector<16x16xf32>
    %586 = vector.broadcast %583 : f32 to vector<16x16xf32>
    %587 = arith.mulf %586, %585 : vector<16x16xf32>
    %588 = arith.addf %582, %587 : vector<16x16xf32>
    %c0_392 = arith.constant 0 : index
    %589 = memref.load %arg2[%c0_392] : memref<1xf32, #tpu.memory_space<smem>>
    %590 = vector.broadcast %589 : f32 to vector<16x16xf32>
    %591 = arith.addf %588, %590 : vector<16x16xf32>
    %592 = arith.negf %591 : vector<16x16xf32>
    %593 = math.exp %592 : vector<16x16xf32>
    %cst_393 = arith.constant 1.000000e+00 : f32
    %594 = vector.broadcast %cst_393 : f32 to vector<16x16xf32>
    %595 = arith.addf %594, %593 : vector<16x16xf32>
    %596 = arith.divf %594, %595 : vector<16x16xf32>
    %597 = vector.extract_strided_slice %596 {offsets = [0, 0], sizes = [1, 16], strides = [1, 1]} : vector<16x16xf32> to vector<1x16xf32>
    %c0_394 = arith.constant 0 : index
    %c0_395 = arith.constant 0 : index
    %c0_396 = arith.constant 0 : index
    %598 = vector.load %arg4[%c0_394, %c0_395, %c0_396] : memref<1x1x256xf32, #tpu.memory_space<vmem>>, vector<1x1x16xf32>
    %599 = vector.shape_cast %598 : vector<1x1x16xf32> to vector<1x16xf32>
    %600 = vector.shape_cast %597 : vector<1x16xf32> to vector<1x1x16xf32>
    tpu.vector_store %arg4[%c0_394, %c0_395, %c0_396], %600 {strides = array<i32>} : memref<1x1x256xf32, #tpu.memory_space<vmem>>, vector<1x1x16xf32>,
    %601 = vector.extract_strided_slice %596 {offsets = [1, 0], sizes = [1, 16], strides = [1, 1]} : vector<16x16xf32> to vector<1x16xf32>
    %c0_397 = arith.constant 0 : index
    %c0_398 = arith.constant 0 : index
    %c16_399 = arith.constant 16 : index
    %602 = vector.load %arg4[%c0_397, %c0_398, %c16_399] : memref<1x1x256xf32, #tpu.memory_space<vmem>>, vector<1x1x16xf32>
    %603 = vector.shape_cast %602 : vector<1x1x16xf32> to vector<1x16xf32>
    %604 = vector.shape_cast %601 : vector<1x16xf32> to vector<1x1x16xf32>
    tpu.vector_store %arg4[%c0_397, %c0_398, %c16_399], %604 {strides = array<i32>} : memref<1x1x256xf32, #tpu.memory_space<vmem>>, vector<1x1x16xf32>,
    %605 = vector.extract_strided_slice %596 {offsets = [2, 0], sizes = [1, 16], strides = [1, 1]} : vector<16x16xf32> to vector<1x16xf32>
    %c0_400 = arith.constant 0 : index
    %c0_401 = arith.constant 0 : index
    %c32_402 = arith.constant 32 : index
    %606 = vector.load %arg4[%c0_400, %c0_401, %c32_402] : memref<1x1x256xf32, #tpu.memory_space<vmem>>, vector<1x1x16xf32>
    %607 = vector.shape_cast %606 : vector<1x1x16xf32> to vector<1x16xf32>
    %608 = vector.shape_cast %605 : vector<1x16xf32> to vector<1x1x16xf32>
    tpu.vector_store %arg4[%c0_400, %c0_401, %c32_402], %608 {strides = array<i32>} : memref<1x1x256xf32, #tpu.memory_space<vmem>>, vector<1x1x16xf32>,
    %609 = vector.extract_strided_slice %596 {offsets = [3, 0], sizes = [1, 16], strides = [1, 1]} : vector<16x16xf32> to vector<1x16xf32>
    %c0_403 = arith.constant 0 : index
    %c0_404 = arith.constant 0 : index
    %c48_405 = arith.constant 48 : index
    %610 = vector.load %arg4[%c0_403, %c0_404, %c48_405] : memref<1x1x256xf32, #tpu.memory_space<vmem>>, vector<1x1x16xf32>
    %611 = vector.shape_cast %610 : vector<1x1x16xf32> to vector<1x16xf32>
    %612 = vector.shape_cast %609 : vector<1x16xf32> to vector<1x1x16xf32>
    tpu.vector_store %arg4[%c0_403, %c0_404, %c48_405], %612 {strides = array<i32>} : memref<1x1x256xf32, #tpu.memory_space<vmem>>, vector<1x1x16xf32>,
    %613 = vector.extract_strided_slice %596 {offsets = [4, 0], sizes = [1, 16], strides = [1, 1]} : vector<16x16xf32> to vector<1x16xf32>
    %c0_406 = arith.constant 0 : index
    %c0_407 = arith.constant 0 : index
    %c64_408 = arith.constant 64 : index
    %614 = vector.load %arg4[%c0_406, %c0_407, %c64_408] : memref<1x1x256xf32, #tpu.memory_space<vmem>>, vector<1x1x16xf32>
    %615 = vector.shape_cast %614 : vector<1x1x16xf32> to vector<1x16xf32>
    %616 = vector.shape_cast %613 : vector<1x16xf32> to vector<1x1x16xf32>
    tpu.vector_store %arg4[%c0_406, %c0_407, %c64_408], %616 {strides = array<i32>} : memref<1x1x256xf32, #tpu.memory_space<vmem>>, vector<1x1x16xf32>,
    %617 = vector.extract_strided_slice %596 {offsets = [5, 0], sizes = [1, 16], strides = [1, 1]} : vector<16x16xf32> to vector<1x16xf32>
    %c0_409 = arith.constant 0 : index
    %c0_410 = arith.constant 0 : index
    %c80_411 = arith.constant 80 : index
    %618 = vector.load %arg4[%c0_409, %c0_410, %c80_411] : memref<1x1x256xf32, #tpu.memory_space<vmem>>, vector<1x1x16xf32>
    %619 = vector.shape_cast %618 : vector<1x1x16xf32> to vector<1x16xf32>
    %620 = vector.shape_cast %617 : vector<1x16xf32> to vector<1x1x16xf32>
    tpu.vector_store %arg4[%c0_409, %c0_410, %c80_411], %620 {strides = array<i32>} : memref<1x1x256xf32, #tpu.memory_space<vmem>>, vector<1x1x16xf32>,
    %621 = vector.extract_strided_slice %596 {offsets = [6, 0], sizes = [1, 16], strides = [1, 1]} : vector<16x16xf32> to vector<1x16xf32>
    %c0_412 = arith.constant 0 : index
    %c0_413 = arith.constant 0 : index
    %c96_414 = arith.constant 96 : index
    %622 = vector.load %arg4[%c0_412, %c0_413, %c96_414] : memref<1x1x256xf32, #tpu.memory_space<vmem>>, vector<1x1x16xf32>
    %623 = vector.shape_cast %622 : vector<1x1x16xf32> to vector<1x16xf32>
    %624 = vector.shape_cast %621 : vector<1x16xf32> to vector<1x1x16xf32>
    tpu.vector_store %arg4[%c0_412, %c0_413, %c96_414], %624 {strides = array<i32>} : memref<1x1x256xf32, #tpu.memory_space<vmem>>, vector<1x1x16xf32>,
    %625 = vector.extract_strided_slice %596 {offsets = [7, 0], sizes = [1, 16], strides = [1, 1]} : vector<16x16xf32> to vector<1x16xf32>
    %c0_415 = arith.constant 0 : index
    %c0_416 = arith.constant 0 : index
    %c112 = arith.constant 112 : index
    %626 = vector.load %arg4[%c0_415, %c0_416, %c112] : memref<1x1x256xf32, #tpu.memory_space<vmem>>, vector<1x1x16xf32>
    %627 = vector.shape_cast %626 : vector<1x1x16xf32> to vector<1x16xf32>
    %628 = vector.shape_cast %625 : vector<1x16xf32> to vector<1x1x16xf32>
    tpu.vector_store %arg4[%c0_415, %c0_416, %c112], %628 {strides = array<i32>} : memref<1x1x256xf32, #tpu.memory_space<vmem>>, vector<1x1x16xf32>,
    %629 = vector.extract_strided_slice %596 {offsets = [8, 0], sizes = [1, 16], strides = [1, 1]} : vector<16x16xf32> to vector<1x16xf32>
    %c0_417 = arith.constant 0 : index
    %c0_418 = arith.constant 0 : index
    %c128 = arith.constant 128 : index
    %630 = vector.load %arg4[%c0_417, %c0_418, %c128] : memref<1x1x256xf32, #tpu.memory_space<vmem>>, vector<1x1x16xf32>
    %631 = vector.shape_cast %630 : vector<1x1x16xf32> to vector<1x16xf32>
    %632 = vector.shape_cast %629 : vector<1x16xf32> to vector<1x1x16xf32>
    tpu.vector_store %arg4[%c0_417, %c0_418, %c128], %632 {strides = array<i32>} : memref<1x1x256xf32, #tpu.memory_space<vmem>>, vector<1x1x16xf32>,
    %633 = vector.extract_strided_slice %596 {offsets = [9, 0], sizes = [1, 16], strides = [1, 1]} : vector<16x16xf32> to vector<1x16xf32>
    %c0_419 = arith.constant 0 : index
    %c0_420 = arith.constant 0 : index
    %c144 = arith.constant 144 : index
    %634 = vector.load %arg4[%c0_419, %c0_420, %c144] : memref<1x1x256xf32, #tpu.memory_space<vmem>>, vector<1x1x16xf32>
    %635 = vector.shape_cast %634 : vector<1x1x16xf32> to vector<1x16xf32>
    %636 = vector.shape_cast %633 : vector<1x16xf32> to vector<1x1x16xf32>
    tpu.vector_store %arg4[%c0_419, %c0_420, %c144], %636 {strides = array<i32>} : memref<1x1x256xf32, #tpu.memory_space<vmem>>, vector<1x1x16xf32>,
    %637 = vector.extract_strided_slice %596 {offsets = [10, 0], sizes = [1, 16], strides = [1, 1]} : vector<16x16xf32> to vector<1x16xf32>
    %c0_421 = arith.constant 0 : index
    %c0_422 = arith.constant 0 : index
    %c160 = arith.constant 160 : index
    %638 = vector.load %arg4[%c0_421, %c0_422, %c160] : memref<1x1x256xf32, #tpu.memory_space<vmem>>, vector<1x1x16xf32>
    %639 = vector.shape_cast %638 : vector<1x1x16xf32> to vector<1x16xf32>
    %640 = vector.shape_cast %637 : vector<1x16xf32> to vector<1x1x16xf32>
    tpu.vector_store %arg4[%c0_421, %c0_422, %c160], %640 {strides = array<i32>} : memref<1x1x256xf32, #tpu.memory_space<vmem>>, vector<1x1x16xf32>,
    %641 = vector.extract_strided_slice %596 {offsets = [11, 0], sizes = [1, 16], strides = [1, 1]} : vector<16x16xf32> to vector<1x16xf32>
    %c0_423 = arith.constant 0 : index
    %c0_424 = arith.constant 0 : index
    %c176 = arith.constant 176 : index
    %642 = vector.load %arg4[%c0_423, %c0_424, %c176] : memref<1x1x256xf32, #tpu.memory_space<vmem>>, vector<1x1x16xf32>
    %643 = vector.shape_cast %642 : vector<1x1x16xf32> to vector<1x16xf32>
    %644 = vector.shape_cast %641 : vector<1x16xf32> to vector<1x1x16xf32>
    tpu.vector_store %arg4[%c0_423, %c0_424, %c176], %644 {strides = array<i32>} : memref<1x1x256xf32, #tpu.memory_space<vmem>>, vector<1x1x16xf32>,
    %645 = vector.extract_strided_slice %596 {offsets = [12, 0], sizes = [1, 16], strides = [1, 1]} : vector<16x16xf32> to vector<1x16xf32>
    %c0_425 = arith.constant 0 : index
    %c0_426 = arith.constant 0 : index
    %c192 = arith.constant 192 : index
    %646 = vector.load %arg4[%c0_425, %c0_426, %c192] : memref<1x1x256xf32, #tpu.memory_space<vmem>>, vector<1x1x16xf32>
    %647 = vector.shape_cast %646 : vector<1x1x16xf32> to vector<1x16xf32>
    %648 = vector.shape_cast %645 : vector<1x16xf32> to vector<1x1x16xf32>
    tpu.vector_store %arg4[%c0_425, %c0_426, %c192], %648 {strides = array<i32>} : memref<1x1x256xf32, #tpu.memory_space<vmem>>, vector<1x1x16xf32>,
    %649 = vector.extract_strided_slice %596 {offsets = [13, 0], sizes = [1, 16], strides = [1, 1]} : vector<16x16xf32> to vector<1x16xf32>
    %c0_427 = arith.constant 0 : index
    %c0_428 = arith.constant 0 : index
    %c208 = arith.constant 208 : index
    %650 = vector.load %arg4[%c0_427, %c0_428, %c208] : memref<1x1x256xf32, #tpu.memory_space<vmem>>, vector<1x1x16xf32>
    %651 = vector.shape_cast %650 : vector<1x1x16xf32> to vector<1x16xf32>
    %652 = vector.shape_cast %649 : vector<1x16xf32> to vector<1x1x16xf32>
    tpu.vector_store %arg4[%c0_427, %c0_428, %c208], %652 {strides = array<i32>} : memref<1x1x256xf32, #tpu.memory_space<vmem>>, vector<1x1x16xf32>,
    %653 = vector.extract_strided_slice %596 {offsets = [14, 0], sizes = [1, 16], strides = [1, 1]} : vector<16x16xf32> to vector<1x16xf32>
    %c0_429 = arith.constant 0 : index
    %c0_430 = arith.constant 0 : index
    %c224 = arith.constant 224 : index
    %654 = vector.load %arg4[%c0_429, %c0_430, %c224] : memref<1x1x256xf32, #tpu.memory_space<vmem>>, vector<1x1x16xf32>
    %655 = vector.shape_cast %654 : vector<1x1x16xf32> to vector<1x16xf32>
    %656 = vector.shape_cast %653 : vector<1x16xf32> to vector<1x1x16xf32>
    tpu.vector_store %arg4[%c0_429, %c0_430, %c224], %656 {strides = array<i32>} : memref<1x1x256xf32, #tpu.memory_space<vmem>>, vector<1x1x16xf32>,
    %657 = vector.extract_strided_slice %596 {offsets = [15, 0], sizes = [1, 16], strides = [1, 1]} : vector<16x16xf32> to vector<1x16xf32>
    %c0_431 = arith.constant 0 : index
    %c0_432 = arith.constant 0 : index
    %c240 = arith.constant 240 : index
    %658 = vector.load %arg4[%c0_431, %c0_432, %c240] : memref<1x1x256xf32, #tpu.memory_space<vmem>>, vector<1x1x16xf32>
    %659 = vector.shape_cast %658 : vector<1x1x16xf32> to vector<1x16xf32>
    %660 = vector.shape_cast %657 : vector<1x16xf32> to vector<1x1x16xf32>
    tpu.vector_store %arg4[%c0_431, %c0_432, %c240], %660 {strides = array<i32>} : memref<1x1x256xf32, #tpu.memory_space<vmem>>, vector<1x1x16xf32>,
    return
  }
  func.func @transform_0(%arg0: i32) -> i32 {
    %c0_i32 = arith.constant 0 : i32
    %c0_i32_0 = arith.constant 0 : i32
    return %c0_i32 : i32
  }
  func.func @transform_1(%arg0: i32) -> i32 {
    %c0_i32 = arith.constant 0 : i32
    %c0_i32_0 = arith.constant 0 : i32
    return %c0_i32 : i32
  }
  func.func @transform_2(%arg0: i32) -> (i32, i32, i32, i32) {
    %c0_i32 = arith.constant 0 : i32
    %c0_i32_0 = arith.constant 0 : i32
    %c0_i32_1 = arith.constant 0 : i32
    %c0_i32_2 = arith.constant 0 : i32
    return %arg0, %c0_i32, %c0_i32_0, %c0_i32_1 : i32, i32, i32, i32
  }
  func.func @transform_3(%arg0: i32) -> (i32, i32, i32) {
    %c0_i32 = arith.constant 0 : i32
    %c0_i32_0 = arith.constant 0 : i32
    %c0_i32_1 = arith.constant 0 : i32
    return %arg0, %c0_i32, %c0_i32_0 : i32, i32, i32
  }
}

</mosaic_0001>

<bundles_post_ra>
// kernel: cbam_forward.5
= control target key start
LH: loop header
LB: loop body
LE: loop exit
PB: predicated region body
PF: predicated region fallthrough
CT: control target
= control target key end

     0   :  { %s590_s12 = smov 0   ;;  %s592_s13 = smov 0   ;;  %s690_s0 = inlined_call_operand.vmem [shape: f32[2,64,256], index: 0, kind: input, shape index: {}]   ;;  %s691_s1 = inlined_call_operand.vmem [shape: f32[2,64,1], index: 1, kind: input, shape index: {}]   ;;  %s692_s2 = inlined_call_operand.vmem [shape: f32[2,1,256], index: 2, kind: input, shape index: {}]   ;;  %s693_s3 = inlined_call_operand.vmem [shape: f32[2,64,256], index: 3, kind: output, shape index: {}]  }
   0x1   :  { %s594_s14 = smov 0  }
   0x2 LB: > { %s25_s15 = sadd.s32 1, %s563_s13  ;;  %p505_p0 = scmp.ge.s32.totalorder %s567_s14, 1  ;;  %s567_s14 = sphi %s594_s14, %s13_s14   ;;  %s563_s13 = sphi %s592_s13, %s695_s13   ;;  %s559_s12 = sphi %s590_s12, %s694_s12  }
   0x3   : > { %p27_p1 = scmp.ge.s32.totalorder %s25_s15, 2  ;;  %p184_p2 = scmp.lt.s32.totalorder %s567_s14, 3 }
   0x5   : > { %s697_s15 = smov (%p27_p1, %s25_s15), 0  ;;  %p185_p3 = pnand %p505_p0, %p184_p2 }
   0x6   : > { %p230_p4 = scmp.lt.s32.totalorder (!%p185_p3), %s559_s12, 1  ;;  %v569_v0 = vmov (!%p185_p3), 0   ;;  %v345_v9 = vlaneseq (!%p185_p3) }
   0x7   : > { %188 = sbr.rel (%p185_p3) target bundleno = 164 (0xa4), region = 32  ;;  %544 = vset.pattern.permute.xlu1 (!%p185_p3), %v569_v0  ;;  %543 = vset.pattern.permute.xlu0 (!%p185_p3), %v569_v0 }
   0x8   : > { %v346_v10 = vshrl.u32 (!%p185_p3), %v345_v9, 7 }
   0xa   : > { %v347_v11 = vsub.s32 (!%p185_p3), 0, %v346_v10  ;;  %v351_v12 = vsub.s32 (!%p185_p3), 1, %v346_v10 }
   0xe   : > { %s699_s12 = smov (!%p230_p4, %s559_s12), 1 }
   0xf   : > { %s516_s16 = sshll.u32 %s699_s12, 6  ;;  %s510_s20 = sshll.u32 %s699_s12, 1 }
  0x10   : > { %s243_s19 = scalar_lea.vmem %s691_s1, %s516_s16  ;;  %s515_s21 = sshll.u32 %s699_s12, 7 }
  0x11   : > { %v281_v1 = vld [vmem:[%s243_s19 + $0x10] sm:$0xff]  ;;  %v279_v2 = vld [vmem:[%s243_s19] sm:$0xff]  ;;  %v282_v3 = vld [vmem:[%s243_s19 + $0x18] sm:$0xff]  ;;  %s251_s24 = scalar_lea.vmem %s692_s2, %s510_s20  ;;  %s622_s27 = scalar_lea.vmem %s690_s0, %s515_s21 }
  0x12   : > { %300 = vperm.xlu1 %544, %v281_v1   ;;  %290 = vperm.xlu0 %543, %v279_v2   ;;  %v280_v4 = vld [vmem:[%s243_s19 + $0x8] sm:$0xff]  ;;  %v283_v6 = vld [vmem:[%s243_s19 + $0x20] sm:$0xff]  ;;  %v286_v7 = vld [vmem:[%s243_s19 + $0x38] sm:$0xff]  ;;  %s636_s30 = scalar_lea.vmem %s693_s3, %s515_s21 }
  0x13   : > { %v284_v5 = vld [vmem:[%s243_s19 + $0x28] sm:$0xff]  ;;  %v285_v8 = vld [vmem:[%s243_s19 + $0x30] sm:$0xff]  ;;  %v287_v13 = vld [vmem:[%s251_s24] sm:$0x3] }
  0x14   : > { %v267_v14 = vld [vmem:[%s622_s27 + $0x20] sm:$0xff]  ;;  %v268_v15 = vld [vmem:[%s622_s27 + $0x28] sm:$0xff]  ;;  %v628_v18 = vrot.slane %v287_v13, %v347_v11  ;;  %v630_v19 = vrot.slane %v287_v13, %v351_v12  ;;  %v269_v26 = vld [vmem:[%s622_s27 + $0x30] sm:$0xff] }
  0x15   : > { %v263_v16 = vld [vmem:[%s622_s27] sm:$0xff]  ;;  %v264_v17 = vld [vmem:[%s622_s27 + $0x8] sm:$0xff]  ;;  %v270_v27 = vld [vmem:[%s622_s27 + $0x38] sm:$0xff] }
  0x16   : > { %305 = vperm.xlu1 %544, %v282_v3   ;;  %295 = vperm.xlu0 %543, %v280_v4   ;;  %v265_v28 = vld [vmem:[%s622_s27 + $0x10] sm:$0xff]  ;;  %v266_v29 = vld [vmem:[%s622_s27 + $0x18] sm:$0xff]  ;;  %v271_v42 = vld [vmem:[%s622_s27 + $0x40] sm:$0xff] }
  0x17   : > { %v273_v40 = vld [vmem:[%s622_s27 + $0x50] sm:$0xff]  ;;  %v274_v41 = vld [vmem:[%s622_s27 + $0x58] sm:$0xff]  ;;  %v272_v43 = vld [vmem:[%s622_s27 + $0x48] sm:$0xff] }
  0x18   : > { %v277_v54 = vld [vmem:[%s622_s27 + $0x70] sm:$0xff]  ;;  %v278_v55 = vld [vmem:[%s622_s27 + $0x78] sm:$0xff]  ;;  %v275_v56 = vld [vmem:[%s622_s27 + $0x60] sm:$0xff] }
  0x19   : > { %v276_v57 = vld [vmem:[%s622_s27 + $0x68] sm:$0xff] }
  0x1a   : > { %315 = vperm.xlu1 %544, %v284_v5   ;;  %310 = vperm.xlu0 %543, %v283_v6  }
  0x1e   : > { %325 = vperm.xlu1 %544, %v286_v7   ;;  %320 = vperm.xlu0 %543, %v285_v8  }
  0x91   : > { %v301_v20 = vpop.permute.xlu1 %300  ;;  %v291_v21 = vpop.permute.xlu0 %290 }
  0x92   : > { %v332_v22 = vmul.f32 %v301_v20, %v267_v14  ;;  %v333_v23 = vmul.f32 %v301_v20, %v268_v15  ;;  %v328_v24 = vmul.f32 %v291_v21, %v263_v16  ;;  %v329_v25 = vmul.f32 %v291_v21, %v264_v17 }
  0x94   : > { %v359_v30 = vmul.f32 %v628_v18, %v332_v22  ;;  %v360_v31 = vmul.f32 %v630_v19, %v333_v23  ;;  %v355_v32 = vmul.f32 %v628_v18, %v328_v24  ;;  %v356_v33 = vmul.f32 %v630_v19, %v329_v25 }
  0x95   : > { %v306_v34 = vpop.permute.xlu1 %305  ;;  %v296_v35 = vpop.permute.xlu0 %295 }
  0x96   : > { %375 = vst [vmem:[%s636_s30 + $0x20] sm:$0xff] %v359_v30  ;;  %376 = vst [vmem:[%s636_s30 + $0x28] sm:$0xff] %v360_v31  ;;  %v334_v36 = vmul.f32 %v306_v34, %v269_v26  ;;  %v335_v37 = vmul.f32 %v306_v34, %v270_v27  ;;  %v330_v38 = vmul.f32 %v296_v35, %v265_v28 }
  0x97   : > { %371 = vst [vmem:[%s636_s30] sm:$0xff] %v355_v32  ;;  %372 = vst [vmem:[%s636_s30 + $0x8] sm:$0xff] %v356_v33  ;;  %v331_v39 = vmul.f32 %v296_v35, %v266_v29 }
  0x98   : > { %v361_v44 = vmul.f32 %v628_v18, %v334_v36  ;;  %v362_v45 = vmul.f32 %v630_v19, %v335_v37  ;;  %v357_v46 = vmul.f32 %v628_v18, %v330_v38 }
  0x99   : > { %v358_v47 = vmul.f32 %v630_v19, %v331_v39  ;;  %v316_v48 = vpop.permute.xlu1 %315  ;;  %v311_v49 = vpop.permute.xlu0 %310 }
  0x9a   : > { %377 = vst [vmem:[%s636_s30 + $0x30] sm:$0xff] %v361_v44  ;;  %378 = vst [vmem:[%s636_s30 + $0x38] sm:$0xff] %v362_v45  ;;  %v338_v50 = vmul.f32 %v316_v48, %v273_v40  ;;  %v339_v51 = vmul.f32 %v316_v48, %v274_v41  ;;  %v336_v52 = vmul.f32 %v311_v49, %v271_v42 }
  0x9b   : > { %373 = vst [vmem:[%s636_s30 + $0x10] sm:$0xff] %v357_v46  ;;  %374 = vst [vmem:[%s636_s30 + $0x18] sm:$0xff] %v358_v47  ;;  %v337_v53 = vmul.f32 %v311_v49, %v272_v43 }
  0x9c   : > { %v365_v58 = vmul.f32 %v628_v18, %v338_v50  ;;  %v366_v59 = vmul.f32 %v630_v19, %v339_v51  ;;  %v363_v60 = vmul.f32 %v628_v18, %v336_v52 }
  0x9d   : > { %v364_v61 = vmul.f32 %v630_v19, %v337_v53  ;;  %v326_v62 = vpop.permute.xlu1 %325  ;;  %v321_v63 = vpop.permute.xlu0 %320 }
  0x9e   : > { %381 = vst [vmem:[%s636_s30 + $0x50] sm:$0xff] %v365_v58  ;;  %382 = vst [vmem:[%s636_s30 + $0x58] sm:$0xff] %v366_v59  ;;  %v342_v0 = vmul.f32 %v326_v62, %v277_v54  ;;  %v343_v1 = vmul.f32 %v326_v62, %v278_v55  ;;  %v340_v2 = vmul.f32 %v321_v63, %v275_v56 }
  0x9f   : > { %379 = vst [vmem:[%s636_s30 + $0x40] sm:$0xff] %v363_v60  ;;  %380 = vst [vmem:[%s636_s30 + $0x48] sm:$0xff] %v364_v61  ;;  %v341_v3 = vmul.f32 %v321_v63, %v276_v57 }
  0xa0   : > { %v369_v4 = vmul.f32 %v628_v18, %v342_v0  ;;  %v370_v5 = vmul.f32 %v630_v19, %v343_v1  ;;  %v367_v6 = vmul.f32 %v628_v18, %v340_v2 }
  0xa1   : > { %v368_v7 = vmul.f32 %v630_v19, %v341_v3 }
  0xa2   : > { %385 = vst [vmem:[%s636_s30 + $0x70] sm:$0xff] %v369_v4  ;;  %386 = vst [vmem:[%s636_s30 + $0x78] sm:$0xff] %v370_v5 }
  0xa3   : > { %383 = vst [vmem:[%s636_s30 + $0x60] sm:$0xff] %v367_v6  ;;  %384 = vst [vmem:[%s636_s30 + $0x68] sm:$0xff] %v368_v7 }
  0xa4 PF: > { %s13_s14 = sadd.s32 1, %s567_s14   ;;  %s694_s12 = smov %s563_s13 }
  0xa5   : > { %p10_p5 = scmp.ge.s32.totalorder %s13_s14, 4   ;;  %s695_s13 = smov %s697_s15 }
  0xa7   :  { %12 = sbr.rel (!%p10_p5) target bundleno = 2 (0x2), region = 68 }

// kernel: cbam_forward.3
= control target key start
LH: loop header
LB: loop body
LE: loop exit
PB: predicated region body
PF: predicated region fallthrough
CT: control target
= control target key end

     0   :  { %s1002_s21 = smov 0   ;;  %s1161_s0 = inlined_call_operand.vmem [shape: f32[2,64,256], index: 0, kind: input, shape index: {}]   ;;  %s1162_s1 = inlined_call_operand.vmem [shape: f32[4,64], index: 1, kind: input, shape index: {}]   ;;  %s1163_s2 = inlined_call_operand.vmem [shape: f32[4,1], index: 2, kind: input, shape index: {}]   ;;  %s1164_s3 = inlined_call_operand.vmem [shape: f32[64,4], index: 3, kind: input, shape index: {}]   ;;  %s1165_s4 = inlined_call_operand.vmem [shape: f32[64,1], index: 4, kind: input, shape index: {}]   ;;  %s1166_s5 = inlined_call_operand.vmem [shape: f32[2,64,1], index: 5, kind: output, shape index: {0}]   ;;  %s1167_s6 = inlined_call_operand.vmem [shape: f32[2,2,256], index: 6, kind: output, shape index: {1}]  }
   0x1 LB: > { %s811_s22 = sadd.s32 4294967295, %s961_s21   ;;  %p815_p0 = scmp.ge.s32.totalorder %s961_s21, 1  ;;  %s961_s21 = sphi %s1002_s21, %s17_s21  }
   0x2   : > { %p215_p1 = scmp.lt.s32.totalorder %s961_s21, 3 }
   0x4   : > { %p216_p2 = pnand %p815_p0, %p215_p1 }
   0x5   : > { %p250_p3 = scmp.lt.s32.totalorder (!%p216_p2), %s811_s22, 1  ;;  %v963_v24 = vmov (!%p216_p2), 0.0|0.0   ;;  %vm964_vm0 = vmmov (!%p216_p2), 0   ;;  %v965_v25 = vmov (!%p216_p2), 0.0   ;;  %v313_v46 = vld [vmem:[%s1162_s1] sm:$0xf] (!%p216_p2) }
   0x6   : > { %219 = sbr.rel (%p216_p2) target bundleno = 817 (0x331), region = 40  ;;  %897 = vmatprep.subr.bf16.mxu0 (!%p216_p2), %v963_v24  ;;  %880 = vmatprep.mubr.msk.f32.mxu0 (!%p216_p2), %vm964_vm0, %v965_v25  ;;  %vm315_vm1 = vcmask (!%p216_p2), 523264   ;;  %v390_v47 = vld [vmem:[%s1164_s3] sm:$0xff] (!%p216_p2)  ;;  %vm406_vm2 = vcmask (!%p216_p2), 31744   ;;  %vm431_vm3 = vcmask (!%p216_p2), 1043456   ;;  %v391_v53 = vld [vmem:[%s1164_s3 + $0x8] sm:$0xff] (!%p216_p2) }
   0x7   : > { %885 = vmatprep.mubr.msk.f32.mxu1 (!%p216_p2), %vm406_vm2, %v390_v47  ;;  %v314_v48 = vld [vmem:[%s1163_s2] sm:$0xf] (!%p216_p2)  ;;  %v392_v54 = vld [vmem:[%s1164_s3 + $0x10] sm:$0xff] (!%p216_p2)  ;;  %v393_v55 = vld [vmem:[%s1164_s3 + $0x18] sm:$0xff] (!%p216_p2)  ;;  %v966_v60 = vmov (!%p216_p2), 0   ;;  %vm588_vm4 = vcmask (!%p216_p2), 7168  }
   0x8   : > { %v394_v56 = vld [vmem:[%s1164_s3 + $0x20] sm:$0xff] (!%p216_p2)  ;;  %v395_v57 = vld [vmem:[%s1164_s3 + $0x28] sm:$0xff] (!%p216_p2)  ;;  %v396_v58 = vld [vmem:[%s1164_s3 + $0x30] sm:$0xff] (!%p216_p2)  ;;  %922 = vset.pattern.permute.xlu1 (!%p216_p2), %v966_v60  ;;  %921 = vset.pattern.permute.xlu0 (!%p216_p2), %v966_v60  ;;  %vm708_vm5 = vcmask (!%p216_p2), 1040384  }
   0x9   : > { %v397_v59 = vld [vmem:[%s1164_s3 + $0x38] sm:$0xff] (!%p216_p2)  ;;  %v399_v61 = vld [vmem:[%s1165_s4 + $0x8] sm:$0xff] (!%p216_p2)  ;;  %v398_v62 = vld [vmem:[%s1165_s4] sm:$0xff] (!%p216_p2) }
   0xd   : > { %s1169_s22 = smov (!%p250_p3, %s811_s22), 1 }
   0xe   : > { %s843_s23 = sshll.u32 %s1169_s22, 7  ;;  %s844_s17 = sshll.u32 %s1169_s22, 6 }
   0xf   : > { %s254_s26 = scalar_lea.vmem %s1161_s0, %s843_s23  ;;  %s259_s20 = scalar_lea.vmem %s1166_s5, %s844_s17 }
  0x10   : > { %v1016_v0 = vld [vmem:[%s254_s26 + $0x20] sm:$0xff]  ;;  %v1018_v1 = vld [vmem:[%s254_s26 + $0x28] sm:$0xff]  ;;  %v1026_v5 = vld [vmem:[%s254_s26 + $0x30] sm:$0xff]  ;;  %s845_s23 = sshll.u32 %s1169_s22, 2 }
  0x11   : > { %v1020_v2 = vld [vmem:[%s254_s26] sm:$0xff]  ;;  %v287_v3 = vadd.f32 %v1018_v1, %v1016_v0  ;;  %v1024_v4 = vld [vmem:[%s254_s26 + $0x8] sm:$0xff]  ;;  %v1028_v6 = vld [vmem:[%s254_s26 + $0x38] sm:$0xff] }
  0x12   : > { %v281_v7 = vadd.f32 %v1024_v4, %v1020_v2  ;;  %v1032_v8 = vld [vmem:[%s254_s26 + $0x10] sm:$0xff]  ;;  %v1034_v9 = vld [vmem:[%s254_s26 + $0x18] sm:$0xff]  ;;  %v290_v10 = vadd.f32 %v1028_v6, %v1026_v5  ;;  %v1044_v14 = vld [vmem:[%s254_s26 + $0x40] sm:$0xff] }
  0x13   : > { %288 = vadd.xlane.f32.xlu1 %v287_v3  ;;  %v284_v11 = vadd.f32 %v1034_v9, %v1032_v8  ;;  %v1040_v12 = vld [vmem:[%s254_s26 + $0x50] sm:$0xff]  ;;  %v1042_v13 = vld [vmem:[%s254_s26 + $0x58] sm:$0xff]  ;;  %v1046_v15 = vld [vmem:[%s254_s26 + $0x48] sm:$0xff] }
  0x14   : > { %282 = vadd.xlane.f32.xlu0 %v281_v7  ;;  %v296_v16 = vadd.f32 %v1042_v13, %v1040_v12  ;;  %v293_v17 = vadd.f32 %v1046_v15, %v1044_v14  ;;  %v1052_v18 = vld [vmem:[%s254_s26 + $0x70] sm:$0xff]  ;;  %v1054_v19 = vld [vmem:[%s254_s26 + $0x78] sm:$0xff]  ;;  %v1056_v20 = vld [vmem:[%s254_s26 + $0x60] sm:$0xff] }
  0x15   : > { %v1058_v21 = vld [vmem:[%s254_s26 + $0x68] sm:$0xff]  ;;  %v302_v22 = vadd.f32 %v1054_v19, %v1052_v18  ;;  %s264_s26 = scalar_lea.vmem %s1167_s6, %s845_s23 }
  0x16   : > { %v299_v23 = vadd.f32 %v1058_v21, %v1056_v20 }
  0x17   : > { %291 = vadd.xlane.f32.xlu1 %v290_v10 }
  0x18   : > { %285 = vadd.xlane.f32.xlu0 %v284_v11  ;;  %v401_v11 = vld [vmem:[%s1165_s4 + $0x18] sm:$0xff] }
  0x1b   : > { %297 = vadd.xlane.f32.xlu1 %v296_v16 }
  0x1c   : > { %294 = vadd.xlane.f32.xlu0 %v293_v17  ;;  %v400_v17 = vld [vmem:[%s1165_s4 + $0x10] sm:$0xff] }
  0x1f   : > { %303 = vadd.xlane.f32.xlu1 %v302_v22 }
  0x20   : > { %300 = vadd.xlane.f32.xlu0 %v299_v23 }
  0xa0   : > { %v289_v26 = vpop.xlane.xlu1 %288 }
  0xa1   : > { %v283_v27 = vpop.xlane.xlu0 %282  ;;  %v307_v32 = vmul.f32 0.00390625, %v289_v26 }
  0xa2   : > { %v305_v30 = vmul.f32 0.00390625, %v283_v27  ;;  %v403_v27 = vld [vmem:[%s1165_s4 + $0x28] sm:$0xff] }
  0xa4   : > { %v292_v28 = vpop.xlane.xlu1 %291 }
  0xa5   : > { %v286_v29 = vpop.xlane.xlu0 %285  ;;  %v308_v33 = vmul.f32 0.00390625, %v292_v28 }
  0xa6   : > { %v306_v31 = vmul.f32 0.00390625, %v286_v29  ;;  %v402_v29 = vld [vmem:[%s1165_s4 + $0x20] sm:$0xff] }
  0xa7   : > { %v901_v39 = vpack.c.bf16 %v308_v33, %v307_v32 }
  0xa8   : > { %v898_v34 = vpack.c.bf16 %v306_v31, %v305_v30  ;;  %v298_v35 = vpop.xlane.xlu1 %297 }
  0xa9   : > { %v295_v36 = vpop.xlane.xlu0 %294  ;;  %v310_v37 = vmul.f32 0.00390625, %v298_v35  ;;  %v405_v35 = vld [vmem:[%s1165_s4 + $0x38] sm:$0xff] }
  0xaa   : > { %899 = vmatpush3.bf16.msra.mxu0 %v898_v34  ;;  %v309_v38 = vmul.f32 0.00390625, %v295_v36 }
  0xab   : > { %900 = vmatprep.subr.bf16.mxu0 %v963_v24 }
  0xac   : > { %v304_v40 = vpop.xlane.xlu1 %303  ;;  %v904_v42 = vpack.c.bf16 %v310_v37, %v309_v38  ;;  %v404_v37 = vld [vmem:[%s1165_s4 + $0x30] sm:$0xff] }
  0xad   : > { %v301_v41 = vpop.xlane.xlu0 %300  ;;  %v312_v43 = vmul.f32 0.00390625, %v304_v40 }
  0xae   : > { %902 = vmatpush3.bf16.msra.mxu0 %v901_v39  ;;  %v311_v44 = vmul.f32 0.00390625, %v301_v41 }
  0xaf   : > { %903 = vmatprep.subr.bf16.mxu0 %v963_v24 }
  0xb0   : > { %v907_v45 = vpack.c.bf16 %v312_v43, %v311_v44 }
  0xb2   : > { %905 = vmatpush3.bf16.msra.mxu0 %v904_v42 }
  0xb3   : > { %906 = vmatprep.subr.bf16.mxu0 %v963_v24 }
  0xb6   : > { %908 = vmatpush3.bf16.msra.mxu0 %v907_v45 }
  0xb9   : > { %881 = vmatmul.mubr.msk.f32.vlgmr.msra.gmra.mrb[0].mxu0 %vm315_vm1, %v313_v46 }
 0x18c   : > { %v385_v49 = vpop.f32.mrb[0].mxu0 }
 0x18d   : > { %v386_v50 = vadd.f32 %v385_v49, %v314_v48  ;;  %v882_v51 = vpop.f32.mrb[1].mxu0 }
 0x18f   : > { %v389_v52 = vmax.f32 %v386_v50, 0.0 }
 0x191   : > { %883 = vmatprep.subr.msk.mxu1 %vm431_vm3, %v389_v52 }
 0x192   : > { %884 = vmatpush3.msk.msra.mxu1 %vm431_vm3, %v389_v52 }
 0x193   : > { %886 = vmatmul.mubr.msk.f32.vlgmr.msra.gmra.mrb[0].mxu1 %vm406_vm2, %v391_v53 }
 0x194   : > { %888 = vmatprep.mubr.msk.f32.mxu1 %vm406_vm2, %v392_v54 }
 0x197   : > { %889 = vmatmul.mubr.msk.f32.gmra.mrb[2].mxu1 %vm406_vm2, %v393_v55 }
 0x198   : > { %891 = vmatprep.mubr.msk.f32.mxu1 %vm406_vm2, %v394_v56 }
 0x19b   : > { %892 = vmatmul.mubr.msk.f32.gmra.mrb[4].mxu1 %vm406_vm2, %v395_v57 }
 0x19c   : > { %894 = vmatprep.mubr.msk.f32.mxu1 %vm406_vm2, %v396_v58 }
 0x19f   : > { %895 = vmatmul.mubr.msk.f32.gmra.mrb[6].mxu1 %vm406_vm2, %v397_v59 }
 0x266   : > { %v887_v63 = vpop.f32.mrb[0].mxu1 }
 0x267   : > { %v507_v3 = vadd.f32 %v887_v63, %v399_v61  ;;  %v501_v7 = vpop.f32.mrb[1].mxu1 }
 0x268   : > { %v502_v10 = vadd.f32 %v501_v7, %v398_v62 }
 0x269   : > { %v833_v16 = vmul.f32 -1.442695, %v507_v3 }
 0x26a   : > { %v832_v22 = vmul.f32 -1.442695, %v502_v10  ;;  %v890_v23 = vpop.f32.mrb[2].mxu1 }
 0x26b   : > { %923 = vpow2.f32 %v833_v16  ;;  %v517_v24 = vadd.f32 %v890_v23, %v401_v11  ;;  %v511_v25 = vpop.f32.mrb[3].mxu1 }
 0x26c   : > { %925 = vpow2.f32 %v832_v22  ;;  %v512_v26 = vadd.f32 %v511_v25, %v400_v17 }
 0x26d   : > { %v835_v28 = vmul.f32 -1.442695, %v517_v24 }
 0x26e   : > { %v834_v30 = vmul.f32 -1.442695, %v512_v26  ;;  %v893_v31 = vpop.f32.mrb[4].mxu1 }
 0x26f   : > { %927 = vpow2.f32 %v835_v28  ;;  %v527_v32 = vadd.f32 %v893_v31, %v403_v27  ;;  %v521_v33 = vpop.f32.mrb[5].mxu1 }
 0x270   : > { %929 = vpow2.f32 %v834_v30  ;;  %v522_v34 = vadd.f32 %v521_v33, %v402_v29 }
 0x271   : > { %v837_v36 = vmul.f32 -1.442695, %v527_v32 }
 0x272   : > { %v836_v38 = vmul.f32 -1.442695, %v522_v34  ;;  %v896_v39 = vpop.f32.mrb[6].mxu1 }
 0x273   : > { %931 = vpow2.f32 %v837_v36  ;;  %v537_v40 = vadd.f32 %v896_v39, %v405_v35  ;;  %v531_v41 = vpop.f32.mrb[7].mxu1 }
 0x274   : > { %933 = vpow2.f32 %v836_v38  ;;  %v532_v42 = vadd.f32 %v531_v41, %v404_v37 }
 0x275   : > { %v924_v43 = vpop.eup %923  ;;  %v839_v44 = vmul.f32 -1.442695, %v537_v40 }
 0x276   : > { %v926_v45 = vpop.eup %925  ;;  %v565_v46 = vadd.f32 1.0, %v924_v43  ;;  %v838_v47 = vmul.f32 -1.442695, %v532_v42 }
 0x277   : > { %v564_v48 = vadd.f32 1.0, %v926_v45  ;;  %935 = vpow2.f32 %v839_v44 }
 0x278   : > { %937 = vrcp.f32 %v565_v46 }
 0x279   : > { %v928_v49 = vpop.eup %927  ;;  %939 = vrcp.f32 %v564_v48 }
 0x27a   : > { %v930_v50 = vpop.eup %929  ;;  %v567_v51 = vadd.f32 1.0, %v928_v49  ;;  %941 = vpow2.f32 %v838_v47 }
 0x27b   : > { %v566_v52 = vadd.f32 1.0, %v930_v50 }
 0x27c   : > { %943 = vrcp.f32 %v567_v51 }
 0x27d   : > { %v932_v53 = vpop.eup %931  ;;  %945 = vrcp.f32 %v566_v52 }
 0x27e   : > { %v934_v54 = vpop.eup %933  ;;  %v569_v55 = vadd.f32 1.0, %v932_v53 }
 0x27f   : > { %v568_v56 = vadd.f32 1.0, %v934_v54 }
 0x280   : > { %947 = vrcp.f32 %v569_v55 }
 0x281   : > { %v936_v57 = vpop.eup %935  ;;  %949 = vrcp.f32 %v568_v56 }
 0x282   : > { %v938_v58 = vpop.eup %937  ;;  %v571_v59 = vadd.f32 1.0, %v936_v57 }
 0x283   : > { %v940_v60 = vpop.eup %939  ;;  %590 = vst.msk [vmem:[%s259_s20 + $0x8] sm:$0xff] %vm588_vm4, %v938_v58  ;;  %604 = vperm.xlu1 %922, %v938_v58  }
 0x284   : > { %v942_v61 = vpop.eup %941  ;;  %589 = vst.msk [vmem:[%s259_s20] sm:$0xff] %vm588_vm4, %v940_v60  ;;  %951 = vrcp.f32 %v571_v59  ;;  %599 = vperm.xlu0 %921, %v940_v60  }
 0x285   : > { %v570_v62 = vadd.f32 1.0, %v942_v61 }
 0x286   : > { %v944_v63 = vpop.eup %943 }
 0x287   : > { %v946_v3 = vpop.eup %945  ;;  %592 = vst.msk [vmem:[%s259_s20 + $0x18] sm:$0xff] %vm588_vm4, %v944_v63  ;;  %953 = vrcp.f32 %v570_v62  ;;  %614 = vperm.xlu1 %922, %v944_v63  }
 0x288   : > { %591 = vst.msk [vmem:[%s259_s20 + $0x10] sm:$0xff] %vm588_vm4, %v946_v3 }
 0x28a   : > { %v948_v7 = vpop.eup %947 }
 0x28b   : > { %v950_v10 = vpop.eup %949  ;;  %594 = vst.msk [vmem:[%s259_s20 + $0x28] sm:$0xff] %vm588_vm4, %v948_v7  ;;  %609 = vperm.xlu1 %922, %v946_v3  }
 0x28c   : > { %593 = vst.msk [vmem:[%s259_s20 + $0x20] sm:$0xff] %vm588_vm4, %v950_v10 }
 0x28e   : > { %v952_v11 = vpop.eup %951 }
 0x28f   : > { %596 = vst.msk [vmem:[%s259_s20 + $0x38] sm:$0xff] %vm588_vm4, %v952_v11  ;;  %624 = vperm.xlu1 %922, %v948_v7  }
 0x291   : > { %v954_v16 = vpop.eup %953 }
 0x292   : > { %595 = vst.msk [vmem:[%s259_s20 + $0x30] sm:$0xff] %vm588_vm4, %v954_v16 }
 0x293   : > { %619 = vperm.xlu1 %922, %v950_v10  }
 0x297   : > { %629 = vperm.xlu1 %922, %v954_v16  }
 0x29b   : > { %634 = vperm.xlu1 %922, %v952_v11  }
 0x302   : > { %v605_v17 = vpop.permute.xlu1 %604 }
 0x303   : > { %v600_v22 = vpop.permute.xlu0 %599  ;;  %v639_v24 = vmul.f32 %v605_v17, %v1032_v8  ;;  %v640_v25 = vmul.f32 %v605_v17, %v1034_v9 }
 0x304   : > { %v637_v26 = vmul.f32 %v600_v22, %v1020_v2  ;;  %v638_v27 = vmul.f32 %v600_v22, %v1024_v4 }
 0x306   : > { %v615_v23 = vpop.permute.xlu1 %614  ;;  %v653_v31 = vadd.f32 %v639_v24, %v637_v26  ;;  %v666_v32 = vadd.f32 %v640_v25, %v638_v27 }
 0x307   : > { %v643_v36 = vmul.f32 %v615_v23, %v1026_v5  ;;  %v644_v8 = vmul.f32 %v615_v23, %v1028_v6 }
 0x309   : > { %v683_v44 = vmax.f32 %v639_v24, %v643_v36  ;;  %v696_v45 = vmax.f32 %v640_v25, %v644_v8 }
 0x30a   : > { %v610_v28 = vpop.permute.xlu1 %609 }
 0x30b   : > { %v641_v29 = vmul.f32 %v610_v28, %v1016_v0  ;;  %v642_v30 = vmul.f32 %v610_v28, %v1018_v1 }
 0x30d   : > { %v654_v34 = vadd.f32 %v653_v31, %v641_v29  ;;  %v667_v35 = vadd.f32 %v666_v32, %v642_v30  ;;  %v695_v46 = vmax.f32 %v638_v27, %v642_v30 }
 0x30e   : > { %v625_v33 = vpop.permute.xlu1 %624 }
 0x30f   : > { %v655_v4 = vadd.f32 %v654_v34, %v643_v36  ;;  %v668_v38 = vadd.f32 %v667_v35, %v644_v8  ;;  %v647_v0 = vmul.f32 %v625_v33, %v1040_v12  ;;  %v648_v1 = vmul.f32 %v625_v33, %v1042_v13 }
 0x311   : > { %v698_v47 = vmax.f32 %v696_v45, %v648_v1 }
 0x312   : > { %v620_v37 = vpop.permute.xlu1 %619 }
 0x313   : > { %v645_v9 = vmul.f32 %v620_v37, %v1044_v14  ;;  %v646_v2 = vmul.f32 %v620_v37, %v1046_v15  ;;  %v682_v14 = vmax.f32 %v637_v26, %v641_v29  ;;  %v685_v15 = vmax.f32 %v683_v44, %v647_v0 }
 0x315   : > { %v656_v39 = vadd.f32 %v655_v4, %v645_v9  ;;  %v669_v40 = vadd.f32 %v668_v38, %v646_v2  ;;  %v684_v48 = vmax.f32 %v682_v14, %v645_v9  ;;  %v697_v49 = vmax.f32 %v695_v46, %v646_v2 }
 0x316   : > { %v630_v41 = vpop.permute.xlu1 %629 }
 0x317   : > { %v649_v42 = vmul.f32 %v630_v41, %v1056_v20  ;;  %v650_v5 = vmul.f32 %v630_v41, %v1058_v21  ;;  %v657_v43 = vadd.f32 %v656_v39, %v647_v0  ;;  %v670_v6 = vadd.f32 %v669_v40, %v648_v1 }
 0x319   : > { %v658_v50 = vadd.f32 %v657_v43, %v649_v42  ;;  %v671_v13 = vadd.f32 %v670_v6, %v650_v5  ;;  %v686_v20 = vmax.f32 %v684_v48, %v649_v42  ;;  %v699_v53 = vmax.f32 %v697_v49, %v650_v5 }
 0x31a   : > { %v635_v12 = vpop.permute.xlu1 %634 }
 0x31b   : > { %v651_v51 = vmul.f32 %v635_v12, %v1052_v18  ;;  %v652_v52 = vmul.f32 %v635_v12, %v1054_v19 }
 0x31d   : > { %v659_v21 = vadd.f32 %v658_v50, %v651_v51  ;;  %v672_v54 = vadd.f32 %v671_v13, %v652_v52  ;;  %v687_v55 = vmax.f32 %v685_v15, %v651_v51  ;;  %v700_v56 = vmax.f32 %v698_v47, %v652_v52 }
 0x31f   : > { %v660_v57 = vrot.slane %v659_v21, 4  ;;  %v673_v58 = vrot.slane %v672_v54, 4  ;;  %v688_v59 = vmax.f32 %v686_v20, %v687_v55  ;;  %v701_v60 = vmax.f32 %v699_v53, %v700_v56 }
 0x321   : > { %v661_v61 = vadd.f32 %v660_v57, %v659_v21  ;;  %v674_v62 = vadd.f32 %v673_v58, %v672_v54  ;;  %v689_v63 = vrot.slane %v688_v59, 4  ;;  %v702_v3 = vrot.slane %v701_v60, 4 }
 0x323   : > { %v662_v7 = vrot.slane %v661_v61, 2  ;;  %v675_v10 = vrot.slane %v674_v62, 2  ;;  %v690_v18 = vmax.f32 %v688_v59, %v689_v63  ;;  %v703_v11 = vmax.f32 %v701_v60, %v702_v3 }
 0x325   : > { %v663_v19 = vadd.f32 %v662_v7, %v661_v61  ;;  %v676_v16 = vadd.f32 %v675_v10, %v674_v62  ;;  %v691_v17 = vrot.slane %v690_v18, 2  ;;  %v704_v22 = vrot.slane %v703_v11, 2 }
 0x327   : > { %v664_v23 = vrot.slane %v663_v19, 1  ;;  %v677_v24 = vrot.slane %v676_v16, 1  ;;  %v692_v25 = vmax.f32 %v690_v18, %v691_v17  ;;  %v705_v26 = vmax.f32 %v703_v11, %v704_v22 }
 0x329   : > { %v665_v27 = vadd.f32 %v664_v23, %v663_v19  ;;  %v678_v28 = vadd.f32 %v677_v24, %v676_v16  ;;  %v693_v29 = vrot.slane %v692_v25, 1  ;;  %v706_v30 = vrot.slane %v705_v26, 1 }
 0x32b   : > { %v680_v31 = vmul.f32 0.015625, %v665_v27  ;;  %v681_v32 = vmul.f32 0.015625, %v678_v28  ;;  %v694_v33 = vmax.f32 %v692_v25, %v693_v29  ;;  %v707_v34 = vmax.f32 %v705_v26, %v706_v30 }
 0x32d   : > { %v709_v35 = vsel %vm708_vm5, %v680_v31, %v694_v33  ;;  %v710_v36 = vsel %vm708_vm5, %v681_v32, %v707_v34 }
 0x32e   : > { %v713_v8 = vcombine.low %v709_v35, %v710_v36 }
 0x330   : > { %840 = vst.sshfl [vmem:[%s264_s26] sm:$0x33 pattern:$0x76325410] %v713_v8 }
 0x331 PF: > { %s17_s21 = sadd.s32 1, %s961_s21  }
 0x332   : > { %p14_p4 = scmp.ge.s32.totalorder %s17_s21, 4  }
 0x334   :  { %16 = sbr.rel (!%p14_p4) target bundleno = 1 (0x1), region = 82 }

// kernel: cbam_forward.4
= control target key start
LH: loop header
LB: loop body
LE: loop exit
PB: predicated region body
PF: predicated region fallthrough
CT: control target
= control target key end

     0   :  { %s2604_s0 = inlined_call_operand.vmem [shape: f32[98], index: 0, kind: input, shape index: {}]   ;;  %s2605_s1 = inlined_call_operand.<no memory space> [shape: f32[1], index: 1, kind: input, shape index: {}]   ;;  %s2606_s2 = inlined_call_operand.vmem [shape: f32[2,2,22,22], index: 2, kind: input, shape index: {}]   ;;  %s2607_s3 = inlined_call_operand.vmem [shape: f32[2,1,256], index: 3, kind: output, shape index: {}]  }
   0x1   :  { %8 = sst [smem:[#allocation2]] %s2605_s1 }
   0x2   :  { %9 = vsyncpa [#allocation4], 0  ;;  %s1968_s14 = smov 0  }
   0x3 LB: > { %s1737_s15 = sadd.s32 4294967295, %s1928_s14   ;;  %p1739_p0 = scmp.ge.s32.totalorder %s1928_s14, 1  ;;  %s1928_s14 = sphi %s1968_s14, %s15_s14  }
   0x4   : > { %p114_p1 = scmp.lt.s32.totalorder %s1928_s14, 3  ;;  %s127_s18 = sshll.u32 %s2604_s0, 4  ;;  %s128_s18 = int_to_ptr.vmem [resolvable:$true] %s127_s18 }
   0x5   : > { %p1870_p3 = scmp.eq.s32.totalorder %s1737_s15, 0  ;;  %s1903_s19 = scalar_lea.vmem %s128_s18, 16 }
   0x6   : > { %p1979_p2 = pnand %p1739_p0, %p114_p1  ;;  %p1904_p6 = scmp.ne.s32.totalorder %s128_s18, %s1903_s19 }
   0x7   : > { %p1911_p10 = scmp.lt.s32.totalorder %s128_s18, %s128_s18  ;;  %p1912_p11 = scmp.lt.s32.totalorder %s1903_s19, %s1903_s19 }
   0x8   : > { %p1866_p4 = pneg %p1979_p2 }
   0x9   : > { %p1913_p12 = por %p1912_p11, %p1911_p10 }
   0xa   : > { %p1867_p5 = pnand %p1870_p3, %p1866_p4 }
   0xc   : > { %p1905_p7 = pneg %p1867_p5 }
   0xe   : > { %p1906_p8 = pnand %p1905_p7, %p1904_p6 }
  0x10   : > { %p1907_p9 = pneg %p1906_p8 }
  0x12   : > { %p1914_p13 = pnand %p1913_p12, %p1907_p9 }
  0x14   : > { %1917 = shalt.err (!%p1914_p13)
}
  0x15   : > { %s1930_s20 = smov [#allocation3]   ;;  %151 = sbr.rel (%p1979_p2) target bundleno = 664 (0x298), region = 32 }
  0x16   : > { %1869 = dma.vmem_to_smem (!%p1867_p5), %s128_s18, 16, %s1930_s20, [#allocation4]  }
  0x1c   : > { %1923 = dma.done.wait (%p1870_p3), [#allocation4], 16  }
  0x1d   : > { %1925 = vsyncadd (%p1870_p3), [#allocation4], 4294967280 }
  0x1e   : > { %157 = sfence }
  0x1f   : > { %p175_p0 = scmp.lt.s32.totalorder %s1737_s15, 1  ;;  %s1747_s21 = sld [smem:[#allocation3 + $0x2]] }
  0x20   : > { %s1746_s22 = sld [smem:[#allocation3 + $0x1]]  ;;  %s1748_s23 = sld [smem:[#allocation3 + $0x3]] }
  0x21   : > { %s2610_s15 = smov (!%p175_p0, %s1737_s15), 1  ;;  %s1749_s28 = sld [smem:[#allocation3 + $0x4]] }
  0x22   : > { %s1861_s24 = smul.u32 48, %s2610_s15  ;;  %s1931_s29 = smov 126  }
  0x23   : > { %s1932_s30 = smov 127   ;;  %s1750_s4 = sld [smem:[#allocation3 + $0x5]] }
  0x24   : > { %s1996_s27 = scalar_lea.vmem %s2606_s2, %s1861_s24  ;;  %s1751_s5 = sld [smem:[#allocation3 + $0x6]] }
  0x25   : > { %v207_v0 = vstv %s1747_s21  ;;  %v1999_v1 = vld [vmem:[%s1996_s27] sm:$0xff]  ;;  %v2002_v2 = vld [vmem:[%s1996_s27 + $0x8] sm:$0xff]  ;;  %s1933_s6 = smov 125   ;;  %s1753_s7 = sld [smem:[#allocation3 + $0x8]] }
  0x26   : > { %v193_v3 = vstv %s1746_s22  ;;  %v208_v4 = vmul.f32 %v207_v0, %v1999_v1  ;;  %v209_v6 = vmul.f32 %v207_v0, %v2002_v2  ;;  %v221_v8 = vstv %s1748_s23  ;;  %s1934_s8 = smov 124   ;;  %s1754_s9 = sld [smem:[#allocation3 + $0x9]]  ;;  %v2027_v20 = vld [vmem:[%s1996_s27 + $0x9] sm:$0xff]  ;;  %v2030_v22 = vld [vmem:[%s1996_s27 + $0x1] sm:$0xff] }
  0x27   : > { %v194_v5 = vmul.f32 %v193_v3, %v1999_v1  ;;  %v195_v7 = vmul.f32 %v193_v3, %v2002_v2  ;;  %v223_v9 = vmul.f32 %v221_v8, %v2002_v2  ;;  %v222_v10 = vmul.f32 %v221_v8, %v1999_v1  ;;  %s1935_s10 = smov 123   ;;  %s1755_s11 = sld [smem:[#allocation3 + $0xa]]  ;;  %v2057_v40 = vld [vmem:[%s1996_s27 + $0xa] sm:$0xff]  ;;  %v2060_v42 = vld [vmem:[%s1996_s27 + $0x2] sm:$0xff] }
  0x28   : > { %212 = vrot.lane.b32.xlu1 %v208_v4, %s1931_s29  ;;  %v235_v11 = vstv %s1749_s28  ;;  %s1936_s12 = smov 122   ;;  %s1756_s13 = sld [smem:[#allocation3 + $0xb]]  ;;  %v2087_v60 = vld [vmem:[%s1996_s27 + $0xb] sm:$0xff]  ;;  %v2090_v62 = vld [vmem:[%s1996_s27 + $0x3] sm:$0xff] }
  0x29   : > { %198 = vrot.lane.b32.xlu0 %v194_v5, %s1932_s30  ;;  %v237_v12 = vmul.f32 %v235_v11, %v2002_v2  ;;  %v236_v13 = vmul.f32 %v235_v11, %v1999_v1  ;;  %v249_v14 = vstv %s1750_s4  ;;  %s1757_s16 = sld [smem:[#allocation3 + $0xc]]  ;;  %s1758_s17 = sld [smem:[#allocation3 + $0xd]] }
  0x2a   : > { %v251_v15 = vmul.f32 %v249_v14, %v2002_v2  ;;  %v250_v16 = vmul.f32 %v249_v14, %v1999_v1  ;;  %v263_v17 = vstv %s1751_s5  ;;  %s1760_s18 = sld [smem:[#allocation3 + $0xf]]  ;;  %s1761_s1 = sld [smem:[#allocation3 + $0x10]] }
  0x2b   : > { %v265_v18 = vmul.f32 %v263_v17, %v2002_v2  ;;  %v264_v19 = vmul.f32 %v263_v17, %v1999_v1  ;;  %v285_v21 = vstv %s1753_s7  ;;  %s1762_s19 = sld [smem:[#allocation3 + $0x11]]  ;;  %s1763_s20 = sld [smem:[#allocation3 + $0x12]] }
  0x2c   : > { %214 = vrot.lane.b32.xlu1 %v209_v6, %s1931_s29  ;;  %v287_v23 = vmul.f32 %v285_v21, %v2027_v20  ;;  %v286_v24 = vmul.f32 %v285_v21, %v2030_v22  ;;  %v299_v25 = vstv %s1754_s9  ;;  %s1764_s21 = sld [smem:[#allocation3 + $0x13]]  ;;  %s1765_s22 = sld [smem:[#allocation3 + $0x14]]  ;;  %v2120_v21 = vld [vmem:[%s1996_s27 + $0x4] sm:$0xff] }
  0x2d   : > { %200 = vrot.lane.b32.xlu0 %v195_v7, %s1932_s30  ;;  %v301_v26 = vmul.f32 %v299_v25, %v2027_v20  ;;  %v300_v27 = vmul.f32 %v299_v25, %v2030_v22  ;;  %v313_v28 = vstv %s1755_s11  ;;  %s1767_s23 = sld [smem:[#allocation3 + $0x16]]  ;;  %s1768_s24 = sld [smem:[#allocation3 + $0x17]] }
  0x2e   : > { %v315_v29 = vmul.f32 %v313_v28, %v2027_v20  ;;  %v314_v30 = vmul.f32 %v313_v28, %v2030_v22  ;;  %v327_v31 = vstv %s1756_s13  ;;  %s1769_s25 = sld [smem:[#allocation3 + $0x18]]  ;;  %s1770_s26 = sld [smem:[#allocation3 + $0x19]] }
  0x2f   : > { %v329_v32 = vmul.f32 %v327_v31, %v2027_v20  ;;  %v328_v33 = vmul.f32 %v327_v31, %v2030_v22  ;;  %v341_v34 = vstv %s1757_s16  ;;  %v355_v37 = vstv %s1758_s17  ;;  %s1771_s28 = sld [smem:[#allocation3 + $0x1a]]  ;;  %s1772_s4 = sld [smem:[#allocation3 + $0x1b]] }
  0x30   : > { %228 = vrot.lane.b32.xlu1 %v223_v9, %s1933_s6  ;;  %v343_v35 = vmul.f32 %v341_v34, %v2027_v20  ;;  %v342_v36 = vmul.f32 %v341_v34, %v2030_v22  ;;  %v357_v38 = vmul.f32 %v355_v37, %v2027_v20  ;;  %v356_v39 = vmul.f32 %v355_v37, %v2030_v22  ;;  %s1774_s5 = sld [smem:[#allocation3 + $0x1d]]  ;;  %s1775_s7 = sld [smem:[#allocation3 + $0x1e]] }
  0x31   : > { %226 = vrot.lane.b32.xlu0 %v222_v10, %s1933_s6  ;;  %v377_v41 = vstv %s1760_s18  ;;  %v391_v45 = vstv %s1761_s1  ;;  %v405_v48 = vstv %s1762_s19  ;;  %s1776_s9 = sld [smem:[#allocation3 + $0x1f]]  ;;  %s1777_s11 = sld [smem:[#allocation3 + $0x20]] }
  0x32   : > { %v379_v43 = vmul.f32 %v377_v41, %v2057_v40  ;;  %v378_v44 = vmul.f32 %v377_v41, %v2060_v42  ;;  %v393_v46 = vmul.f32 %v391_v45, %v2057_v40  ;;  %v392_v47 = vmul.f32 %v391_v45, %v2060_v42  ;;  %s1778_s13 = sld [smem:[#allocation3 + $0x21]]  ;;  %s1779_s16 = sld [smem:[#allocation3 + $0x22]]  ;;  %v2147_v41 = vld [vmem:[%s1996_s27 + $0xd] sm:$0xff] }
  0x33   : > { %v407_v49 = vmul.f32 %v405_v48, %v2057_v40  ;;  %v406_v50 = vmul.f32 %v405_v48, %v2060_v42  ;;  %v419_v51 = vstv %s1763_s20  ;;  %v433_v54 = vstv %s1764_s21  ;;  %s1781_s17 = sld [smem:[#allocation3 + $0x24]]  ;;  %s184_s18 = sld [smem:[#allocation3]] }
  0x34   : > { %242 = vrot.lane.b32.xlu1 %v237_v12, %s1934_s8  ;;  %v421_v52 = vmul.f32 %v419_v51, %v2057_v40  ;;  %v420_v53 = vmul.f32 %v419_v51, %v2060_v42  ;;  %v435_v55 = vmul.f32 %v433_v54, %v2057_v40  ;;  %v434_v56 = vmul.f32 %v433_v54, %v2060_v42  ;;  %s1782_s1 = sld [smem:[#allocation3 + $0x25]]  ;;  %s1783_s19 = sld [smem:[#allocation3 + $0x26]] }
  0x35   : > { %240 = vrot.lane.b32.xlu0 %v236_v13, %s1934_s8  ;;  %v447_v57 = vstv %s1765_s22  ;;  %v469_v61 = vstv %s1767_s23  ;;  %v483_v3 = vstv %s1768_s24  ;;  %s1784_s20 = sld [smem:[#allocation3 + $0x27]]  ;;  %s2164_s22 = sld [smem:[#allocation3 + $0x28]] }
  0x36   : > { %v449_v58 = vmul.f32 %v447_v57, %v2057_v40  ;;  %v448_v59 = vmul.f32 %v447_v57, %v2060_v42  ;;  %v471_v63 = vmul.f32 %v469_v61, %v2087_v60  ;;  %v470_v0 = vmul.f32 %v469_v61, %v2090_v62  ;;  %s2162_s21 = sld [smem:[#allocation3 + $0x7]]  ;;  %s2170_s23 = sld [smem:[#allocation3 + $0x29]] }
  0x37   : > { %v485_v4 = vmul.f32 %v483_v3, %v2087_v60  ;;  %v484_v5 = vmul.f32 %v483_v3, %v2090_v62  ;;  %v497_v6 = vstv %s1769_s25  ;;  %v511_v9 = vstv %s1770_s26  ;;  %s2178_s24 = sld [smem:[#allocation3 + $0x2b]]  ;;  %s1789_s25 = sld [smem:[#allocation3 + $0x2c]] }
  0x38   : > { %256 = vrot.lane.b32.xlu1 %v251_v15, %s1935_s10  ;;  %v499_v7 = vmul.f32 %v497_v6, %v2087_v60  ;;  %v498_v8 = vmul.f32 %v497_v6, %v2090_v62  ;;  %v513_v10 = vmul.f32 %v511_v9, %v2087_v60  ;;  %v512_v11 = vmul.f32 %v511_v9, %v2090_v62  ;;  %s1790_s26 = sld [smem:[#allocation3 + $0x2d]] }
  0x39   : > { %254 = vrot.lane.b32.xlu0 %v250_v16, %s1935_s10  ;;  %v525_v12 = vstv %s1771_s28  ;;  %v539_v15 = vstv %s1772_s4  ;;  %v575_v25 = vstv %s1775_s7  ;;  %s1791_s28 = sld [smem:[#allocation3 + $0x2e]]  ;;  %s2214_s7 = sld [smem:[#allocation3 + $0x30]] }
  0x3a   : > { %v527_v13 = vmul.f32 %v525_v12, %v2087_v60  ;;  %v526_v14 = vmul.f32 %v525_v12, %v2090_v62  ;;  %v541_v16 = vmul.f32 %v539_v15, %v2087_v60  ;;  %v540_v17 = vmul.f32 %v539_v15, %v2090_v62  ;;  %s2206_s4 = sld [smem:[#allocation3 + $0xe]] }
  0x3b   : > { %v589_v28 = vstv %s1776_s9  ;;  %v603_v31 = vstv %s1777_s11  ;;  %v617_v34 = vstv %s1778_s13  ;;  %v631_v37 = vstv %s1779_s16  ;;  %s2222_s9 = sld [smem:[#allocation3 + $0x32]]  ;;  %s1798_s11 = sld [smem:[#allocation3 + $0x33]] }
  0x3c   : > { %270 = vrot.lane.b32.xlu1 %v265_v18, %s1936_s12  ;;  %v2117_v18 = vld [vmem:[%s1996_s27 + $0xc] sm:$0xff]  ;;  %v667_v51 = vstv %s1782_s1  ;;  %v695_v3 = vstv %s1784_s20  ;;  %s1799_s13 = sld [smem:[#allocation3 + $0x34]]  ;;  %s1800_s16 = sld [smem:[#allocation3 + $0x35]] }
  0x3d   : > { %268 = vrot.lane.b32.xlu0 %v264_v19, %s1936_s12  ;;  %v561_v19 = vstv %s1774_s5  ;;  %v709_v12 = vstv %s2164_s22  ;;  %s2208_s5 = sld [smem:[#allocation3 + $0x2f]]  ;;  %s1807_s20 = sld [smem:[#allocation3 + $0x3a]] }
  0x3e   : > { %s2258_s1 = sld [smem:[#allocation3 + $0x37]]  ;;  %s1809_s22 = sld [smem:[#allocation3 + $0x3c]] }
  0x40   : > { %292 = vrot.lane.b32.xlu1 %v287_v23, %s1932_s30  ;;  %v563_v23 = vmul.f32 %v561_v19, %v2117_v18 }
  0x41   : > { %290 = vrot.lane.b32.xlu0 %v286_v24, %s1932_s30  ;;  %v562_v24 = vmul.f32 %v561_v19, %v2120_v21  ;;  %v711_v19 = vmul.f32 %v709_v12, %v2147_v41 }
  0x44   : > { %306 = vrot.lane.b32.xlu1 %v301_v26, %s1931_s29  ;;  %v577_v26 = vmul.f32 %v575_v25, %v2117_v18 }
  0x45   : > { %304 = vrot.lane.b32.xlu0 %v300_v27, %s1931_s29  ;;  %v576_v27 = vmul.f32 %v575_v25, %v2120_v21 }
  0x48   : > { %320 = vrot.lane.b32.xlu1 %v315_v29, %s1933_s6  ;;  %v591_v29 = vmul.f32 %v589_v28, %v2117_v18 }
  0x49   : > { %318 = vrot.lane.b32.xlu0 %v314_v30, %s1933_s6  ;;  %v590_v30 = vmul.f32 %v589_v28, %v2120_v21 }
  0x4c   : > { %334 = vrot.lane.b32.xlu1 %v329_v32, %s1934_s8  ;;  %v605_v32 = vmul.f32 %v603_v31, %v2117_v18 }
  0x4d   : > { %332 = vrot.lane.b32.xlu0 %v328_v33, %s1934_s8  ;;  %v604_v33 = vmul.f32 %v603_v31, %v2120_v21 }
  0x50   : > { %348 = vrot.lane.b32.xlu1 %v343_v35, %s1935_s10  ;;  %v619_v35 = vmul.f32 %v617_v34, %v2117_v18 }
  0x51   : > { %346 = vrot.lane.b32.xlu0 %v342_v36, %s1935_s10  ;;  %v618_v36 = vmul.f32 %v617_v34, %v2120_v21 }
  0x54   : > { %362 = vrot.lane.b32.xlu1 %v357_v38, %s1936_s12  ;;  %v633_v38 = vmul.f32 %v631_v37, %v2117_v18 }
  0x55   : > { %360 = vrot.lane.b32.xlu0 %v356_v39, %s1936_s12  ;;  %v632_v39 = vmul.f32 %v631_v37, %v2120_v21 }
  0x58   : > { %384 = vrot.lane.b32.xlu1 %v379_v43, %s1932_s30  ;;  %v653_v43 = vstv %s1781_s17  ;;  %s2250_s17 = sld [smem:[#allocation3 + $0x15]] }
  0x59   : > { %382 = vrot.lane.b32.xlu0 %v378_v44, %s1932_s30  ;;  %v2150_v44 = vld [vmem:[%s1996_s27 + $0x5] sm:$0xff]  ;;  %v655_v48 = vmul.f32 %v653_v43, %v2147_v41 }
  0x5c   : > { %398 = vrot.lane.b32.xlu1 %v393_v46, %s1931_s29 }
  0x5d   : > { %396 = vrot.lane.b32.xlu0 %v392_v47, %s1931_s29  ;;  %v187_v47 = vstv %s184_s18  ;;  %s2252_s18 = sld [smem:[#allocation3 + $0x36]] }
  0x5e   : > { %v188_v54 = vmul.f32 %v187_v47, %v1999_v1 }
  0x60   : > { %412 = vrot.lane.b32.xlu1 %v407_v49, %s1933_s6  ;;  %v654_v49 = vmul.f32 %v653_v43, %v2150_v44 }
  0x61   : > { %410 = vrot.lane.b32.xlu0 %v406_v50, %s1933_s6  ;;  %v189_v50 = vmul.f32 %v187_v47, %v2002_v2 }
  0x64   : > { %426 = vrot.lane.b32.xlu1 %v421_v52, %s1934_s8 }
  0x65   : > { %424 = vrot.lane.b32.xlu0 %v420_v53, %s1934_s8 }
  0x68   : > { %440 = vrot.lane.b32.xlu1 %v435_v55, %s1935_s10  ;;  %v669_v55 = vmul.f32 %v667_v51, %v2147_v41 }
  0x69   : > { %438 = vrot.lane.b32.xlu0 %v434_v56, %s1935_s10  ;;  %v668_v56 = vmul.f32 %v667_v51, %v2150_v44 }
  0x6c   : > { %454 = vrot.lane.b32.xlu1 %v449_v58, %s1936_s12  ;;  %v681_v58 = vstv %s1783_s19  ;;  %s2266_s19 = sld [smem:[#allocation3 + $0x39]] }
  0x6d   : > { %452 = vrot.lane.b32.xlu0 %v448_v59, %s1936_s12  ;;  %v683_v1 = vmul.f32 %v681_v58, %v2147_v41 }
  0x70   : > { %476 = vrot.lane.b32.xlu1 %v471_v63, %s1932_s30  ;;  %v682_v63 = vmul.f32 %v681_v58, %v2150_v44 }
  0x71   : > { %474 = vrot.lane.b32.xlu0 %v470_v0, %s1932_s30 }
  0x74   : > { %490 = vrot.lane.b32.xlu1 %v485_v4, %s1931_s29 }
  0x75   : > { %488 = vrot.lane.b32.xlu0 %v484_v5, %s1931_s29 }
  0x78   : > { %504 = vrot.lane.b32.xlu1 %v499_v7, %s1933_s6  ;;  %v697_v7 = vmul.f32 %v695_v3, %v2147_v41 }
  0x79   : > { %502 = vrot.lane.b32.xlu0 %v498_v8, %s1933_s6  ;;  %v696_v8 = vmul.f32 %v695_v3, %v2150_v44 }
  0x7c   : > { %518 = vrot.lane.b32.xlu1 %v513_v10, %s1934_s8 }
  0x7d   : > { %516 = vrot.lane.b32.xlu0 %v512_v11, %s1934_s8  ;;  %v279_v11 = vstv %s2162_s21  ;;  %s1808_s21 = sld [smem:[#allocation3 + $0x3b]] }
  0x80   : > { %532 = vrot.lane.b32.xlu1 %v527_v13, %s1935_s10 }
  0x81   : > { %530 = vrot.lane.b32.xlu0 %v526_v14, %s1935_s10 }
  0x84   : > { %546 = vrot.lane.b32.xlu1 %v541_v16, %s1936_s12 }
  0x85   : > { %544 = vrot.lane.b32.xlu0 %v540_v17, %s1936_s12  ;;  %v281_v17 = vmul.f32 %v279_v11, %v2027_v20 }
  0x88   : > { %568 = vrot.lane.b32.xlu1 %v563_v23, %s1932_s30  ;;  %v710_v23 = vmul.f32 %v709_v12, %v2150_v44 }
  0x89   : > { %566 = vrot.lane.b32.xlu0 %v562_v24, %s1932_s30 }
  0x8c   : > { %582 = vrot.lane.b32.xlu1 %v577_v26, %s1931_s29  ;;  %v280_v26 = vmul.f32 %v279_v11, %v2030_v22  ;;  %v2196_v22 = vld [vmem:[%s1996_s27 + $0x6] sm:$0xff] }
  0x8d   : > { %580 = vrot.lane.b32.xlu0 %v576_v27, %s1931_s29  ;;  %v723_v27 = vstv %s2170_s23  ;;  %s2294_s23 = sld [smem:[#allocation3 + $0x1c]] }
  0x8e   : > { %v725_v20 = vmul.f32 %v723_v27, %v2147_v41 }
  0x90   : > { %596 = vrot.lane.b32.xlu1 %v591_v29, %s1933_s6 }
  0x91   : > { %594 = vrot.lane.b32.xlu0 %v590_v30, %s1933_s6 }
  0x94   : > { %610 = vrot.lane.b32.xlu1 %v605_v32, %s1934_s8  ;;  %v724_v32 = vmul.f32 %v723_v27, %v2150_v44 }
  0x95   : > { %608 = vrot.lane.b32.xlu0 %v604_v33, %s1934_s8 }
  0x98   : > { %624 = vrot.lane.b32.xlu1 %v619_v35, %s1935_s10  ;;  %v2192_v35 = vld [vmem:[%s1996_s27 + $0xe] sm:$0xff] }
  0x99   : > { %622 = vrot.lane.b32.xlu0 %v618_v36, %s1935_s10  ;;  %v745_v36 = vstv %s2178_s24  ;;  %s2296_s24 = sld [smem:[#allocation3 + $0x3d]] }
  0x9a   : > { %v213_v45 = vpop.permute.xlu1 %212  ;;  %v746_v43 = vmul.f32 %v745_v36, %v2196_v22 }
  0x9b   : > { %v199_v46 = vpop.permute.xlu0 %198 }
  0x9c   : > { %638 = vrot.lane.b32.xlu1 %v633_v38, %s1936_s12  ;;  %v204_v61 = vadd.f32 %v199_v46, %v188_v54 }
  0x9d   : > { %636 = vrot.lane.b32.xlu0 %v632_v39, %s1936_s12  ;;  %v747_v39 = vmul.f32 %v745_v36, %v2192_v35 }
  0x9e   : > { %v215_v52 = vpop.permute.xlu1 %214  ;;  %v218_v6 = vadd.f32 %v213_v45, %v204_v61  ;;  %v759_v45 = vstv %s1789_s25  ;;  %s2302_s25 = sld [smem:[#allocation3 + $0x3e]] }
  0x9f   : > { %v201_v53 = vpop.permute.xlu0 %200 }
  0xa0   : > { %660 = vrot.lane.b32.xlu1 %v655_v48, %s1932_s30  ;;  %v205_v57 = vadd.f32 %v201_v53, %v189_v50  ;;  %v761_v48 = vmul.f32 %v759_v45, %v2192_v35  ;;  %v773_v50 = vstv %s1790_s26  ;;  %s2310_s26 = sld [smem:[#allocation3 + $0x40]] }
  0xa1   : > { %658 = vrot.lane.b32.xlu0 %v654_v49, %s1932_s30  ;;  %v760_v49 = vmul.f32 %v759_v45, %v2196_v22  ;;  %v775_v53 = vmul.f32 %v773_v50, %v2192_v35  ;;  %v774_v54 = vmul.f32 %v773_v50, %v2196_v22  ;;  %v880_v50 = vstv %s1800_s16  ;;  %s2352_s16 = sld [smem:[#allocation3 + $0x23]] }
  0xa2   : > { %v229_v2 = vpop.permute.xlu1 %228  ;;  %v219_v0 = vadd.f32 %v215_v52, %v205_v57  ;;  %v787_v57 = vstv %s1791_s28  ;;  %s1816_s28 = sld [smem:[#allocation3 + $0x41]] }
  0xa3   : > { %v227_v59 = vpop.permute.xlu0 %226 }
  0xa4   : > { %674 = vrot.lane.b32.xlu1 %v669_v55, %s1931_s29  ;;  %v233_v9 = vadd.f32 %v229_v2, %v219_v0  ;;  %v232_v10 = vadd.f32 %v227_v59, %v218_v6 }
  0xa5   : > { %672 = vrot.lane.b32.xlu0 %v668_v56, %s1931_s29 }
  0xa6   : > { %v243_v4 = vpop.permute.xlu1 %242 }
  0xa7   : > { %v241_v5 = vpop.permute.xlu0 %240  ;;  %v247_v15 = vadd.f32 %v243_v4, %v233_v9  ;;  %v371_v4 = vstv %s2206_s4  ;;  %s1817_s4 = sld [smem:[#allocation3 + $0x42]] }
  0xa8   : > { %688 = vrot.lane.b32.xlu1 %v683_v1, %s1933_s6  ;;  %v246_v16 = vadd.f32 %v241_v5, %v232_v10  ;;  %v789_v1 = vmul.f32 %v787_v57, %v2192_v35  ;;  %v801_v5 = vstv %s2208_s5  ;;  %v373_v10 = vmul.f32 %v371_v4, %v2057_v40  ;;  %s1818_s5 = sld [smem:[#allocation3 + $0x43]] }
  0xa9   : > { %686 = vrot.lane.b32.xlu0 %v682_v63, %s1933_s6  ;;  %v788_v63 = vmul.f32 %v787_v57, %v2196_v22  ;;  %v803_v11 = vmul.f32 %v801_v5, %v2192_v35  ;;  %v802_v12 = vmul.f32 %v801_v5, %v2196_v22 }
  0xaa   : > { %v257_v13 = vpop.permute.xlu1 %256 }
  0xab   : > { %v255_v14 = vpop.permute.xlu0 %254  ;;  %v261_v24 = vadd.f32 %v257_v13, %v247_v15  ;;  %v372_v15 = vmul.f32 %v371_v4, %v2060_v42  ;;  %v2240_v42 = vld [vmem:[%s1996_s27 + $0x18] sm:$0xff] }
  0xac   : > { %702 = vrot.lane.b32.xlu1 %v697_v7, %s1934_s8  ;;  %v260_v25 = vadd.f32 %v255_v14, %v246_v16  ;;  %v815_v16 = vstv %s2214_s7  ;;  %s1819_s7 = sld [smem:[#allocation3 + $0x44]] }
  0xad   : > { %700 = vrot.lane.b32.xlu0 %v696_v8, %s1934_s8  ;;  %v817_v40 = vmul.f32 %v815_v16, %v2192_v35 }
  0xae   : > { %v271_v28 = vpop.permute.xlu1 %270 }
  0xaf   : > { %v269_v29 = vpop.permute.xlu0 %268  ;;  %v275_v30 = vadd.f32 %v271_v28, %v261_v24  ;;  %v2236_v28 = vld [vmem:[%s1996_s27 + $0x20] sm:$0xff] }
  0xb0   : > { %v274_v31 = vadd.f32 %v269_v29, %v260_v25  ;;  %716 = vrot.lane.b32.xlu1 %v711_v19, %s1935_s10  ;;  %v816_v25 = vmul.f32 %v815_v16, %v2196_v22  ;;  %v838_v29 = vstv %s2222_s9  ;;  %s1820_s9 = sld [smem:[#allocation3 + $0x45]] }
  0xb1   : > { %714 = vrot.lane.b32.xlu0 %v710_v23, %s1935_s10  ;;  %v283_v33 = vadd.f32 %v281_v17, %v275_v30 }
  0xb2   : > { %v282_v34 = vadd.f32 %v280_v26, %v274_v31  ;;  %v293_v37 = vpop.permute.xlu1 %292 }
  0xb3   : > { %v291_v38 = vpop.permute.xlu0 %290  ;;  %v297_v55 = vadd.f32 %v293_v37, %v283_v33  ;;  %v852_v33 = vstv %s1798_s11  ;;  %s1824_s11 = sld [smem:[#allocation3 + $0x47]] }
  0xb4   : > { %730 = vrot.lane.b32.xlu1 %v725_v20, %s1936_s12  ;;  %v296_v56 = vadd.f32 %v291_v38, %v282_v34  ;;  %v840_v20 = vmul.f32 %v2236_v28, %v838_v29  ;;  %v854_v37 = vmul.f32 %v2236_v28, %v852_v33  ;;  %v853_v38 = vmul.f32 %v2240_v42, %v852_v33 }
  0xb5   : > { %728 = vrot.lane.b32.xlu0 %v724_v32, %s1936_s12  ;;  %v839_v32 = vmul.f32 %v2240_v42, %v838_v29 }
  0xb6   : > { %v307_v46 = vpop.permute.xlu1 %306 }
  0xb7   : > { %v305_v47 = vpop.permute.xlu0 %304  ;;  %v311_v59 = vadd.f32 %v307_v46, %v297_v55  ;;  %v882_v55 = vmul.f32 %v2236_v28, %v880_v50 }
  0xb8   : > { %752 = vrot.lane.b32.xlu1 %v747_v39, %s1932_s30  ;;  %v310_v61 = vadd.f32 %v305_v47, %v296_v56  ;;  %v866_v39 = vstv %s1799_s13  ;;  %v881_v56 = vmul.f32 %v2240_v42, %v880_v50  ;;  %s2350_s13 = sld [smem:[#allocation3 + $0x48]] }
  0xb9   : > { %750 = vrot.lane.b32.xlu0 %v746_v43, %s1932_s30  ;;  %v868_v46 = vmul.f32 %v2236_v28, %v866_v39  ;;  %v867_v47 = vmul.f32 %v2240_v42, %v866_v39  ;;  %v972_v39 = vstv %s1809_s22  ;;  %s2404_s22 = sld [smem:[#allocation3 + $0x4f]] }
  0xba   : > { %v321_v51 = vpop.permute.xlu1 %320 }
  0xbb   : > { %v319_v52 = vpop.permute.xlu0 %318  ;;  %v325_v0 = vadd.f32 %v321_v51, %v311_v59  ;;  %v894_v59 = vstv %s2252_s18  ;;  %s2371_s18 = sld [smem:[#allocation3 + $0x4a]] }
  0xbc   : > { %766 = vrot.lane.b32.xlu1 %v761_v48, %s1931_s29  ;;  %v324_v3 = vadd.f32 %v319_v52, %v310_v61  ;;  %v896_v4 = vmul.f32 %v2236_v28, %v894_v59  ;;  %v895_v5 = vmul.f32 %v2240_v42, %v894_v59 }
  0xbd   : > { %764 = vrot.lane.b32.xlu0 %v760_v49, %s1931_s29 }
  0xbe   : > { %v335_v58 = vpop.permute.xlu1 %334 }
  0xbf   : > { %v333_v2 = vpop.permute.xlu0 %332  ;;  %v339_v8 = vadd.f32 %v335_v58, %v325_v0 }
  0xc0   : > { %780 = vrot.lane.b32.xlu1 %v775_v53, %s1933_s6  ;;  %v338_v9 = vadd.f32 %v333_v2, %v324_v3  ;;  %v463_v2 = vstv %s2250_s17  ;;  %s2364_s17 = sld [smem:[#allocation3 + $0x49]] }
  0xc1   : > { %778 = vrot.lane.b32.xlu0 %v774_v54, %s1933_s6  ;;  %v465_v3 = vmul.f32 %v463_v2, %v2087_v60 }
  0xc2   : > { %v349_v6 = vpop.permute.xlu1 %348 }
  0xc3   : > { %v347_v7 = vpop.permute.xlu0 %346  ;;  %v353_v13 = vadd.f32 %v349_v6, %v339_v8  ;;  %v464_v8 = vmul.f32 %v463_v2, %v2090_v62  ;;  %v2284_v62 = vld [vmem:[%s1996_s27 + $0x19] sm:$0xff] }
  0xc4   : > { %794 = vrot.lane.b32.xlu1 %v789_v1, %s1934_s8  ;;  %v352_v14 = vadd.f32 %v347_v7, %v338_v9  ;;  %v908_v9 = vstv %s2258_s1  ;;  %s2379_s1 = sld [smem:[#allocation3 + $0x4b]] }
  0xc5   : > { %792 = vrot.lane.b32.xlu0 %v788_v63, %s1934_s8  ;;  %v910_v60 = vmul.f32 %v2236_v28, %v908_v9 }
  0xc6   : > { %v363_v17 = vpop.permute.xlu1 %362 }
  0xc7   : > { %v361_v19 = vpop.permute.xlu0 %360  ;;  %v367_v23 = vadd.f32 %v363_v17, %v353_v13  ;;  %v2280_v17 = vld [vmem:[%s1996_s27 + $0x21] sm:$0xff] }
  0xc8   : > { %v366_v24 = vadd.f32 %v361_v19, %v352_v14  ;;  %808 = vrot.lane.b32.xlu1 %v803_v11, %s1935_s10  ;;  %v909_v14 = vmul.f32 %v2240_v42, %v908_v9  ;;  %v930_v19 = vstv %s2266_s19  ;;  %s2388_s19 = sld [smem:[#allocation3 + $0x4c]] }
  0xc9   : > { %806 = vrot.lane.b32.xlu0 %v802_v12, %s1935_s10  ;;  %v375_v26 = vadd.f32 %v373_v10, %v367_v23 }
  0xca   : > { %v374_v27 = vadd.f32 %v372_v15, %v366_v24  ;;  %v385_v30 = vpop.permute.xlu1 %384 }
  0xcb   : > { %v383_v31 = vpop.permute.xlu0 %382  ;;  %v389_v48 = vadd.f32 %v385_v30, %v375_v26  ;;  %v944_v26 = vstv %s1807_s20  ;;  %s2394_s20 = sld [smem:[#allocation3 + $0x2a]] }
  0xcc   : > { %822 = vrot.lane.b32.xlu1 %v817_v40, %s1936_s12  ;;  %v388_v49 = vadd.f32 %v383_v31, %v374_v27  ;;  %v932_v40 = vmul.f32 %v2280_v17, %v930_v19  ;;  %v946_v30 = vmul.f32 %v2280_v17, %v944_v26  ;;  %v945_v31 = vmul.f32 %v2284_v62, %v944_v26 }
  0xcd   : > { %820 = vrot.lane.b32.xlu0 %v816_v25, %s1936_s12  ;;  %v931_v25 = vmul.f32 %v2284_v62, %v930_v19 }
  0xce   : > { %v399_v34 = vpop.permute.xlu1 %398 }
  0xcf   : > { %v397_v36 = vpop.permute.xlu0 %396  ;;  %v403_v53 = vadd.f32 %v399_v34, %v389_v48  ;;  %v974_v48 = vmul.f32 %v2280_v17, %v972_v39 }
  0xd0   : > { %845 = vrot.lane.b32.xlu1 %v840_v20, %s1932_s30  ;;  %v402_v54 = vadd.f32 %v397_v36, %v388_v49  ;;  %v958_v20 = vstv %s1808_s21  ;;  %v973_v49 = vmul.f32 %v2284_v62, %v972_v39  ;;  %s2397_s21 = sld [smem:[#allocation3 + $0x4e]] }
  0xd1   : > { %843 = vrot.lane.b32.xlu0 %v839_v32, %s1932_s30  ;;  %v960_v34 = vmul.f32 %v2280_v17, %v958_v20  ;;  %v959_v36 = vmul.f32 %v2284_v62, %v958_v20 }
  0xd2   : > { %v413_v43 = vpop.permute.xlu1 %412 }
  0xd3   : > { %v411_v45 = vpop.permute.xlu0 %410  ;;  %v417_v57 = vadd.f32 %v413_v43, %v403_v53  ;;  %v986_v53 = vstv %s2296_s24  ;;  %s1836_s24 = sld [smem:[#allocation3 + $0x51]] }
  0xd4   : > { %859 = vrot.lane.b32.xlu1 %v854_v37, %s1931_s29  ;;  %v416_v58 = vadd.f32 %v411_v45, %v402_v54  ;;  %v988_v2 = vmul.f32 %v2280_v17, %v986_v53  ;;  %v987_v59 = vmul.f32 %v2284_v62, %v986_v53  ;;  %v2362_v53 = vld [vmem:[%s1996_s27 + $0x1b] sm:$0xff] }
  0xd5   : > { %857 = vrot.lane.b32.xlu0 %v853_v38, %s1931_s29 }
  0xd6   : > { %v427_v51 = vpop.permute.xlu1 %426 }
  0xd7   : > { %v425_v52 = vpop.permute.xlu0 %424  ;;  %v431_v63 = vadd.f32 %v427_v51, %v417_v57 }
  0xd8   : > { %873 = vrot.lane.b32.xlu1 %v868_v46, %s1933_s6  ;;  %v430_v0 = vadd.f32 %v425_v52, %v416_v58  ;;  %v555_v52 = vstv %s2294_s23  ;;  %s2418_s23 = sld [smem:[#allocation3 + $0x50]] }
  0xd9   : > { %871 = vrot.lane.b32.xlu0 %v867_v47, %s1933_s6  ;;  %v557_v58 = vmul.f32 %v555_v52, %v2117_v18 }
  0xda   : > { %v441_v61 = vpop.permute.xlu1 %440 }
  0xdb   : > { %v439_v1 = vpop.permute.xlu0 %438  ;;  %v445_v6 = vadd.f32 %v441_v61, %v431_v63  ;;  %v556_v63 = vmul.f32 %v555_v52, %v2120_v21  ;;  %v2328_v21 = vld [vmem:[%s1996_s27 + $0x1a] sm:$0xff]  ;;  %v1114_v52 = vstv %s1824_s11  ;;  %s1846_s11 = sld [smem:[#allocation3 + $0x59]] }
  0xdc   : > { %887 = vrot.lane.b32.xlu1 %v882_v55, %s1934_s8  ;;  %v444_v7 = vadd.f32 %v439_v1, %v430_v0  ;;  %v1000_v0 = vstv %s2302_s25  ;;  %s2432_s25 = sld [smem:[#allocation3 + $0x31]] }
  0xdd   : > { %885 = vrot.lane.b32.xlu0 %v881_v56, %s1934_s8  ;;  %v1002_v18 = vmul.f32 %v2280_v17, %v1000_v0 }
  0xde   : > { %v455_v10 = vpop.permute.xlu1 %454 }
  0xdf   : > { %v453_v11 = vpop.permute.xlu0 %452  ;;  %v459_v12 = vadd.f32 %v455_v10, %v445_v6  ;;  %v2324_v10 = vld [vmem:[%s1996_s27 + $0x22] sm:$0xff] }
  0xe0   : > { %v458_v13 = vadd.f32 %v453_v11, %v444_v7  ;;  %901 = vrot.lane.b32.xlu1 %v896_v4, %s1935_s10  ;;  %v1001_v7 = vmul.f32 %v2284_v62, %v1000_v0  ;;  %v1022_v11 = vstv %s2310_s26  ;;  %s2434_s26 = sld [smem:[#allocation3 + $0x52]] }
  0xe1   : > { %899 = vrot.lane.b32.xlu0 %v895_v5, %s1935_s10  ;;  %v467_v15 = vadd.f32 %v465_v3, %v459_v12 }
  0xe2   : > { %v466_v16 = vadd.f32 %v464_v8, %v458_v13  ;;  %v477_v23 = vpop.permute.xlu1 %476 }
  0xe3   : > { %v475_v24 = vpop.permute.xlu0 %474  ;;  %v481_v37 = vadd.f32 %v477_v23, %v467_v15  ;;  %v1036_v15 = vstv %s1816_s28  ;;  %s2440_s28 = sld [smem:[#allocation3 + $0x53]] }
  0xe4   : > { %915 = vrot.lane.b32.xlu1 %v910_v60, %s1936_s12  ;;  %v480_v38 = vadd.f32 %v475_v24, %v466_v16  ;;  %v1024_v60 = vmul.f32 %v2324_v10, %v1022_v11  ;;  %v1038_v23 = vmul.f32 %v2324_v10, %v1036_v15  ;;  %v1037_v24 = vmul.f32 %v2328_v21, %v1036_v15 }
  0xe5   : > { %913 = vrot.lane.b32.xlu0 %v909_v14, %s1936_s12  ;;  %v1023_v14 = vmul.f32 %v2328_v21, %v1022_v11 }
  0xe6   : > { %v491_v27 = vpop.permute.xlu1 %490 }
  0xe7   : > { %v489_v29 = vpop.permute.xlu0 %488  ;;  %v495_v46 = vadd.f32 %v491_v27, %v481_v37 }
  0xe8   : > { %937 = vrot.lane.b32.xlu1 %v932_v40, %s1932_s30  ;;  %v494_v47 = vadd.f32 %v489_v29, %v480_v38  ;;  %v1050_v40 = vstv %s1817_s4  ;;  %s2448_s4 = sld [smem:[#allocation3 + $0x55]] }
  0xe9   : > { %935 = vrot.lane.b32.xlu0 %v931_v25, %s1932_s30  ;;  %v1052_v27 = vmul.f32 %v2324_v10, %v1050_v40  ;;  %v1051_v29 = vmul.f32 %v2328_v21, %v1050_v40 }
  0xea   : > { %v505_v32 = vpop.permute.xlu1 %504 }
  0xeb   : > { %v503_v33 = vpop.permute.xlu0 %502  ;;  %v509_v50 = vadd.f32 %v505_v32, %v495_v46 }
  0xec   : > { %951 = vrot.lane.b32.xlu1 %v946_v30, %s1931_s29  ;;  %v508_v51 = vadd.f32 %v503_v33, %v494_v47  ;;  %v1064_v30 = vstv %s1818_s5  ;;  %s2457_s5 = sld [smem:[#allocation3 + $0x56]] }
  0xed   : > { %949 = vrot.lane.b32.xlu0 %v945_v31, %s1931_s29  ;;  %v1066_v32 = vmul.f32 %v2324_v10, %v1064_v30  ;;  %v1065_v33 = vmul.f32 %v2328_v21, %v1064_v30 }
  0xee   : > { %v519_v43 = vpop.permute.xlu1 %518 }
  0xef   : > { %v517_v45 = vpop.permute.xlu0 %516  ;;  %v523_v56 = vadd.f32 %v519_v43, %v509_v50  ;;  %v1092_v43 = vstv %s1820_s9  ;;  %s1845_s9 = sld [smem:[#allocation3 + $0x58]] }
  0xf0   : > { %965 = vrot.lane.b32.xlu1 %v960_v34, %s1933_s6  ;;  %v522_v57 = vadd.f32 %v517_v45, %v508_v51  ;;  %v1078_v34 = vstv %s1819_s7  ;;  %v1094_v47 = vmul.f32 %v2324_v10, %v1092_v43  ;;  %v2359_v51 = vld [vmem:[%s1996_s27 + $0x23] sm:$0xff]  ;;  %s1844_s7 = sld [smem:[#allocation3 + $0x57]] }
  0xf1   : > { %963 = vrot.lane.b32.xlu0 %v959_v36, %s1933_s6  ;;  %v1080_v38 = vmul.f32 %v2324_v10, %v1078_v34  ;;  %v1079_v39 = vmul.f32 %v2328_v21, %v1078_v34 }
  0xf2   : > { %v533_v54 = vpop.permute.xlu1 %532 }
  0xf3   : > { %v531_v55 = vpop.permute.xlu0 %530  ;;  %v537_v61 = vadd.f32 %v533_v54, %v523_v56 }
  0xf4   : > { %979 = vrot.lane.b32.xlu1 %v974_v48, %s1934_s8  ;;  %v536_v1 = vadd.f32 %v531_v55, %v522_v57  ;;  %v1093_v48 = vmul.f32 %v2328_v21, %v1092_v43 }
  0xf5   : > { %977 = vrot.lane.b32.xlu0 %v973_v49, %s1934_s8 }
  0xf6   : > { %v547_v3 = vpop.permute.xlu1 %546 }
  0xf7   : > { %v545_v4 = vpop.permute.xlu0 %544  ;;  %v551_v5 = vadd.f32 %v547_v3, %v537_v61 }
  0xf8   : > { %v550_v6 = vadd.f32 %v545_v4, %v536_v1  ;;  %993 = vrot.lane.b32.xlu1 %v988_v2, %s1935_s10  ;;  %v1115_v2 = vmul.f32 %v2362_v53, %v1114_v52  ;;  %v1128_v1 = vstv %s2350_s13  ;;  %s1847_s13 = sld [smem:[#allocation3 + $0x5a]] }
  0xf9   : > { %991 = vrot.lane.b32.xlu0 %v987_v59, %s1935_s10  ;;  %v559_v8 = vadd.f32 %v557_v58, %v551_v5  ;;  %v1116_v58 = vmul.f32 %v2359_v51, %v1114_v52  ;;  %v647_v5 = vstv %s2352_s16  ;;  %v2412_v52 = vld [vmem:[%s1996_s27 + $0x24] sm:$0xff]  ;;  %s1851_s16 = sld [smem:[#allocation3 + $0x5c]] }
  0xfa   : > { %v558_v9 = vadd.f32 %v556_v63, %v550_v6  ;;  %v569_v12 = vpop.permute.xlu1 %568  ;;  %v1130_v6 = vmul.f32 %v2359_v51, %v1128_v1 }
  0xfb   : > { %v567_v13 = vpop.permute.xlu0 %566  ;;  %v573_v49 = vadd.f32 %v569_v12, %v559_v8 }
  0xfc   : > { %1007 = vrot.lane.b32.xlu1 %v1002_v18, %s1936_s12  ;;  %v572_v50 = vadd.f32 %v567_v13, %v558_v9  ;;  %v1129_v18 = vmul.f32 %v2362_v53, %v1128_v1  ;;  %v1142_v9 = vstv %s2364_s17  ;;  %v649_v13 = vmul.f32 %v647_v5, %v2147_v41  ;;  %s1852_s17 = sld [smem:[#allocation3 + $0x5d]] }
  0xfd   : > { %1005 = vrot.lane.b32.xlu0 %v1001_v7, %s1936_s12 }
  0xfe   : > { %v583_v16 = vpop.permute.xlu1 %582 }
  0xff   : > { %v581_v19 = vpop.permute.xlu0 %580  ;;  %v587_v56 = vadd.f32 %v583_v16, %v573_v49  ;;  %v1144_v16 = vmul.f32 %v2359_v51, %v1142_v9 }
 0x100   : > { %1029 = vrot.lane.b32.xlu1 %v1024_v60, %s1932_s30  ;;  %v586_v57 = vadd.f32 %v581_v19, %v572_v50  ;;  %v1143_v19 = vmul.f32 %v2362_v53, %v1142_v9  ;;  %v739_v50 = vstv %s2394_s20  ;;  %v1234_v9 = vstv %s2418_s23  ;;  %s1473_s20 = sld [smem:[#allocation2]] }
 0x101   : > { %1027 = vrot.lane.b32.xlu0 %v1023_v14, %s1932_s30  ;;  %v648_v14 = vmul.f32 %v647_v5, %v2150_v44 }
 0x102   : > { %v597_v25 = vpop.permute.xlu1 %596 }
 0x103   : > { %v595_v26 = vpop.permute.xlu0 %594  ;;  %v601_v59 = vadd.f32 %v597_v25, %v587_v56 }
 0x104   : > { %1043 = vrot.lane.b32.xlu1 %v1038_v23, %s1931_s29  ;;  %v600_v61 = vadd.f32 %v595_v26, %v586_v57  ;;  %v1156_v23 = vstv %s2371_s18  ;;  %s1853_s18 = sld [smem:[#allocation3 + $0x5e]] }
 0x105   : > { %1041 = vrot.lane.b32.xlu0 %v1037_v24, %s1931_s29  ;;  %v1158_v44 = vmul.f32 %v2359_v51, %v1156_v23  ;;  %v1157_v26 = vmul.f32 %v2362_v53, %v1156_v23 }
 0x106   : > { %v611_v31 = vpop.permute.xlu1 %610 }
 0x107   : > { %v609_v20 = vpop.permute.xlu0 %608  ;;  %v615_v3 = vadd.f32 %v611_v31, %v601_v59  ;;  %v741_v59 = vmul.f32 %v739_v50, %v2192_v35 }
 0x108   : > { %1057 = vrot.lane.b32.xlu1 %v1052_v27, %s1933_s6  ;;  %v614_v4 = vadd.f32 %v609_v20, %v600_v61  ;;  %v1170_v27 = vstv %s2379_s1  ;;  %s1854_s1 = sld [smem:[#allocation3 + $0x5f]] }
 0x109   : > { %1055 = vrot.lane.b32.xlu0 %v1051_v29, %s1933_s6 }
 0x10a   : > { %v625_v36 = vpop.permute.xlu1 %624 }
 0x10b   : > { %v623_v37 = vpop.permute.xlu0 %622  ;;  %v629_v7 = vadd.f32 %v625_v36, %v615_v3 }
 0x10c   : > { %1071 = vrot.lane.b32.xlu1 %v1066_v32, %s1934_s8  ;;  %v628_v8 = vadd.f32 %v623_v37, %v614_v4  ;;  %v1172_v32 = vmul.f32 %v2359_v51, %v1170_v27  ;;  %v1184_v37 = vstv %s2388_s19  ;;  %v1220_v4 = vstv %s2404_s22  ;;  %s1856_s19 = sld [smem:[#allocation3 + $0x61]] }
 0x10d   : > { %1069 = vrot.lane.b32.xlu0 %v1065_v33, %s1934_s8  ;;  %v1171_v33 = vmul.f32 %v2362_v53, %v1170_v27  ;;  %v1222_v35 = vmul.f32 %v2412_v52, %v1220_v4  ;;  %v1262_v27 = vstv %s2434_s26  ;;  %s1940_s26 = smov 64  }
 0x10e   : > { %v639_v45 = vpop.permute.xlu1 %638 }
 0x10f   : > { %v637_v46 = vpop.permute.xlu0 %636  ;;  %v643_v60 = vadd.f32 %v639_v45, %v629_v7 }
 0x110   : > { %1085 = vrot.lane.b32.xlu1 %v1080_v38, %s1935_s10  ;;  %v642_v15 = vadd.f32 %v637_v46, %v628_v8  ;;  %v1186_v46 = vmul.f32 %v2359_v51, %v1184_v37 }
 0x111   : > { %1083 = vrot.lane.b32.xlu0 %v1079_v39, %s1935_s10  ;;  %v651_v25 = vadd.f32 %v649_v13, %v643_v60 }
 0x112   : > { %v661_v54 = vpop.permute.xlu1 %660  ;;  %v650_v41 = vadd.f32 %v648_v14, %v642_v15  ;;  %v1248_v15 = vstv %s1836_s24 }
 0x113   : > { %v659_v55 = vpop.permute.xlu0 %658  ;;  %v665_v31 = vadd.f32 %v661_v54, %v651_v25  ;;  %v1206_v54 = vstv %s2397_s21  ;;  %s1745_s21 = sshll.u32 %s2610_s15, 1  ;;  %s1938_s15 = smov 16  }
 0x114   : > { %1099 = vrot.lane.b32.xlu1 %v1094_v47, %s1936_s12  ;;  %v664_v20 = vadd.f32 %v659_v55, %v650_v41  ;;  %v1185_v47 = vmul.f32 %v2362_v53, %v1184_v37  ;;  %v2416_v55 = vld [vmem:[%s1996_s27 + $0x1c] sm:$0xff]  ;;  %v1208_v61 = vmul.f32 %v2412_v52, %v1206_v54  ;;  %s2568_s24 = scalar_lea.vmem %s2607_s3, %s1745_s21 }
 0x115   : > { %1097 = vrot.lane.b32.xlu0 %v1093_v48, %s1936_s12  ;;  %v1207_v1 = vmul.f32 %v2416_v55, %v1206_v54  ;;  %v1235_v13 = vmul.f32 %v2416_v55, %v1234_v9  ;;  %v1249_v25 = vmul.f32 %v2416_v55, %v1248_v15  ;;  %v2464_v54 = vld [vmem:[%s1996_s27 + $0x25] sm:$0xff] }
 0x116   : > { %v675_v63 = vpop.permute.xlu1 %674 }
 0x117   : > { %v673_v0 = vpop.permute.xlu0 %672  ;;  %v679_v34 = vadd.f32 %v675_v63, %v665_v31 }
 0x118   : > { %1121 = vrot.lane.b32.xlu1 %v1116_v58, %s1932_s30  ;;  %v678_v36 = vadd.f32 %v673_v0, %v664_v20  ;;  %v740_v0 = vmul.f32 %v739_v50, %v2196_v22 }
 0x119   : > { %1119 = vrot.lane.b32.xlu0 %v1115_v2, %s1932_s30 }
 0x11a   : > { %v689_v11 = vpop.permute.xlu1 %688 }
 0x11b   : > { %v687_v12 = vpop.permute.xlu0 %686  ;;  %v693_v43 = vadd.f32 %v689_v11, %v679_v34  ;;  %v1263_v34 = vmul.f32 %v2416_v55, %v1262_v27 }
 0x11c   : > { %1135 = vrot.lane.b32.xlu1 %v1130_v6, %s1931_s29  ;;  %v692_v45 = vadd.f32 %v687_v12, %v678_v36  ;;  %v1236_v12 = vmul.f32 %v2412_v52, %v1234_v9 }
 0x11d   : > { %1133 = vrot.lane.b32.xlu0 %v1129_v18, %s1931_s29  ;;  %v1221_v18 = vmul.f32 %v2416_v55, %v1220_v4 }
 0x11e   : > { %v703_v24 = vpop.permute.xlu1 %702 }
 0x11f   : > { %v701_v40 = vpop.permute.xlu0 %700  ;;  %v707_v48 = vadd.f32 %v703_v24, %v693_v43 }
 0x120   : > { %1149 = vrot.lane.b32.xlu1 %v1144_v16, %s1933_s6  ;;  %v706_v49 = vadd.f32 %v701_v40, %v692_v45  ;;  %v1250_v40 = vmul.f32 %v2412_v52, %v1248_v15 }
 0x121   : > { %1147 = vrot.lane.b32.xlu0 %v1143_v19, %s1933_s6 }
 0x122   : > { %v717_v29 = vpop.permute.xlu1 %716 }
 0x123   : > { %v715_v30 = vpop.permute.xlu0 %714  ;;  %v721_v58 = vadd.f32 %v717_v29, %v707_v48 }
 0x124   : > { %1163 = vrot.lane.b32.xlu1 %v1158_v44, %s1934_s8  ;;  %v720_v2 = vadd.f32 %v715_v30, %v706_v49 }
 0x125   : > { %1161 = vrot.lane.b32.xlu0 %v1157_v26, %s1934_s8  ;;  %v832_v26 = vstv %s2432_s25  ;;  %s1939_s25 = smov 32  }
 0x126   : > { %v731_v38 = vpop.permute.xlu1 %730 }
 0x127   : > { %v729_v39 = vpop.permute.xlu0 %728  ;;  %v735_v63 = vadd.f32 %v731_v38, %v721_v58  ;;  %v833_v38 = vmul.f32 %v2240_v42, %v832_v26  ;;  %v1298_v42 = vstv %s2448_s4  ;;  %s1942_s4 = smov 80  }
 0x128   : > { %1177 = vrot.lane.b32.xlu1 %v1172_v32, %s1935_s10  ;;  %v734_v3 = vadd.f32 %v729_v39, %v720_v2  ;;  %v834_v32 = vmul.f32 %v2236_v28, %v832_v26  ;;  %v1276_v39 = vstv %s2440_s28  ;;  %v1368_v26 = vstv %s1847_s13  ;;  %s1941_s28 = smov 48  }
 0x129   : > { %1175 = vrot.lane.b32.xlu0 %v1171_v33, %s1935_s10  ;;  %v743_v7 = vadd.f32 %v741_v59, %v735_v63  ;;  %v1264_v33 = vmul.f32 %v2412_v52, %v1262_v27  ;;  %v1278_v28 = vmul.f32 %v2412_v52, %v1276_v39  ;;  %v1277_v48 = vmul.f32 %v2416_v55, %v1276_v39 }
 0x12a   : > { %v753_v56 = vpop.permute.xlu1 %752  ;;  %v742_v8 = vadd.f32 %v740_v0, %v734_v3  ;;  %v1312_v63 = vstv %s2457_s5  ;;  %v1404_v39 = vstv %s1852_s17  ;;  %s1943_s5 = smov 96  }
 0x12b   : > { %v751_v57 = vpop.permute.xlu0 %750  ;;  %v757_v60 = vadd.f32 %v753_v56, %v743_v7  ;;  %v2468_v56 = vld [vmem:[%s1996_s27 + $0x1d] sm:$0xff] }
 0x12c   : > { %1191 = vrot.lane.b32.xlu1 %v1186_v46, %s1936_s12  ;;  %v756_v14 = vadd.f32 %v751_v57, %v742_v8 }
 0x12d   : > { %1189 = vrot.lane.b32.xlu0 %v1185_v47, %s1936_s12 }
 0x12e   : > { %v767_v5 = vpop.permute.xlu1 %766 }
 0x12f   : > { %v765_v6 = vpop.permute.xlu0 %764  ;;  %v771_v23 = vadd.f32 %v767_v5, %v757_v60 }
 0x130   : > { %1213 = vrot.lane.b32.xlu1 %v1208_v61, %s1932_s30  ;;  %v770_v24 = vadd.f32 %v765_v6, %v756_v14  ;;  %v1300_v61 = vmul.f32 %v2464_v54, %v1298_v42  ;;  %v1314_v6 = vmul.f32 %v2464_v54, %v1312_v63 }
 0x131   : > { %1211 = vrot.lane.b32.xlu0 %v1207_v1, %s1932_s30  ;;  %v1299_v1 = vmul.f32 %v2468_v56, %v1298_v42 }
 0x132   : > { %v781_v22 = vpop.permute.xlu1 %780 }
 0x133   : > { %v779_v11 = vpop.permute.xlu0 %778  ;;  %v785_v41 = vadd.f32 %v781_v22, %v771_v23 }
 0x134   : > { %1227 = vrot.lane.b32.xlu1 %v1222_v35, %s1931_s29  ;;  %v784_v44 = vadd.f32 %v779_v11, %v770_v24  ;;  %v1313_v35 = vmul.f32 %v2468_v56, %v1312_v63  ;;  %v1354_v24 = vstv %s1846_s11 }
 0x135   : > { %1225 = vrot.lane.b32.xlu0 %v1221_v18, %s1931_s29  ;;  %v1326_v18 = vstv %s1844_s7  ;;  %s1944_s7 = smov 112  }
 0x136   : > { %v795_v16 = vpop.permute.xlu1 %794  ;;  %v1328_v11 = vmul.f32 %v2464_v54, %v1326_v18 }
 0x137   : > { %v793_v19 = vpop.permute.xlu0 %792  ;;  %v799_v31 = vadd.f32 %v795_v16, %v785_v41  ;;  %v1356_v41 = vmul.f32 %v2464_v54, %v1354_v24 }
 0x138   : > { %1241 = vrot.lane.b32.xlu1 %v1236_v12, %s1933_s6  ;;  %v798_v20 = vadd.f32 %v793_v19, %v784_v44  ;;  %v1327_v12 = vmul.f32 %v2468_v56, %v1326_v18  ;;  %v1355_v44 = vmul.f32 %v2468_v56, %v1354_v24 }
 0x139   : > { %1239 = vrot.lane.b32.xlu0 %v1235_v13, %s1933_s6  ;;  %v1340_v13 = vstv %s1845_s9 }
 0x13a   : > { %v809_v29 = vpop.permute.xlu1 %808  ;;  %v1342_v19 = vmul.f32 %v2464_v54, %v1340_v13  ;;  %v1341_v23 = vmul.f32 %v2468_v56, %v1340_v13 }
 0x13b   : > { %v807_v30 = vpop.permute.xlu0 %806  ;;  %v813_v36 = vadd.f32 %v809_v29, %v799_v31  ;;  %v1369_v31 = vmul.f32 %v2468_v56, %v1368_v26 }
 0x13c   : > { %1255 = vrot.lane.b32.xlu1 %v1250_v40, %s1934_s8  ;;  %v812_v37 = vadd.f32 %v807_v30, %v798_v20  ;;  %v1370_v30 = vmul.f32 %v2464_v54, %v1368_v26  ;;  %v2508_v20 = vld [vmem:[%s1996_s27 + $0x26] sm:$0xff] }
 0x13d   : > { %1253 = vrot.lane.b32.xlu0 %v1249_v25, %s1934_s8 }
 0x13e   : > { %v823_v43 = vpop.permute.xlu1 %822 }
 0x13f   : > { %v821_v45 = vpop.permute.xlu0 %820  ;;  %v827_v46 = vadd.f32 %v823_v43, %v813_v36 }
 0x140   : > { %v826_v47 = vadd.f32 %v821_v45, %v812_v37  ;;  %1269 = vrot.lane.b32.xlu1 %v1264_v33, %s1935_s10  ;;  %v2511_v33 = vld [vmem:[%s1996_s27 + $0x1e] sm:$0xff]  ;;  %s1855_s27 = sld [smem:[#allocation3 + $0x60]] }
 0x141   : > { %1267 = vrot.lane.b32.xlu0 %v1263_v34, %s1935_s10  ;;  %v836_v49 = vadd.f32 %v834_v32, %v827_v46  ;;  %v1390_v32 = vstv %s1851_s16  ;;  %v1406_v46 = vmul.f32 %v2508_v20, %v1404_v39 }
 0x142   : > { %v835_v50 = vadd.f32 %v833_v38, %v826_v47  ;;  %v846_v57 = vpop.permute.xlu1 %845  ;;  %v1392_v37 = vmul.f32 %v2508_v20, %v1390_v32  ;;  %v1391_v38 = vmul.f32 %v2511_v33, %v1390_v32  ;;  %v1405_v47 = vmul.f32 %v2511_v33, %v1404_v39 }
 0x143   : > { %v844_v58 = vpop.permute.xlu0 %843  ;;  %v850_v2 = vadd.f32 %v846_v57, %v836_v49  ;;  %v1432_v57 = vstv %s1854_s1 }
 0x144   : > { %v849_v59 = vadd.f32 %v844_v58, %v835_v50  ;;  %1283 = vrot.lane.b32.xlu1 %v1278_v28, %s1936_s12  ;;  %v1418_v28 = vstv %s1853_s18 }
 0x145   : > { %1281 = vrot.lane.b32.xlu0 %v1277_v48, %s1936_s12  ;;  %v1420_v50 = vmul.f32 %v2508_v20, %v1418_v28  ;;  %v1419_v42 = vmul.f32 %v2511_v33, %v1418_v28 }
 0x146   : > { %v860_v0 = vpop.permute.xlu1 %859 }
 0x147   : > { %v858_v3 = vpop.permute.xlu0 %857  ;;  %v864_v4 = vadd.f32 %v860_v0, %v850_v2 }
 0x148   : > { %v863_v5 = vadd.f32 %v858_v3, %v849_v59  ;;  %1305 = vrot.lane.b32.xlu1 %v1300_v61, %s1932_s30  ;;  %v1434_v59 = vmul.f32 %v2508_v20, %v1432_v57  ;;  %v1433_v61 = vmul.f32 %v2511_v33, %v1432_v57 }
 0x149   : > { %1303 = vrot.lane.b32.xlu0 %v1299_v1, %s1932_s30  ;;  %v1446_v1 = vstv %s1855_s27 }
 0x14a   : > { %v874_v7 = vpop.permute.xlu1 %873  ;;  %v1448_v3 = vmul.f32 %v2508_v20, %v1446_v1 }
 0x14b   : > { %v872_v8 = vpop.permute.xlu0 %871  ;;  %v878_v9 = vadd.f32 %v874_v7, %v864_v4  ;;  %v1447_v4 = vmul.f32 %v2511_v33, %v1446_v1 }
 0x14c   : > { %v877_v22 = vadd.f32 %v872_v8, %v863_v5  ;;  %1319 = vrot.lane.b32.xlu1 %v1314_v6, %s1931_s29  ;;  %v1460_v5 = vstv %s1856_s19 }
 0x14d   : > { %1317 = vrot.lane.b32.xlu0 %v1313_v35, %s1931_s29  ;;  %v1462_v18 = vmul.f32 %v2508_v20, %v1460_v5  ;;  %v1461_v7 = vmul.f32 %v2511_v33, %v1460_v5 }
 0x14e   : > { %v888_v60 = vpop.permute.xlu1 %887 }
 0x14f   : > { %v886_v14 = vpop.permute.xlu0 %885  ;;  %v2483_v15 = vadd.f32 %v888_v60, %v878_v9 }
 0x150   : > { %v2485_v16 = vadd.f32 %v886_v14, %v877_v22  ;;  %1333 = vrot.lane.b32.xlu1 %v1328_v11, %s1933_s6 }
 0x151   : > { %1331 = vrot.lane.b32.xlu0 %v1327_v12, %s1933_s6 }
 0x152   : > { %v2491_v40 = vpop.permute.xlu1 %901 }
 0x153   : > { %v2493_v25 = vpop.permute.xlu0 %899  ;;  %v906_v13 = vadd.f32 %v2491_v40, %v2483_v15 }
 0x154   : > { %1347 = vrot.lane.b32.xlu1 %v1342_v19, %s1934_s8  ;;  %v905_v60 = vadd.f32 %v2493_v25, %v2485_v16 }
 0x155   : > { %1345 = vrot.lane.b32.xlu0 %v1341_v23, %s1934_s8 }
 0x156   : > { %v2499_v27 = vpop.permute.xlu1 %915 }
 0x157   : > { %v2501_v29 = vpop.permute.xlu0 %913  ;;  %v920_v24 = vadd.f32 %v2499_v27, %v906_v13 }
 0x158   : > { %1361 = vrot.lane.b32.xlu1 %v1356_v41, %s1935_s10 }
 0x159   : > { %1359 = vrot.lane.b32.xlu0 %v1355_v44, %s1935_s10  ;;  %v919_v44 = vadd.f32 %v2501_v29, %v905_v60 }
 0x15a   : > { %v2513_v34 = vpop.permute.xlu1 %937 }
 0x15b   : > { %v2515_v36 = vpop.permute.xlu0 %935 }
 0x15c   : > { %1375 = vrot.lane.b32.xlu1 %v1370_v30, %s1936_s12 }
 0x15d   : > { %1373 = vrot.lane.b32.xlu0 %v1369_v31, %s1936_s12 }
 0x15e   : > { %v952_v43 = vpop.permute.xlu1 %951 }
 0x15f   : > { %v950_v45 = vpop.permute.xlu0 %949 }
 0x160   : > { %1397 = vrot.lane.b32.xlu1 %v1392_v37, %s1932_s30 }
 0x161   : > { %1395 = vrot.lane.b32.xlu0 %v1391_v38, %s1932_s30  ;;  %s1812_s30 = sld [smem:[#allocation3 + $0x3f]] }
 0x162   : > { %v966_v48 = vpop.permute.xlu1 %965 }
 0x163   : > { %v964_v49 = vpop.permute.xlu0 %963 }
 0x164   : > { %1411 = vrot.lane.b32.xlu1 %v1406_v46, %s1931_s29 }
 0x165   : > { %1409 = vrot.lane.b32.xlu0 %v1405_v47, %s1931_s29  ;;  %s1803_s29 = sld [smem:[#allocation3 + $0x38]] }
 0x166   : > { %v980_v58 = vpop.permute.xlu1 %979 }
 0x167   : > { %v978_v2 = vpop.permute.xlu0 %977  ;;  %v1016_v29 = vstv %s1812_s30 }
 0x168   : > { %1425 = vrot.lane.b32.xlu1 %v1420_v50, %s1933_s6 }
 0x169   : > { %1423 = vrot.lane.b32.xlu0 %v1419_v42, %s1933_s6  ;;  %s1821_s6 = sld [smem:[#allocation3 + $0x46]] }
 0x16a   : > { %v994_v63 = vpop.permute.xlu1 %993 }
 0x16b   : > { %v992_v0 = vpop.permute.xlu0 %991  ;;  %v924_v12 = vstv %s1803_s29 }
 0x16c   : > { %1439 = vrot.lane.b32.xlu1 %v1434_v59, %s1934_s8  ;;  %v926_v23 = vmul.f32 %v2280_v17, %v924_v12  ;;  %v925_v41 = vmul.f32 %v2284_v62, %v924_v12  ;;  %v1018_v59 = vmul.f32 %v2324_v10, %v1016_v29 }
 0x16d   : > { %1437 = vrot.lane.b32.xlu0 %v1433_v61, %s1934_s8  ;;  %s1830_s8 = sld [smem:[#allocation3 + $0x4d]] }
 0x16e   : > { %v1008_v6 = vpop.permute.xlu1 %1007  ;;  %v928_v31 = vadd.f32 %v926_v23, %v920_v24  ;;  %v927_v32 = vadd.f32 %v925_v41, %v919_v44 }
 0x16f   : > { %v1006_v35 = vpop.permute.xlu0 %1005 }
 0x170   : > { %1453 = vrot.lane.b32.xlu1 %v1448_v3, %s1935_s10  ;;  %v942_v40 = vadd.f32 %v2513_v34, %v928_v31  ;;  %v941_v16 = vadd.f32 %v2515_v36, %v927_v32  ;;  %v1017_v34 = vmul.f32 %v2328_v21, %v1016_v29 }
 0x171   : > { %1451 = vrot.lane.b32.xlu0 %v1447_v4, %s1935_s10  ;;  %s1839_s10 = sld [smem:[#allocation3 + $0x54]] }
 0x172   : > { %v1030_v8 = vpop.permute.xlu1 %1029  ;;  %v956_v25 = vadd.f32 %v952_v43, %v942_v40  ;;  %v955_v38 = vadd.f32 %v950_v45, %v941_v16 }
 0x173   : > { %v1028_v9 = vpop.permute.xlu0 %1027 }
 0x174   : > { %1467 = vrot.lane.b32.xlu1 %v1462_v18, %s1936_s12  ;;  %v970_v27 = vadd.f32 %v966_v48, %v956_v25  ;;  %v969_v46 = vadd.f32 %v964_v49, %v955_v38 }
 0x175   : > { %1465 = vrot.lane.b32.xlu0 %v1461_v7, %s1936_s12  ;;  %s1848_s12 = sld [smem:[#allocation3 + $0x5b]] }
 0x176   : > { %v1044_v22 = vpop.permute.xlu1 %1043  ;;  %v984_v62 = vadd.f32 %v980_v58, %v970_v27  ;;  %v983_v47 = vadd.f32 %v978_v2, %v969_v46 }
 0x177   : > { %v1042_v11 = vpop.permute.xlu0 %1041 }
 0x178   : > { %v998_v42 = vadd.f32 %v994_v63, %v984_v62  ;;  %v997_v57 = vadd.f32 %v992_v0, %v983_v47 }
 0x17a   : > { %v1058_v14 = vpop.permute.xlu1 %1057  ;;  %v1012_v61 = vadd.f32 %v1008_v6, %v998_v42  ;;  %v1011_v1 = vadd.f32 %v1006_v35, %v997_v57  ;;  %v1108_v35 = vstv %s1821_s6 }
 0x17b   : > { %v1056_v19 = vpop.permute.xlu0 %1055 }
 0x17c   : > { %v1020_v45 = vadd.f32 %v1018_v59, %v1012_v61  ;;  %v1019_v3 = vadd.f32 %v1017_v34, %v1011_v1 }
 0x17e   : > { %v1072_v26 = vpop.permute.xlu1 %1071  ;;  %v1034_v49 = vadd.f32 %v1030_v8, %v1020_v45  ;;  %v1033_v58 = vadd.f32 %v1028_v9, %v1019_v3  ;;  %v1110_v8 = vmul.f32 %v2359_v51, %v1108_v35  ;;  %v1109_v9 = vmul.f32 %v2362_v53, %v1108_v35 }
 0x17f   : > { %v1070_v30 = vpop.permute.xlu0 %1069  ;;  %v1200_v51 = vstv %s1830_s8 }
 0x180   : > { %v1048_v18 = vadd.f32 %v1044_v22, %v1034_v49  ;;  %v1047_v63 = vadd.f32 %v1042_v11, %v1033_v58  ;;  %v1202_v42 = vmul.f32 %v2412_v52, %v1200_v51 }
 0x182   : > { %v1086_v37 = vpop.permute.xlu1 %1085  ;;  %v1062_v0 = vadd.f32 %v1058_v14, %v1048_v18  ;;  %v1061_v7 = vadd.f32 %v1056_v19, %v1047_v63 }
 0x183   : > { %v1084_v15 = vpop.permute.xlu0 %1083 }
 0x184   : > { %v1076_v12 = vadd.f32 %v1072_v26, %v1062_v0  ;;  %v1075_v21 = vadd.f32 %v1070_v30, %v1061_v7 }
 0x186   : > { %v1100_v17 = vpop.permute.xlu1 %1099  ;;  %v1090_v13 = vadd.f32 %v1086_v37, %v1076_v12  ;;  %v1089_v60 = vadd.f32 %v1084_v15, %v1075_v21 }
 0x187   : > { %v1098_v39 = vpop.permute.xlu0 %1097 }
 0x188   : > { %v1104_v41 = vadd.f32 %v1100_v17, %v1090_v13  ;;  %v1103_v44 = vadd.f32 %v1098_v39, %v1089_v60 }
 0x18a   : > { %v1122_v28 = vpop.permute.xlu1 %1121  ;;  %v1112_v11 = vadd.f32 %v1110_v8, %v1104_v41  ;;  %v1111_v14 = vadd.f32 %v1109_v9, %v1103_v44 }
 0x18b   : > { %v1120_v50 = vpop.permute.xlu0 %1119 }
 0x18c   : > { %v1126_v26 = vadd.f32 %v1122_v28, %v1112_v11  ;;  %v1125_v30 = vadd.f32 %v1120_v50, %v1111_v14  ;;  %v1201_v28 = vmul.f32 %v2416_v55, %v1200_v51  ;;  %v1292_v55 = vstv %s1839_s10 }
 0x18d   : > { %v1294_v21 = vmul.f32 %v2464_v54, %v1292_v55  ;;  %v1293_v35 = vmul.f32 %v2468_v56, %v1292_v55  ;;  %v1384_v54 = vstv %s1848_s12 }
 0x18e   : > { %v1136_v36 = vpop.permute.xlu1 %1135 }
 0x18f   : > { %v1134_v43 = vpop.permute.xlu0 %1133  ;;  %v1140_v40 = vadd.f32 %v1136_v36, %v1126_v26 }
 0x190   : > { %v1139_v37 = vadd.f32 %v1134_v43, %v1125_v30 }
 0x192   : > { %v1150_v4 = vpop.permute.xlu1 %1149 }
 0x193   : > { %v1148_v48 = vpop.permute.xlu0 %1147  ;;  %v1154_v25 = vadd.f32 %v1150_v4, %v1140_v40 }
 0x194   : > { %v1153_v38 = vadd.f32 %v1148_v48, %v1139_v37 }
 0x196   : > { %v1164_v2 = vpop.permute.xlu1 %1163 }
 0x197   : > { %v1162_v5 = vpop.permute.xlu0 %1161  ;;  %v1168_v17 = vadd.f32 %v1164_v2, %v1154_v25 }
 0x198   : > { %v1167_v39 = vadd.f32 %v1162_v5, %v1153_v38  ;;  %v1386_v38 = vmul.f32 %v2508_v20, %v1384_v54 }
 0x19a   : > { %v1178_v10 = vpop.permute.xlu1 %1177 }
 0x19b   : > { %v1176_v6 = vpop.permute.xlu0 %1175  ;;  %v1182_v46 = vadd.f32 %v1178_v10, %v1168_v17  ;;  %v1385_v17 = vmul.f32 %v2511_v33, %v1384_v54 }
 0x19c   : > { %v1181_v62 = vadd.f32 %v1176_v6, %v1167_v39 }
 0x19e   : > { %v1192_v23 = vpop.permute.xlu1 %1191 }
 0x19f   : > { %v1190_v24 = vpop.permute.xlu0 %1189  ;;  %v1196_v47 = vadd.f32 %v1192_v23, %v1182_v46 }
 0x1a0   : > { %v1195_v29 = vadd.f32 %v1190_v24, %v1181_v62 }
 0x1a1   : > { %v1204_v59 = vadd.f32 %v1202_v42, %v1196_v47 }
 0x1a2   : > { %v1214_v31 = vpop.permute.xlu1 %1213  ;;  %v1203_v61 = vadd.f32 %v1201_v28, %v1195_v29 }
 0x1a3   : > { %v1212_v22 = vpop.permute.xlu0 %1211  ;;  %v1218_v36 = vadd.f32 %v1214_v31, %v1204_v59 }
 0x1a4   : > { %v1217_v43 = vadd.f32 %v1212_v22, %v1203_v61 }
 0x1a6   : > { %v1228_v19 = vpop.permute.xlu1 %1227 }
 0x1a7   : > { %v1226_v32 = vpop.permute.xlu0 %1225  ;;  %v1232_v4 = vadd.f32 %v1228_v19, %v1218_v36 }
 0x1a8   : > { %v1231_v48 = vadd.f32 %v1226_v32, %v1217_v43 }
 0x1aa   : > { %v1242_v15 = vpop.permute.xlu1 %1241 }
 0x1ab   : > { %v1240_v16 = vpop.permute.xlu0 %1239  ;;  %v1246_v49 = vadd.f32 %v1242_v15, %v1232_v4 }
 0x1ac   : > { %v1245_v58 = vadd.f32 %v1240_v16, %v1231_v48 }
 0x1ae   : > { %v1256_v27 = vpop.permute.xlu1 %1255 }
 0x1af   : > { %v1254_v53 = vpop.permute.xlu0 %1253  ;;  %v1260_v52 = vadd.f32 %v1256_v27, %v1246_v49 }
 0x1b0   : > { %v1259_v18 = vadd.f32 %v1254_v53, %v1245_v58 }
 0x1b2   : > { %v1270_v50 = vpop.permute.xlu1 %1269 }
 0x1b3   : > { %v1268_v57 = vpop.permute.xlu0 %1267  ;;  %v1274_v63 = vadd.f32 %v1270_v50, %v1260_v52 }
 0x1b4   : > { %v1273_v0 = vadd.f32 %v1268_v57, %v1259_v18 }
 0x1b6   : > { %v1284_v34 = vpop.permute.xlu1 %1283 }
 0x1b7   : > { %v1282_v1 = vpop.permute.xlu0 %1281  ;;  %v1288_v6 = vadd.f32 %v1284_v34, %v1274_v63 }
 0x1b8   : > { %v1287_v12 = vadd.f32 %v1282_v1, %v1273_v0 }
 0x1b9   : > { %v1296_v23 = vadd.f32 %v1294_v21, %v1288_v6 }
 0x1ba   : > { %v1306_v45 = vpop.permute.xlu1 %1305  ;;  %v1295_v24 = vadd.f32 %v1293_v35, %v1287_v12 }
 0x1bb   : > { %v1304_v3 = vpop.permute.xlu0 %1303  ;;  %v1310_v8 = vadd.f32 %v1306_v45, %v1296_v23  ;;  %v1474_v45 = vstv %s1473_s20 }
 0x1bc   : > { %v1309_v9 = vadd.f32 %v1304_v3, %v1295_v24 }
 0x1be   : > { %v1320_v2 = vpop.permute.xlu1 %1319 }
 0x1bf   : > { %v1318_v5 = vpop.permute.xlu0 %1317  ;;  %v1324_v31 = vadd.f32 %v1320_v2, %v1310_v8 }
 0x1c0   : > { %v1323_v22 = vadd.f32 %v1318_v5, %v1309_v9 }
 0x1c2   : > { %v1334_v7 = vpop.permute.xlu1 %1333 }
 0x1c3   : > { %v1332_v10 = vpop.permute.xlu0 %1331  ;;  %v1338_v19 = vadd.f32 %v1334_v7, %v1324_v31  ;;  %v1489_v7 = vlaneseq }
 0x1c4   : > { %v1337_v32 = vadd.f32 %v1332_v10, %v1323_v22  ;;  %v1937_v10 = vmov 1966171168  }
 0x1c5   : > { %v1496_v6 = vunpack.c.l.s4 %v1937_v10  ;;  %v1499_v21 = vshrl.u32 %v1489_v7, 7  ;;  %vm1491_vm0 = vcmp.lt.s32.totalorder %v1489_v7, 16  ;;  %vm1520_vm1 = vcmp.ge.s32.totalorder %v1489_v7, 16 }
 0x1c6   : > { %v1348_v13 = vpop.permute.xlu1 %1347  ;;  %vm1521_vm2 = vcmp.lt.s32.totalorder %v1489_v7, 32  ;;  %vm1528_vm4 = vcmp.ge.s32.totalorder %v1489_v7, 32  ;;  %vm1529_vm5 = vcmp.lt.s32.totalorder %v1489_v7, 48  ;;  %vm1536_vm7 = vcmp.ge.s32.totalorder %v1489_v7, 48 }
 0x1c7   : > { %v1346_v60 = vpop.permute.xlu0 %1345  ;;  %v1352_v26 = vadd.f32 %v1348_v13, %v1338_v19  ;;  %v1497_v12 = vunpack.c.0.s8 %v1496_v6  ;;  %vm1522_vm3 = vmand %vm1520_vm1, %vm1521_vm2  ;;  %vm1537_vm8 = vcmp.lt.s32.totalorder %v1489_v7, 64  ;;  %vm1558_vm9 = vcmp.ge.s32.totalorder %v1489_v7, 64 }
 0x1c8   : > { %v1351_v30 = vadd.f32 %v1346_v60, %v1337_v32  ;;  %vm1530_vm6 = vmand %vm1528_vm4, %vm1529_vm5  ;;  %vm1559_vm10 = vcmp.lt.s32.totalorder %v1489_v7, 80  ;;  %vm1573_vm13 = vcmp.ge.s32.totalorder %v1489_v7, 80  ;;  %vm1574_vm14 = vcmp.lt.s32.totalorder %v1489_v7, 96 }
 0x1c9   : > { %v1500_v35 = vsub.s32 %v1497_v12, %v1499_v21  ;;  %vm1538_vm11 = vmand %vm1536_vm7, %vm1537_vm8  ;;  %vm1582_vm1 = vcmp.lt.s32.totalorder %v1489_v7, 112  ;;  %vm1590_vm4 = vcmp.lt.s32.totalorder %v1489_v7, 128 }
 0x1ca   : > { %v1362_v41 = vpop.permute.xlu1 %1361  ;;  %vm1560_vm12 = vmand %vm1558_vm9, %vm1559_vm10 }
 0x1cb   : > { %v1360_v44 = vpop.permute.xlu0 %1359  ;;  %v1366_v37 = vadd.f32 %v1362_v41, %v1352_v26  ;;  %vm1575_vm15 = vmand %vm1573_vm13, %vm1574_vm14 }
 0x1cc   : > { %v1365_v15 = vadd.f32 %v1360_v44, %v1351_v30 }
 0x1ce   : > { %v1376_v11 = vpop.permute.xlu1 %1375 }
 0x1cf   : > { %v1374_v14 = vpop.permute.xlu0 %1373  ;;  %v1380_v16 = vadd.f32 %v1376_v11, %v1366_v37 }
 0x1d0   : > { %v1379_v25 = vadd.f32 %v1374_v14, %v1365_v15 }
 0x1d1   : > { %v1388_v27 = vadd.f32 %v1386_v38, %v1380_v16 }
 0x1d2   : > { %v1398_v40 = vpop.permute.xlu1 %1397  ;;  %v1387_v53 = vadd.f32 %v1385_v17, %v1379_v25 }
 0x1d3   : > { %v1396_v56 = vpop.permute.xlu0 %1395  ;;  %v1402_v47 = vadd.f32 %v1398_v40, %v1388_v27 }
 0x1d4   : > { %v1401_v29 = vadd.f32 %v1396_v56, %v1387_v53 }
 0x1d6   : > { %v1412_v39 = vpop.permute.xlu1 %1411 }
 0x1d7   : > { %v1410_v51 = vpop.permute.xlu0 %1409  ;;  %v1416_v50 = vadd.f32 %v1412_v39, %v1402_v47 }
 0x1d8   : > { %v1415_v57 = vadd.f32 %v1410_v51, %v1401_v29 }
 0x1da   : > { %v1426_v46 = vpop.permute.xlu1 %1425 }
 0x1db   : > { %v1424_v62 = vpop.permute.xlu0 %1423  ;;  %v1430_v59 = vadd.f32 %v1426_v46, %v1416_v50 }
 0x1dc   : > { %v1429_v61 = vadd.f32 %v1424_v62, %v1415_v57 }
 0x1de   : > { %v1440_v42 = vpop.permute.xlu1 %1439 }
 0x1df   : > { %v1438_v28 = vpop.permute.xlu0 %1437  ;;  %v1444_v20 = vadd.f32 %v1440_v42, %v1430_v59 }
 0x1e0   : > { %v1443_v36 = vadd.f32 %v1438_v28, %v1429_v61 }
 0x1e2   : > { %v1454_v34 = vpop.permute.xlu1 %1453 }
 0x1e3   : > { %v1452_v1 = vpop.permute.xlu0 %1451  ;;  %v1458_v33 = vadd.f32 %v1454_v34, %v1444_v20 }
 0x1e4   : > { %v1457_v43 = vadd.f32 %v1452_v1, %v1443_v36 }
 0x1e6   : > { %v1468_v3 = vpop.permute.xlu1 %1467 }
 0x1e7   : > { %v1466_v4 = vpop.permute.xlu0 %1465  ;;  %v1472_v48 = vadd.f32 %v1468_v3, %v1458_v33 }
 0x1e8   : > { %v1471_v49 = vadd.f32 %v1466_v4, %v1457_v43 }
 0x1e9   : > { %v1476_v58 = vadd.f32 %v1474_v45, %v1472_v48 }
 0x1ea   : > { %v1475_v2 = vadd.f32 %v1474_v45, %v1471_v49 }
 0x1eb   : > { %v1858_v5 = vmul.f32 -1.442695, %v1476_v58 }
 0x1ec   : > { %v1857_v52 = vmul.f32 -1.442695, %v1475_v2 }
 0x1ed   : > { %1895 = vpow2.f32 %v1858_v5 }
 0x1ee   : > { %1897 = vpow2.f32 %v1857_v52 }
 0x1f7   : > { %v1896_v18 = vpop.eup %1895 }
 0x1f8   : > { %v1898_v55 = vpop.eup %1897  ;;  %v1484_v63 = vadd.f32 1.0, %v1896_v18 }
 0x1f9   : > { %v1483_v0 = vadd.f32 1.0, %v1898_v55 }
 0x1fa   : > { %1899 = vrcp.f32 %v1484_v63 }
 0x1fb   : > { %1901 = vrcp.f32 %v1483_v0 }
 0x204   : > { %v1900_v13 = vpop.eup %1899 }
 0x205   : > { %v1902_v60 = vpop.eup %1901  ;;  %v1601_v23 = vrot.slane %v1900_v13, %v1500_v35  ;;  %1593 = vst.msk [vmem:[%s2568_s24 + $0x1] sm:$0x1] %vm1491_vm0, %v1900_v13  ;;  %v1631_v31 = vcombine.high %v1900_v13, %v1900_v13 }
 0x206   : > { %v1501_v24 = vrot.slane %v1902_v60, %v1500_v35  ;;  %1493 = vst.msk [vmem:[%s2568_s24] sm:$0x1] %vm1491_vm0, %v1902_v60  ;;  %v1540_v14 = vcombine.high %v1902_v60, %v1902_v60  ;;  %vm1581_vm0 = vcmp.ge.s32.totalorder %v1489_v7, 96 }
 0x207   : > { %v1602_v41 = vcombine.high %v1601_v23, %v1601_v23  ;;  %v1609_v9 = vrot.slane %v1601_v23, %v1500_v35  ;;  %v1638_v32 = vrot.slane %v1631_v31, %v1500_v35  ;;  %vm1583_vm2 = vmand %vm1581_vm0, %vm1582_vm1 }
 0x208   : > { %v1502_v44 = vcombine.high %v1501_v24, %v1501_v24  ;;  %v1509_v11 = vrot.slane %v1501_v24, %v1500_v35  ;;  %v1547_v30 = vrot.slane %v1540_v14, %v1500_v35 }
 0x209   : > { %v1616_v8 = vrot.slane %v1602_v41, %v1500_v35  ;;  %v1621_v19 = vcombine.high %v1609_v9, %v1609_v9  ;;  %v1645_v54 = vrot.slane %v1638_v32, %v1500_v35  ;;  %v1650_v37 = vcombine.high %v1638_v32, %v1638_v32 }
 0x20a   : > { %v1516_v22 = vrot.slane %v1502_v44, %v1500_v35  ;;  %v1524_v26 = vcombine.high %v1509_v11, %v1509_v11  ;;  %v1554_v40 = vrot.slane %v1547_v30, %v1500_v35  ;;  %v1562_v16 = vcombine.high %v1547_v30, %v1547_v30 }
 0x20b   : > { %1617 = vrot.lane.b32.xlu1 %v1616_v8, %s1938_s15  ;;  %v1626_v56 = vcombine.high %v1616_v8, %v1616_v8  ;;  %v1657_v25 = vrot.slane %v1650_v37, %v1500_v35  ;;  %v1662_v17 = vcombine.high %v1645_v54, %v1645_v54 }
 0x20c   : > { %1517 = vrot.lane.b32.xlu0 %v1516_v22, %s1938_s15  ;;  %v1532_v15 = vcombine.high %v1516_v22, %v1516_v22  ;;  %v1569_v38 = vrot.slane %v1562_v16, %v1500_v35  ;;  %v1577_v39 = vcombine.high %v1554_v40, %v1554_v40 }
 0x20d   : > { %v1667_v51 = vcombine.high %v1657_v25, %v1657_v25 }
 0x20e   : > { %v1585_v27 = vcombine.high %v1569_v38, %v1569_v38 }
 0x20f   : > { %1622 = vrot.lane.b32.xlu1 %v1621_v19, %s1939_s25 }
 0x210   : > { %1525 = vrot.lane.b32.xlu0 %v1524_v26, %s1939_s25 }
 0x213   : > { %1646 = vrot.lane.b32.xlu1 %v1645_v54, %s1940_s26 }
 0x214   : > { %1555 = vrot.lane.b32.xlu0 %v1554_v40, %s1940_s26 }
 0x217   : > { %1627 = vrot.lane.b32.xlu1 %v1626_v56, %s1941_s28 }
 0x218   : > { %1533 = vrot.lane.b32.xlu0 %v1532_v15, %s1941_s28 }
 0x21b   : > { %1658 = vrot.lane.b32.xlu1 %v1657_v25, %s1942_s4 }
 0x21c   : > { %1570 = vrot.lane.b32.xlu0 %v1569_v38, %s1942_s4 }
 0x21f   : > { %1663 = vrot.lane.b32.xlu1 %v1662_v17, %s1943_s5 }
 0x220   : > { %1578 = vrot.lane.b32.xlu0 %v1577_v39, %s1943_s5 }
 0x223   : > { %1668 = vrot.lane.b32.xlu1 %v1667_v51, %s1944_s7 }
 0x224   : > { %1586 = vrot.lane.b32.xlu0 %v1585_v27, %s1944_s7 }
 0x27d   : > { %v1618_v53 = vpop.permute.xlu1 %1617 }
 0x27e   : > { %1620 = vst.msk [vmem:[%s2568_s24 + $0x1] sm:$0x1] %vm1522_vm3, %v1618_v53  ;;  %v1518_v46 = vpop.permute.xlu0 %1517 }
 0x27f   : > { %1523 = vst.msk [vmem:[%s2568_s24] sm:$0x1] %vm1522_vm3, %v1518_v46  ;;  %vm1589_vm3 = vcmp.ge.s32.totalorder %v1489_v7, 112 }
 0x280   : > { %vm1591_vm5 = vmand %vm1589_vm3, %vm1590_vm4 }
 0x281   : > { %v1623_v62 = vpop.permute.xlu1 %1622 }
 0x282   : > { %1625 = vst.msk [vmem:[%s2568_s24 + $0x1] sm:$0x1] %vm1530_vm6, %v1623_v62  ;;  %v1526_v47 = vpop.permute.xlu0 %1525 }
 0x283   : > { %1531 = vst.msk [vmem:[%s2568_s24] sm:$0x1] %vm1530_vm6, %v1526_v47 }
 0x285   : > { %v1647_v29 = vpop.permute.xlu1 %1646 }
 0x286   : > { %v1556_v42 = vpop.permute.xlu0 %1555 }
 0x289   : > { %v1628_v28 = vpop.permute.xlu1 %1627 }
 0x28a   : > { %1630 = vst.msk [vmem:[%s2568_s24 + $0x1] sm:$0x1] %vm1538_vm11, %v1628_v28  ;;  %v1534_v50 = vpop.permute.xlu0 %1533 }
 0x28b   : > { %1539 = vst.msk [vmem:[%s2568_s24] sm:$0x1] %vm1538_vm11, %v1534_v50 }
 0x28c   : > { %1649 = vst.msk [vmem:[%s2568_s24 + $0x1] sm:$0x1] %vm1560_vm12, %v1647_v29  ;;  %1561 = vst.msk [vmem:[%s2568_s24] sm:$0x1] %vm1560_vm12, %v1556_v42 }
 0x28d   : > { %v1659_v57 = vpop.permute.xlu1 %1658 }
 0x28e   : > { %1661 = vst.msk [vmem:[%s2568_s24 + $0x1] sm:$0x1] %vm1575_vm15, %v1659_v57  ;;  %v1571_v59 = vpop.permute.xlu0 %1570 }
 0x28f   : > { %1576 = vst.msk [vmem:[%s2568_s24] sm:$0x1] %vm1575_vm15, %v1571_v59 }
 0x291   : > { %v1664_v61 = vpop.permute.xlu1 %1663 }
 0x292   : > { %1666 = vst.msk [vmem:[%s2568_s24 + $0x1] sm:$0x1] %vm1583_vm2, %v1664_v61  ;;  %v1579_v34 = vpop.permute.xlu0 %1578 }
 0x293   : > { %1584 = vst.msk [vmem:[%s2568_s24] sm:$0x1] %vm1583_vm2, %v1579_v34 }
 0x295   : > { %v1669_v1 = vpop.permute.xlu1 %1668 }
 0x296   : > { %1671 = vst.msk [vmem:[%s2568_s24 + $0x1] sm:$0x1] %vm1591_vm5, %v1669_v1  ;;  %v1587_v20 = vpop.permute.xlu0 %1586 }
 0x297   : > { %1592 = vst.msk [vmem:[%s2568_s24] sm:$0x1] %vm1591_vm5, %v1587_v20 }
 0x298 PF: > { %s15_s14 = sadd.s32 1, %s1928_s14  }
 0x299   : > { %p12_p1 = scmp.ge.s32.totalorder %s15_s14, 4  }
 0x29b   :  { %14 = sbr.rel (!%p12_p1) target bundleno = 3 (0x3), region = 68 }
 0x2a2   :  { %1691 = vsyncpa [#allocation4], 1 }
 0x2a3   :  { %1693 = vsyncpa [#allocation4 + $0x1], 1 }

</bundles_post_ra>
